<compile_context>
chip_gen: v6e
topology: v6e:2x2x1
jax: 0.10.0
libtpu: 0.0.40
codegen_flags: <defaults>
</compile_context>

<pallas_src>
import functools

import jax
import jax.numpy as jnp
from jax import lax
from jax.experimental import pallas as pl
from jax.experimental.pallas import tpu as pltpu

NEG_SLOPE = 1.0 / 64.0   # LeakyReLU(1/64) as in the reference Conv module
POOL_KS = (5, 9, 13)     # SPP kernel sizes
_HALO = 6                # rows of neighbour context needed per tile (= 13 // 2)
_WPAD = 8                # sublane-aligned -inf column border (>= _HALO, multiple of 8)
_HBLK = 8                # row granularity of the halo fetch blocks


def _leaky(v):
    return jnp.where(v >= 0, v, v * NEG_SLOPE)


# ----------------------------------------------------------------------------
# Fused SPP kernel: cv1 -> shared {5,9,13} max-pool pyramid -> cv2
# ----------------------------------------------------------------------------
def _spp_kernel(xc_ref, xt_ref, xb_ref, w1_ref, w2_ref, o_ref, pad_ref, cat_ref):
    # xc_ref : (1, TH, W, C1)      current row tile of the input image
    # xt_ref : (1, 8,  W, C1)      8-row block just above the tile (clamped at top)
    # xb_ref : (1, 8,  W, C1)      8-row block just below the tile (clamped at bottom)
    # w1_ref : (C1, c_)            cv1 1x1 weights
    # w2_ref : (4*c_, C2)          cv2 1x1 weights, rows ordered [y1 | m5 | m9 | m13]
    # o_ref  : (1, TH, W, C2)
    # pad_ref: (TH+12, W+16, c_) f32  -inf padded pyramid scratch, interior at [6:, 8:]
    # cat_ref: (TH*W, 4*c_) f32    lane-concatenated cv2 input
    TH, W = o_ref.shape[1], o_ref.shape[2]
    C1 = xc_ref.shape[3]
    c_ = w1_ref.shape[1]
    C2 = o_ref.shape[3]
    Hp, Wp = pad_ref.shape[0], pad_ref.shape[1]
    neg = jnp.float32(-jnp.inf)

    t = pl.program_id(1)
    top_valid = t > 0
    bot_valid = t < pl.num_programs(1) - 1

    w1 = w1_ref[...]

    def cv1(x2d):
        # (M, C1) -> (M, c_); bf16 inputs feed the MXU directly, accumulation is f32.
        return _leaky(jnp.dot(x2d, w1, preferred_element_type=jnp.float32))

    # ---- -inf column border strips only (interior is fully overwritten below) ----
    pad_ref[:, 0:_WPAD, :] = jnp.full((Hp, _WPAD, c_), neg, jnp.float32)
    pad_ref[:, _WPAD + W:, :] = jnp.full((Hp, _WPAD, c_), neg, jnp.float32)

    # ---- cv1 on the tile and on the two 6-row halos (recomputed; 1x1 is cheap) ----
    y1 = cv1(xc_ref[0].reshape(TH * W, C1))                            # (TH*W, c_) f32
    pad_ref[_HALO:_HALO + TH, _WPAD:_WPAD + W, :] = y1.reshape(TH, W, c_)

    yt = cv1(xt_ref[0].reshape(_HBLK * W, C1)).reshape(_HBLK, W, c_)
    pad_ref[0:_HALO, _WPAD:_WPAD + W, :] = jnp.where(
        top_valid, yt[_HBLK - _HALO:], neg)                            # -inf above image

    yb = cv1(xb_ref[0].reshape(_HBLK * W, C1)).reshape(_HBLK, W, c_)
    pad_ref[_HALO + TH:, _WPAD:_WPAD + W, :] = jnp.where(
        bot_valid, yb[:_HALO], neg)                                    # -inf below image

    # ---- max-pool pyramid --------------------------------------------------------
    # W direction: centred running maxima built from pltpu.roll shifts (XLU slot).
    # The construction is symmetric in the roll direction, and the 8-wide -inf
    # borders absorb every wrapped value that could reach the extracted interior.
    a0 = pad_ref[...]                                                  # (Hp, Wp, c_) f32

    def rollw(v, d):
        return pltpu.roll(v, d % Wp, axis=1)

    cw5 = jnp.maximum(jnp.maximum(a0, jnp.maximum(rollw(a0, 1), rollw(a0, -1))),
                      jnp.maximum(rollw(a0, 2), rollw(a0, -2)))        # radius 2
    cw9 = jnp.maximum(rollw(cw5, 2), rollw(cw5, -2))                   # radius 4
    cw13 = jnp.maximum(rollw(cw9, 2), rollw(cw9, -2))                  # radius 6

    # H direction: forward running maxima via outer-dim slices (no relayout), then a
    # centred extraction; the column extraction at offset 8 is sublane-aligned.
    def hmax(b, k):
        b = jnp.maximum(b[:-1], b[1:])       # window 2
        b = jnp.maximum(b[:-2], b[2:])       # window 4
        b = jnp.maximum(b[:-1], b[1:])       # window 5
        if k == 5:
            return b
        b = jnp.maximum(b[:-4], b[4:])       # window 9
        if k == 9:
            return b
        return jnp.maximum(b[:-4], b[4:])    # window 13

    m5 = hmax(cw5, 5)[4:4 + TH, _WPAD:_WPAD + W, :].reshape(TH * W, c_)
    m9 = hmax(cw9, 9)[2:2 + TH, _WPAD:_WPAD + W, :].reshape(TH * W, c_)
    m13 = hmax(cw13, 13)[:, _WPAD:_WPAD + W, :].reshape(TH * W, c_)

    # ---- cv2: one long-K matmul over the lane-concatenated [y1 | m5 | m9 | m13] ----
    cat_ref[:, 0 * c_:1 * c_] = y1
    cat_ref[:, 1 * c_:2 * c_] = m5
    cat_ref[:, 2 * c_:3 * c_] = m9
    cat_ref[:, 3 * c_:4 * c_] = m13
    out = _leaky(jnp.dot(cat_ref[...], w2_ref[...],
                         preferred_element_type=jnp.float32))          # (TH*W, C2)
    o_ref[...] = out.reshape(1, TH, W, C2).astype(o_ref.dtype)


# ----------------------------------------------------------------------------
# Wrapper: row-tiled grid, halo fetch via clamped BlockSpecs
# ----------------------------------------------------------------------------
def _vmem_estimate(th, W, C1, c_, C2, in_bytes, out_bytes):
    x_tile = th * W * C1 * in_bytes
    halo_tile = _HBLK * W * C1 * in_bytes
    out_tile = th * W * C2 * out_bytes
    weights = (C1 * c_ + 4 * c_ * C2) * in_bytes
    pad = (th + 2 * _HALO) * (W + 2 * _WPAD) * c_ * 4
    cat = th * W * 4 * c_ * 4
    temps = 6 * pad                      # cw5/cw9/cw13 + running-max temporaries
    return 2 * (x_tile + 2 * halo_tile) + 2 * out_tile + weights + pad + cat + temps


def _choose_tile_h(H, W, C1, c_, C2, in_bytes, out_bytes, budget=48 * 2**20):
    # Largest row tile (multiple of 8, divisor of H) whose working set fits a
    # v7x-safe (64 MiB) VMEM budget; also keeps enough grid steps for pipelining.
    best = 8
    for th in range(8, H + 1, 8):
        if H % th == 0 and _vmem_estimate(th, W, C1, c_, C2, in_bytes, out_bytes) <= budget:
            best = th
    return best


def spp_pallas(x_nhwc, w_cv1, w_cv2, *, tile_h=None, out_dtype=None):
    """x_nhwc: (N,H,W,C1); w_cv1: (C1,c_); w_cv2: (4*c_,C2) -> (N,H,W,C2)."""
    N, H, W, C1 = x_nhwc.shape
    c_ = w_cv1.shape[1]
    C2 = w_cv2.shape[1]
    assert w_cv1.shape[0] == C1 and w_cv2.shape[0] == 4 * c_
    assert H % _HBLK == 0 and W % 8 == 0, "H and W must be multiples of 8"

    out_dtype = out_dtype or x_nhwc.dtype
    in_b = x_nhwc.dtype.itemsize
    out_b = jnp.dtype(out_dtype).itemsize
    if tile_h is None:
        tile_h = _choose_tile_h(H, W, C1, c_, C2, in_b, out_b)
    assert H % tile_h == 0 and tile_h % _HBLK == 0 and tile_h >= _HALO

    th_blk = tile_h // _HBLK
    n_row_blk = H // _HBLK
    vmem_limit = int(min(100 * 2**20,
                         max(32 * 2**20,
                             1.25 * _vmem_estimate(tile_h, W, C1, c_, C2, in_b, out_b))))

    return pl.pallas_call(
        _spp_kernel,
        out_shape=jax.ShapeDtypeStruct((N, H, W, C2), out_dtype),
        grid=(N, H // tile_h),
        in_specs=[
            # current row tile
            pl.BlockSpec((1, tile_h, W, C1), lambda n, t: (n, t, 0, 0)),
            # 8-row blocks just above / below the tile; block indices are in units of
            # 8 rows and are clamped at the image boundary (masked to -inf in-kernel).
            pl.BlockSpec((1, _HBLK, W, C1),
                         lambda n, t: (n, jnp.maximum(t * th_blk - 1, 0), 0, 0)),
            pl.BlockSpec((1, _HBLK, W, C1),
                         lambda n, t: (n, jnp.minimum((t + 1) * th_blk, n_row_blk - 1), 0, 0)),
            pl.BlockSpec((C1, c_), lambda n, t: (0, 0)),
            pl.BlockSpec((4 * c_, C2), lambda n, t: (0, 0)),
        ],
        out_specs=pl.BlockSpec((1, tile_h, W, C2), lambda n, t: (n, t, 0, 0)),
        scratch_shapes=[
            pltpu.VMEM((tile_h + 2 * _HALO, W + 2 * _WPAD, c_), jnp.float32),
            pltpu.VMEM((tile_h * W, 4 * c_), jnp.float32),
        ],
        compiler_params=pltpu.CompilerParams(
            dimension_semantics=("parallel", "parallel"),
            vmem_limit_bytes=vmem_limit,
        ),
    )(x_nhwc, x_nhwc, x_nhwc, w_cv1, w_cv2)


# ----------------------------------------------------------------------------
# Public forward: matches the PyTorch module's NCHW interface
# ----------------------------------------------------------------------------
@functools.partial(jax.jit, static_argnames=("tile_h",))
def spp_forward(x_nchw, params, tile_h=None):
    # TODO(synk): keep NHWC end-to-end in the surrounding model; these transposes are
    #             full-tensor HBM round trips the fused kernel otherwise avoids.
    x = jnp.transpose(x_nchw, (0, 2, 3, 1))                  # NCHW -> NHWC
    out = spp_pallas(x, params["w_cv1"], params["w_cv2"], tile_h=tile_h)
    return jnp.transpose(out, (0, 3, 1, 2))                  # NHWC -> NCHW


# ----------------------------------------------------------------------------
# Pure-JAX reference (direct transcription of the PyTorch SPP) for validation
# ----------------------------------------------------------------------------
def spp_reference(x_nchw, params):
    x = jnp.transpose(x_nchw, (0, 2, 3, 1))
    y1 = _leaky(jnp.einsum("nhwc,cd->nhwd", x, params["w_cv1"]))
    pools = [y1]
    for k in POOL_KS:
        r = k // 2
        pools.append(lax.reduce_window(
            y1, -jnp.inf, lax.max,
            window_dimensions=(1, k, k, 1),
            window_strides=(1, 1, 1, 1),
            padding=((0, 0), (r, r), (r, r), (0, 0))))   # -inf pad == PyTorch MaxPool2d
    cat = jnp.concatenate(pools, axis=-1)
    out = _leaky(jnp.einsum("nhwc,cd->nhwd", cat, params["w_cv2"]))
    return jnp.transpose(out, (0, 3, 1, 2))


def init_params(key, c1, c2):
    # torch 1x1 conv weights are (Cout, Cin, 1, 1); stored here as (Cin, Cout),
    # i.e. w_jax = w_torch[:, :, 0, 0].T
    c_ = c1 // 2
    k1, k2 = jax.random.split(key)
    scale = 0.1
    return {
        "w_cv1": scale * jax.random.normal(k1, (c1, c_), jnp.float32),
        "w_cv2": scale * jax.random.normal(k2, (4 * c_, c2), jnp.float32),
    }


if __name__ == "__main__":
    key = jax.random.PRNGKey(0)
    k_x, k_p = jax.random.split(key)

    N, C1, H, W = 2, 4, 16, 16     # NCHW, small shapes consistent with the module
    C2 = 4

    x = jax.random.normal(k_x, (N, C1, H, W), jnp.float32)
    params = init_params(k_p, C1, C2)
    ref = spp_reference(x, params)

    # Row-tiled path (2 tiles per image -> exercises both valid and -inf halos).
    out = jax.block_until_ready(spp_forward(x, params, tile_h=8))
    assert out.shape == (N, C2, H, W), out.shape
    assert jnp.allclose(out, ref, atol=1e-4, rtol=1e-4), float(jnp.max(jnp.abs(out - ref)))

    # Single-tile path (no valid halos) must agree too.
    out1 = jax.block_until_ready(spp_forward(x, params, tile_h=16))
    assert jnp.allclose(out1, ref, atol=1e-4, rtol=1e-4), float(jnp.max(jnp.abs(out1 - ref)))

    print("KERNEL_OK")
</pallas_src>

<mosaic_0001>
module attributes {stable_mosaic.version = 11 : i64} {
  func.func @_spp_kernel(%arg0: i32, %arg1: i32, %arg2: memref<1x8x16x4xf32, #tpu.memory_space<vmem>>, %arg3: memref<1x8x16x4xf32, #tpu.memory_space<vmem>>, %arg4: memref<1x8x16x4xf32, #tpu.memory_space<vmem>>, %arg5: memref<4x2xf32, #tpu.memory_space<vmem>>, %arg6: memref<8x4xf32, #tpu.memory_space<vmem>>, %arg7: memref<1x8x16x4xf32, #tpu.memory_space<vmem>>, %arg8: memref<20x32x2xf32, #tpu.memory_space<vmem>>, %arg9: memref<128x8xf32, #tpu.memory_space<vmem>>) attributes {dimension_semantics = [#tpu.dimension_semantics<parallel>, #tpu.dimension_semantics<parallel>], iteration_bounds = array<i64: 2, 2>, scalar_prefetch = 0 : i64, scratch_operands = 2 : i64, tpu.core_type = #tpu.core_type<tc>, window_params = [{transform_indices = @transform_0, window_bounds = array<i64: 1, 8, 16, 4>}, {transform_indices = @transform_1, window_bounds = array<i64: 1, 8, 16, 4>}, {transform_indices = @transform_2, window_bounds = array<i64: 1, 8, 16, 4>}, {pipeline_mode = #tpu.pipeline_mode<synchronous>, transform_indices = @transform_3, window_bounds = array<i64: 4, 2>}, {pipeline_mode = #tpu.pipeline_mode<synchronous>, transform_indices = @transform_4, window_bounds = array<i64: 8, 4>}, {transform_indices = @transform_5, window_bounds = array<i64: 1, 8, 16, 4>}]} {
    %c0_i32 = arith.constant 0 : i32
    %0 = arith.cmpi sgt, %arg1, %c0_i32 : i32
    %c1_i32 = arith.constant 1 : i32
    %1 = arith.cmpi slt, %arg1, %c1_i32 : i32
    %c0 = arith.constant 0 : index
    %c0_0 = arith.constant 0 : index
    %2 = vector.load %arg5[%c0, %c0_0] : memref<4x2xf32, #tpu.memory_space<vmem>>, vector<4x2xf32>
    %cst = arith.constant 0xFF800000 : f32
    %3 = vector.broadcast %cst : f32 to vector<20x8x2xf32>
    %c0_1 = arith.constant 0 : index
    %c0_2 = arith.constant 0 : index
    %c0_3 = arith.constant 0 : index
    %4 = vector.load %arg8[%c0_1, %c0_2, %c0_3] : memref<20x32x2xf32, #tpu.memory_space<vmem>>, vector<20x8x2xf32>
    tpu.vector_store %arg8[%c0_1, %c0_2, %c0_3], %3 {strides = array<i32>} : memref<20x32x2xf32, #tpu.memory_space<vmem>>, vector<20x8x2xf32>,
    %cst_4 = arith.constant 0xFF800000 : f32
    %5 = vector.broadcast %cst_4 : f32 to vector<20x8x2xf32>
    %c0_5 = arith.constant 0 : index
    %c24 = arith.constant 24 : index
    %c0_6 = arith.constant 0 : index
    %6 = vector.load %arg8[%c0_5, %c24, %c0_6] : memref<20x32x2xf32, #tpu.memory_space<vmem>>, vector<20x8x2xf32>
    tpu.vector_store %arg8[%c0_5, %c24, %c0_6], %5 {strides = array<i32>} : memref<20x32x2xf32, #tpu.memory_space<vmem>>, vector<20x8x2xf32>,
    %c0_7 = arith.constant 0 : index
    %c0_8 = arith.constant 0 : index
    %c0_9 = arith.constant 0 : index
    %c0_10 = arith.constant 0 : index
    %7 = vector.load %arg2[%c0_7, %c0_8, %c0_9, %c0_10] : memref<1x8x16x4xf32, #tpu.memory_space<vmem>>, vector<1x8x16x4xf32>
    %8 = vector.shape_cast %7 : vector<1x8x16x4xf32> to vector<8x16x4xf32>
    %9 = vector.shape_cast %8 : vector<8x16x4xf32> to vector<128x4xf32>
    %cst_11 = arith.constant dense<0.000000e+00> : vector<128x2xf32>
    %10 = tpu.matmul %9, %2, %cst_11 {dimension_numbers = #tpu.dot_dimension_numbers<[1], [0], [0], [1], [0, 0, 1, 1], [], []>} : vector<128x4xf32>, vector<4x2xf32>, vector<128x2xf32> -> vector<128x2xf32>
    %cst_12 = arith.constant 0.000000e+00 : f32
    %11 = vector.broadcast %cst_12 : f32 to vector<128x2xf32>
    %12 = arith.cmpf oge, %10, %11 : vector<128x2xf32>
    %cst_13 = arith.constant 1.562500e-02 : f32
    %13 = vector.broadcast %cst_13 : f32 to vector<128x2xf32>
    %14 = arith.mulf %10, %13 : vector<128x2xf32>
    %15 = arith.select %12, %10, %14 : vector<128x2xi1>, vector<128x2xf32>
    %16 = vector.shape_cast %15 : vector<128x2xf32> to vector<8x16x2xf32>
    %c6 = arith.constant 6 : index
    %c8 = arith.constant 8 : index
    %c0_14 = arith.constant 0 : index
    %17 = vector.load %arg8[%c6, %c8, %c0_14] : memref<20x32x2xf32, #tpu.memory_space<vmem>>, vector<8x16x2xf32>
    tpu.vector_store %arg8[%c6, %c8, %c0_14], %16 {strides = array<i32>} : memref<20x32x2xf32, #tpu.memory_space<vmem>>, vector<8x16x2xf32>,
    %c0_15 = arith.constant 0 : index
    %c0_16 = arith.constant 0 : index
    %c0_17 = arith.constant 0 : index
    %c0_18 = arith.constant 0 : index
    %18 = vector.load %arg3[%c0_15, %c0_16, %c0_17, %c0_18] : memref<1x8x16x4xf32, #tpu.memory_space<vmem>>, vector<1x8x16x4xf32>
    %19 = vector.shape_cast %18 : vector<1x8x16x4xf32> to vector<8x16x4xf32>
    %20 = vector.shape_cast %19 : vector<8x16x4xf32> to vector<128x4xf32>
    %cst_19 = arith.constant dense<0.000000e+00> : vector<128x2xf32>
    %21 = tpu.matmul %20, %2, %cst_19 {dimension_numbers = #tpu.dot_dimension_numbers<[1], [0], [0], [1], [0, 0, 1, 1], [], []>} : vector<128x4xf32>, vector<4x2xf32>, vector<128x2xf32> -> vector<128x2xf32>
    %cst_20 = arith.constant 0.000000e+00 : f32
    %22 = vector.broadcast %cst_20 : f32 to vector<128x2xf32>
    %23 = arith.cmpf oge, %21, %22 : vector<128x2xf32>
    %cst_21 = arith.constant 1.562500e-02 : f32
    %24 = vector.broadcast %cst_21 : f32 to vector<128x2xf32>
    %25 = arith.mulf %21, %24 : vector<128x2xf32>
    %26 = arith.select %23, %21, %25 : vector<128x2xi1>, vector<128x2xf32>
    %27 = vector.shape_cast %26 : vector<128x2xf32> to vector<8x16x2xf32>
    %28 = vector.extract_strided_slice %27 {offsets = [2, 0, 0], sizes = [6, 16, 2], strides = [1, 1, 1]} : vector<8x16x2xf32> to vector<6x16x2xf32>
    %cst_22 = arith.constant 0xFF800000 : f32
    %29 = vector.broadcast %cst_22 : f32 to vector<6x16x2xf32>
    %30 = arith.select %0, %28, %29 : vector<6x16x2xf32>
    %c0_23 = arith.constant 0 : index
    %c8_24 = arith.constant 8 : index
    %c0_25 = arith.constant 0 : index
    %31 = vector.load %arg8[%c0_23, %c8_24, %c0_25] : memref<20x32x2xf32, #tpu.memory_space<vmem>>, vector<6x16x2xf32>
    tpu.vector_store %arg8[%c0_23, %c8_24, %c0_25], %30 {strides = array<i32>} : memref<20x32x2xf32, #tpu.memory_space<vmem>>, vector<6x16x2xf32>,
    %c0_26 = arith.constant 0 : index
    %c0_27 = arith.constant 0 : index
    %c0_28 = arith.constant 0 : index
    %c0_29 = arith.constant 0 : index
    %32 = vector.load %arg4[%c0_26, %c0_27, %c0_28, %c0_29] : memref<1x8x16x4xf32, #tpu.memory_space<vmem>>, vector<1x8x16x4xf32>
    %33 = vector.shape_cast %32 : vector<1x8x16x4xf32> to vector<8x16x4xf32>
    %34 = vector.shape_cast %33 : vector<8x16x4xf32> to vector<128x4xf32>
    %cst_30 = arith.constant dense<0.000000e+00> : vector<128x2xf32>
    %35 = tpu.matmul %34, %2, %cst_30 {dimension_numbers = #tpu.dot_dimension_numbers<[1], [0], [0], [1], [0, 0, 1, 1], [], []>} : vector<128x4xf32>, vector<4x2xf32>, vector<128x2xf32> -> vector<128x2xf32>
    %cst_31 = arith.constant 0.000000e+00 : f32
    %36 = vector.broadcast %cst_31 : f32 to vector<128x2xf32>
    %37 = arith.cmpf oge, %35, %36 : vector<128x2xf32>
    %cst_32 = arith.constant 1.562500e-02 : f32
    %38 = vector.broadcast %cst_32 : f32 to vector<128x2xf32>
    %39 = arith.mulf %35, %38 : vector<128x2xf32>
    %40 = arith.select %37, %35, %39 : vector<128x2xi1>, vector<128x2xf32>
    %41 = vector.shape_cast %40 : vector<128x2xf32> to vector<8x16x2xf32>
    %42 = vector.extract_strided_slice %41 {offsets = [0, 0, 0], sizes = [6, 16, 2], strides = [1, 1, 1]} : vector<8x16x2xf32> to vector<6x16x2xf32>
    %cst_33 = arith.constant 0xFF800000 : f32
    %43 = vector.broadcast %cst_33 : f32 to vector<6x16x2xf32>
    %44 = arith.select %1, %42, %43 : vector<6x16x2xf32>
    %c14 = arith.constant 14 : index
    %c8_34 = arith.constant 8 : index
    %c0_35 = arith.constant 0 : index
    %45 = vector.load %arg8[%c14, %c8_34, %c0_35] : memref<20x32x2xf32, #tpu.memory_space<vmem>>, vector<6x16x2xf32>
    tpu.vector_store %arg8[%c14, %c8_34, %c0_35], %44 {strides = array<i32>} : memref<20x32x2xf32, #tpu.memory_space<vmem>>, vector<6x16x2xf32>,
    %c0_36 = arith.constant 0 : index
    %c0_37 = arith.constant 0 : index
    %c0_38 = arith.constant 0 : index
    %46 = vector.load %arg8[%c0_36, %c0_37, %c0_38] : memref<20x32x2xf32, #tpu.memory_space<vmem>>, vector<20x32x2xf32>
    %c1_i32_39 = arith.constant 1 : i32
    %47 = tpu.dynamic_rotate %46 by %c1_i32_39 dim 1 : vector<20x32x2xf32>, i32 -> vector<20x32x2xf32>
    %c31_i32 = arith.constant 31 : i32
    %48 = tpu.dynamic_rotate %46 by %c31_i32 dim 1 : vector<20x32x2xf32>, i32 -> vector<20x32x2xf32>
    %49 = arith.maximumf %47, %48 : vector<20x32x2xf32>
    %50 = arith.maximumf %46, %49 : vector<20x32x2xf32>
    %c2_i32 = arith.constant 2 : i32
    %51 = tpu.dynamic_rotate %46 by %c2_i32 dim 1 : vector<20x32x2xf32>, i32 -> vector<20x32x2xf32>
    %c30_i32 = arith.constant 30 : i32
    %52 = tpu.dynamic_rotate %46 by %c30_i32 dim 1 : vector<20x32x2xf32>, i32 -> vector<20x32x2xf32>
    %53 = arith.maximumf %51, %52 : vector<20x32x2xf32>
    %54 = arith.maximumf %50, %53 : vector<20x32x2xf32>
    %c2_i32_40 = arith.constant 2 : i32
    %55 = tpu.dynamic_rotate %54 by %c2_i32_40 dim 1 : vector<20x32x2xf32>, i32 -> vector<20x32x2xf32>
    %c30_i32_41 = arith.constant 30 : i32
    %56 = tpu.dynamic_rotate %54 by %c30_i32_41 dim 1 : vector<20x32x2xf32>, i32 -> vector<20x32x2xf32>
    %57 = arith.maximumf %55, %56 : vector<20x32x2xf32>
    %c2_i32_42 = arith.constant 2 : i32
    %58 = tpu.dynamic_rotate %57 by %c2_i32_42 dim 1 : vector<20x32x2xf32>, i32 -> vector<20x32x2xf32>
    %c30_i32_43 = arith.constant 30 : i32
    %59 = tpu.dynamic_rotate %57 by %c30_i32_43 dim 1 : vector<20x32x2xf32>, i32 -> vector<20x32x2xf32>
    %60 = arith.maximumf %58, %59 : vector<20x32x2xf32>
    %61 = vector.extract_strided_slice %54 {offsets = [0, 0, 0], sizes = [19, 32, 2], strides = [1, 1, 1]} : vector<20x32x2xf32> to vector<19x32x2xf32>
    %62 = vector.extract_strided_slice %54 {offsets = [1, 0, 0], sizes = [19, 32, 2], strides = [1, 1, 1]} : vector<20x32x2xf32> to vector<19x32x2xf32>
    %63 = arith.maximumf %61, %62 : vector<19x32x2xf32>
    %64 = vector.extract_strided_slice %63 {offsets = [0, 0, 0], sizes = [17, 32, 2], strides = [1, 1, 1]} : vector<19x32x2xf32> to vector<17x32x2xf32>
    %65 = vector.extract_strided_slice %63 {offsets = [2, 0, 0], sizes = [17, 32, 2], strides = [1, 1, 1]} : vector<19x32x2xf32> to vector<17x32x2xf32>
    %66 = arith.maximumf %64, %65 : vector<17x32x2xf32>
    %67 = vector.extract_strided_slice %66 {offsets = [0, 0, 0], sizes = [16, 32, 2], strides = [1, 1, 1]} : vector<17x32x2xf32> to vector<16x32x2xf32>
    %68 = vector.extract_strided_slice %66 {offsets = [1, 0, 0], sizes = [16, 32, 2], strides = [1, 1, 1]} : vector<17x32x2xf32> to vector<16x32x2xf32>
    %69 = arith.maximumf %67, %68 : vector<16x32x2xf32>
    %70 = vector.extract_strided_slice %69 {offsets = [4, 8, 0], sizes = [8, 16, 2], strides = [1, 1, 1]} : vector<16x32x2xf32> to vector<8x16x2xf32>
    %71 = vector.shape_cast %70 : vector<8x16x2xf32> to vector<128x2xf32>
    %72 = vector.extract_strided_slice %57 {offsets = [0, 0, 0], sizes = [19, 32, 2], strides = [1, 1, 1]} : vector<20x32x2xf32> to vector<19x32x2xf32>
    %73 = vector.extract_strided_slice %57 {offsets = [1, 0, 0], sizes = [19, 32, 2], strides = [1, 1, 1]} : vector<20x32x2xf32> to vector<19x32x2xf32>
    %74 = arith.maximumf %72, %73 : vector<19x32x2xf32>
    %75 = vector.extract_strided_slice %74 {offsets = [0, 0, 0], sizes = [17, 32, 2], strides = [1, 1, 1]} : vector<19x32x2xf32> to vector<17x32x2xf32>
    %76 = vector.extract_strided_slice %74 {offsets = [2, 0, 0], sizes = [17, 32, 2], strides = [1, 1, 1]} : vector<19x32x2xf32> to vector<17x32x2xf32>
    %77 = arith.maximumf %75, %76 : vector<17x32x2xf32>
    %78 = vector.extract_strided_slice %77 {offsets = [0, 0, 0], sizes = [16, 32, 2], strides = [1, 1, 1]} : vector<17x32x2xf32> to vector<16x32x2xf32>
    %79 = vector.extract_strided_slice %77 {offsets = [1, 0, 0], sizes = [16, 32, 2], strides = [1, 1, 1]} : vector<17x32x2xf32> to vector<16x32x2xf32>
    %80 = arith.maximumf %78, %79 : vector<16x32x2xf32>
    %81 = vector.extract_strided_slice %80 {offsets = [0, 0, 0], sizes = [12, 32, 2], strides = [1, 1, 1]} : vector<16x32x2xf32> to vector<12x32x2xf32>
    %82 = vector.extract_strided_slice %80 {offsets = [4, 0, 0], sizes = [12, 32, 2], strides = [1, 1, 1]} : vector<16x32x2xf32> to vector<12x32x2xf32>
    %83 = arith.maximumf %81, %82 : vector<12x32x2xf32>
    %84 = vector.extract_strided_slice %83 {offsets = [2, 8, 0], sizes = [8, 16, 2], strides = [1, 1, 1]} : vector<12x32x2xf32> to vector<8x16x2xf32>
    %85 = vector.shape_cast %84 : vector<8x16x2xf32> to vector<128x2xf32>
    %86 = vector.extract_strided_slice %60 {offsets = [0, 0, 0], sizes = [19, 32, 2], strides = [1, 1, 1]} : vector<20x32x2xf32> to vector<19x32x2xf32>
    %87 = vector.extract_strided_slice %60 {offsets = [1, 0, 0], sizes = [19, 32, 2], strides = [1, 1, 1]} : vector<20x32x2xf32> to vector<19x32x2xf32>
    %88 = arith.maximumf %86, %87 : vector<19x32x2xf32>
    %89 = vector.extract_strided_slice %88 {offsets = [0, 0, 0], sizes = [17, 32, 2], strides = [1, 1, 1]} : vector<19x32x2xf32> to vector<17x32x2xf32>
    %90 = vector.extract_strided_slice %88 {offsets = [2, 0, 0], sizes = [17, 32, 2], strides = [1, 1, 1]} : vector<19x32x2xf32> to vector<17x32x2xf32>
    %91 = arith.maximumf %89, %90 : vector<17x32x2xf32>
    %92 = vector.extract_strided_slice %91 {offsets = [0, 0, 0], sizes = [16, 32, 2], strides = [1, 1, 1]} : vector<17x32x2xf32> to vector<16x32x2xf32>
    %93 = vector.extract_strided_slice %91 {offsets = [1, 0, 0], sizes = [16, 32, 2], strides = [1, 1, 1]} : vector<17x32x2xf32> to vector<16x32x2xf32>
    %94 = arith.maximumf %92, %93 : vector<16x32x2xf32>
    %95 = vector.extract_strided_slice %94 {offsets = [0, 0, 0], sizes = [12, 32, 2], strides = [1, 1, 1]} : vector<16x32x2xf32> to vector<12x32x2xf32>
    %96 = vector.extract_strided_slice %94 {offsets = [4, 0, 0], sizes = [12, 32, 2], strides = [1, 1, 1]} : vector<16x32x2xf32> to vector<12x32x2xf32>
    %97 = arith.maximumf %95, %96 : vector<12x32x2xf32>
    %98 = vector.extract_strided_slice %97 {offsets = [0, 0, 0], sizes = [8, 32, 2], strides = [1, 1, 1]} : vector<12x32x2xf32> to vector<8x32x2xf32>
    %99 = vector.extract_strided_slice %97 {offsets = [4, 0, 0], sizes = [8, 32, 2], strides = [1, 1, 1]} : vector<12x32x2xf32> to vector<8x32x2xf32>
    %100 = arith.maximumf %98, %99 : vector<8x32x2xf32>
    %101 = vector.extract_strided_slice %100 {offsets = [0, 8, 0], sizes = [8, 16, 2], strides = [1, 1, 1]} : vector<8x32x2xf32> to vector<8x16x2xf32>
    %102 = vector.shape_cast %101 : vector<8x16x2xf32> to vector<128x2xf32>
    %c0_44 = arith.constant 0 : index
    %c0_45 = arith.constant 0 : index
    %103 = vector.load %arg9[%c0_44, %c0_45] : memref<128x8xf32, #tpu.memory_space<vmem>>, vector<128x2xf32>
    tpu.vector_store %arg9[%c0_44, %c0_45], %15 {strides = array<i32>} : memref<128x8xf32, #tpu.memory_space<vmem>>, vector<128x2xf32>,
    %c0_46 = arith.constant 0 : index
    %c2 = arith.constant 2 : index
    %104 = vector.load %arg9[%c0_46, %c2] : memref<128x8xf32, #tpu.memory_space<vmem>>, vector<128x2xf32>
    tpu.vector_store %arg9[%c0_46, %c2], %71 {strides = array<i32>} : memref<128x8xf32, #tpu.memory_space<vmem>>, vector<128x2xf32>,
    %c0_47 = arith.constant 0 : index
    %c4 = arith.constant 4 : index
    %105 = vector.load %arg9[%c0_47, %c4] : memref<128x8xf32, #tpu.memory_space<vmem>>, vector<128x2xf32>
    tpu.vector_store %arg9[%c0_47, %c4], %85 {strides = array<i32>} : memref<128x8xf32, #tpu.memory_space<vmem>>, vector<128x2xf32>,
    %c0_48 = arith.constant 0 : index
    %c6_49 = arith.constant 6 : index
    %106 = vector.load %arg9[%c0_48, %c6_49] : memref<128x8xf32, #tpu.memory_space<vmem>>, vector<128x2xf32>
    tpu.vector_store %arg9[%c0_48, %c6_49], %102 {strides = array<i32>} : memref<128x8xf32, #tpu.memory_space<vmem>>, vector<128x2xf32>,
    %c0_50 = arith.constant 0 : index
    %c0_51 = arith.constant 0 : index
    %107 = vector.load %arg9[%c0_50, %c0_51] : memref<128x8xf32, #tpu.memory_space<vmem>>, vector<128x8xf32>
    %c0_52 = arith.constant 0 : index
    %c0_53 = arith.constant 0 : index
    %108 = vector.load %arg6[%c0_52, %c0_53] : memref<8x4xf32, #tpu.memory_space<vmem>>, vector<8x4xf32>
    %cst_54 = arith.constant dense<0.000000e+00> : vector<128x4xf32>
    %109 = tpu.matmul %107, %108, %cst_54 {dimension_numbers = #tpu.dot_dimension_numbers<[1], [0], [0], [1], [0, 0, 1, 1], [], []>} : vector<128x8xf32>, vector<8x4xf32>, vector<128x4xf32> -> vector<128x4xf32>
    %cst_55 = arith.constant 0.000000e+00 : f32
    %110 = vector.broadcast %cst_55 : f32 to vector<128x4xf32>
    %111 = arith.cmpf oge, %109, %110 : vector<128x4xf32>
    %cst_56 = arith.constant 1.562500e-02 : f32
    %112 = vector.broadcast %cst_56 : f32 to vector<128x4xf32>
    %113 = arith.mulf %109, %112 : vector<128x4xf32>
    %114 = arith.select %111, %109, %113 : vector<128x4xi1>, vector<128x4xf32>
    %115 = vector.shape_cast %114 : vector<128x4xf32> to vector<1x8x16x4xf32>
    %c0_57 = arith.constant 0 : index
    %c0_58 = arith.constant 0 : index
    %c0_59 = arith.constant 0 : index
    %c0_60 = arith.constant 0 : index
    %116 = vector.load %arg7[%c0_57, %c0_58, %c0_59, %c0_60] : memref<1x8x16x4xf32, #tpu.memory_space<vmem>>, vector<1x8x16x4xf32>
    tpu.vector_store %arg7[%c0_57, %c0_58, %c0_59, %c0_60], %115 {strides = array<i32>} : memref<1x8x16x4xf32, #tpu.memory_space<vmem>>, vector<1x8x16x4xf32>,
    return
  }
  func.func @transform_0(%arg0: i32, %arg1: i32) -> (i32, i32, i32, i32) {
    %c0_i32 = arith.constant 0 : i32
    %c0_i32_0 = arith.constant 0 : i32
    %c0_i32_1 = arith.constant 0 : i32
    return %arg0, %arg1, %c0_i32, %c0_i32_0 : i32, i32, i32, i32
  }
  func.func @transform_1(%arg0: i32, %arg1: i32) -> (i32, i32, i32, i32) {
    %c1_i32 = arith.constant 1 : i32
    %0 = arith.muli %arg1, %c1_i32 : i32
    %c1_i32_0 = arith.constant 1 : i32
    %1 = arith.subi %0, %c1_i32_0 : i32
    %c0_i32 = arith.constant 0 : i32
    %2 = arith.maxsi %1, %c0_i32 : i32
    %c0_i32_1 = arith.constant 0 : i32
    %c0_i32_2 = arith.constant 0 : i32
    %c0_i32_3 = arith.constant 0 : i32
    return %arg0, %2, %c0_i32_1, %c0_i32_2 : i32, i32, i32, i32
  }
  func.func @transform_2(%arg0: i32, %arg1: i32) -> (i32, i32, i32, i32) {
    %c1_i32 = arith.constant 1 : i32
    %0 = arith.addi %arg1, %c1_i32 : i32
    %c1_i32_0 = arith.constant 1 : i32
    %1 = arith.muli %0, %c1_i32_0 : i32
    %c1_i32_1 = arith.constant 1 : i32
    %2 = arith.minsi %1, %c1_i32_1 : i32
    %c0_i32 = arith.constant 0 : i32
    %c0_i32_2 = arith.constant 0 : i32
    %c0_i32_3 = arith.constant 0 : i32
    return %arg0, %2, %c0_i32, %c0_i32_2 : i32, i32, i32, i32
  }
  func.func @transform_3(%arg0: i32, %arg1: i32) -> (i32, i32) {
    %c0_i32 = arith.constant 0 : i32
    %c0_i32_0 = arith.constant 0 : i32
    %c0_i32_1 = arith.constant 0 : i32
    return %c0_i32, %c0_i32_0 : i32, i32
  }
  func.func @transform_4(%arg0: i32, %arg1: i32) -> (i32, i32) {
    %c0_i32 = arith.constant 0 : i32
    %c0_i32_0 = arith.constant 0 : i32
    %c0_i32_1 = arith.constant 0 : i32
    return %c0_i32, %c0_i32_0 : i32, i32
  }
  func.func @transform_5(%arg0: i32, %arg1: i32) -> (i32, i32, i32, i32) {
    %c0_i32 = arith.constant 0 : i32
    %c0_i32_0 = arith.constant 0 : i32
    %c0_i32_1 = arith.constant 0 : i32
    return %arg0, %arg1, %c0_i32, %c0_i32_0 : i32, i32, i32, i32
  }
}

</mosaic_0001>

<bundles_post_ra>
// kernel: spp_forward.1
= control target key start
LH: loop header
LB: loop body
LE: loop exit
PB: predicated region body
PF: predicated region fallthrough
CT: control target
= control target key end

     0   :  { %s4311_s18 = smov 0   ;;  %s4313_s19 = smov 0   ;;  %s9158_s0 = inlined_call_operand.vmem [shape: f32[2,16,16,4], index: 0, kind: input, shape index: {}, may-alias: {0,1,2}]   ;;  %s9159_s1 = inlined_call_operand.vmem [shape: f32[2,16,16,4], index: 1, kind: input, shape index: {}, may-alias: {0,1,2}]   ;;  %s9160_s2 = inlined_call_operand.vmem [shape: f32[2,16,16,4], index: 2, kind: input, shape index: {}, may-alias: {0,1,2}]   ;;  %s9161_s3 = inlined_call_operand.vmem [shape: f32[4,2], index: 3, kind: input, shape index: {}]   ;;  %s9162_s4 = inlined_call_operand.vmem [shape: f32[8,4], index: 4, kind: input, shape index: {}]   ;;  %s9163_s5 = inlined_call_operand.vmem [shape: f32[2,16,16,4], index: 5, kind: output, shape index: {}]  }
   0x1   :  { %s4315_s20 = smov 0   ;;  %s4317_s21 = smov 0  }
   0x2   :  { %s4319_s22 = smov 0  }
   0x3 LB: > { %s24_s23 = sadd.s32 1, %s4267_s20  ;;  %s27_s24 = sadd.s32 1, %s4271_s21  ;;  %s4275_s22 = sphi %s4319_s22, %s15_s22   ;;  %s4271_s21 = sphi %s4317_s21, %s10553_s21   ;;  %s4267_s20 = sphi %s4315_s20, %s10552_s20   ;;  %s4263_s19 = sphi %s4313_s19, %s10551_s19   ;;  %s4259_s18 = sphi %s4311_s18, %s10550_s18  }
   0x4   : > { %p25_p0 = scmp.ge.s32.totalorder %s24_s23, 2  ;;  %p3912_p1 = scmp.ge.s32.totalorder %s4275_s22, 1 }
   0x5   : > { %p269_p2 = scmp.lt.s32.totalorder %s4275_s22, 5 }
   0x6   : > { %s10555_s23 = smov (%p25_p0, %s24_s23), 0  ;;  %s10557_s24 = smov (!%p25_p0, %s27_s24), %s4271_s21 }
   0x7   : > { %p270_p3 = pnand %p3912_p1, %p269_p2  ;;  %p29_p4 = scmp.ge.s32.totalorder %s10557_s24, 2 }
   0x9   : > { %s10559_s24 = smov (%p29_p4, %s10557_s24), 0  ;;  %273 = sbr.rel (%p270_p3) target bundleno = 1118 (0x45e), region = 40 }
   0xe   : > { %v391_v0 = vld [vmem:[%s9161_s3] sm:$0xf]  ;;  %vm498_vm0 = vcmask 1043456   ;;  %s3913_s27 = sshll.u32 %s4259_s18, 3  ;;  %p334_p5 = scmp.lt.s32.totalorder %s4263_s19, 1  ;;  %vm449_vm1 = vcmask 31744   ;;  %v1409_v46 = vlaneseq }
   0xf   : > { %4067 = vmatprep.subr.msk.mxu0 %vm498_vm0, %v391_v0  ;;  %p336_p6 = scmp.lt.s32.totalorder %s3913_s27, 15  ;;  %4093 = vmatprep.subr.msk.mxu1 %vm498_vm0, %v391_v0  ;;  %s3917_s28 = sadd.s32 4294967295, %s4259_s18  ;;  %vm392_vm2 = vcmask 15360   ;;  %v4277_v45 = vmov -inf  }
  0x10   : > { %4068 = vmatpush3.msk.msra.mxu0 %vm498_vm0, %v391_v0  ;;  %s10561_s19 = smov (!%p334_p5, %s4263_s19), 1  ;;  %4094 = vmatpush3.msk.msra.mxu1 %vm498_vm0, %v391_v0  ;;  %p345_p7 = scmp.gt.s32.totalorder %s3917_s28, 0  ;;  %399 = vst.msk [vmem:[#allocation2 + $0xc0] sm:$0xff] %vm392_vm2, %v4277_v45  ;;  %400 = vst.msk [vmem:[#allocation2 + $0xe0] sm:$0xff] %vm392_vm2, %v4277_v45  ;;  %v4515_v49 = vshrl.u32 %v1409_v46, 7 }
  0x11   : > { %s10563_s27 = smov (!%p336_p6, %s3913_s27), 15  ;;  %4119 = vmatprep.subr.msk.mxu0 %vm498_vm0, %v391_v0  ;;  %s4353_s29 = sshll.u32 %s10561_s19, 5  ;;  %401 = vst.msk [vmem:[#allocation2 + $0x100] sm:$0xff] %vm392_vm2, %v4277_v45  ;;  %402 = vst.msk [vmem:[#allocation2 + $0x120] sm:$0xff] %vm392_vm2, %v4277_v45 }
  0x12   : > { %s3914_s30 = sshll.u32 %s10563_s27, 1  ;;  %s361_s6 = sadd.s32 1, %s4259_s18  ;;  %403 = vst.msk [vmem:[#allocation2 + $0x140] sm:$0xff] %vm392_vm2, %v4277_v45  ;;  %419 = vst.msk [vmem:[#allocation2 + $0xd8] sm:$0xff] %vm392_vm2, %v4277_v45  ;;  %vm1411_vm3 = vcmp.lt.s32.totalorder %v4515_v49, 1  ;;  %vm1572_vm4 = vcmp.lt.s32.totalorder %v4515_v49, 7 }
  0x13   : > { %s4357_s7 = sadd.s32 %s4353_s29, %s3914_s30  ;;  %p362_p8 = scmp.lt.s32.totalorder %s361_s6, 1  ;;  %420 = vst.msk [vmem:[#allocation2 + $0xf8] sm:$0xff] %vm392_vm2, %v4277_v45  ;;  %421 = vst.msk [vmem:[#allocation2 + $0x118] sm:$0xff] %vm392_vm2, %v4277_v45  ;;  %vm1893_vm5 = vcmp.lt.s32.totalorder %v4515_v49, 2  ;;  %vm2054_vm6 = vcmp.lt.s32.totalorder %v4515_v49, 6 }
  0x14   : > { %s3916_s8 = sshll.u32 %s4357_s7, 3  ;;  %s10565_s28 = smov (!%p345_p7, %s3917_s28), 0  ;;  %422 = vst.msk [vmem:[#allocation2 + $0x138] sm:$0xff] %vm392_vm2, %v4277_v45  ;;  %423 = vst.msk [vmem:[#allocation2 + $0x158] sm:$0xff] %vm392_vm2, %v4277_v45 }
  0x15   : > { %s4365_s11 = scalar_lea.vmem %s9158_s0, %s3916_s8  ;;  %s10567_s6 = smov (!%p362_p8, %s361_s6), 1  ;;  %393 = vst.msk [vmem:[#allocation2] sm:$0xff] %vm392_vm2, %v4277_v45  ;;  %394 = vst.msk [vmem:[#allocation2 + $0x20] sm:$0xff] %vm392_vm2, %v4277_v45 }
  0x16   : > { %v433_v1 = vld [vmem:[%s4365_s11] sm:$0xff]  ;;  %v434_v2 = vld [vmem:[%s4365_s11 + $0x8] sm:$0xff]  ;;  %v435_v3 = vld [vmem:[%s4365_s11 + $0x10] sm:$0xff]  ;;  %s3918_s12 = sshll.u32 %s10565_s28, 3  ;;  %s3922_s13 = sshll.u32 %s10567_s6, 3  ;;  %395 = vst.msk [vmem:[#allocation2 + $0x40] sm:$0xff] %vm392_vm2, %v4277_v45 }
  0x17   : > { %4069 = vmatprep.mubr.msk.f32.mxu0 %vm449_vm1, %v433_v1  ;;  %v436_v4 = vld [vmem:[%s4365_s11 + $0x18] sm:$0xff]  ;;  %p350_p9 = scmp.lt.s32.totalorder %s3918_s12, 15  ;;  %v437_v5 = vld [vmem:[%s4365_s11 + $0x20] sm:$0xff]  ;;  %v438_v6 = vld [vmem:[%s4365_s11 + $0x28] sm:$0xff]  ;;  %p367_p10 = scmp.lt.s32.totalorder %s3922_s13, 15  ;;  %396 = vst.msk [vmem:[#allocation2 + $0x60] sm:$0xff] %vm392_vm2, %v4277_v45 }
  0x18   : > { %4070 = vmatmul.mubr.msk.f32.vlgmr.msra.gmra.mxu0 %vm449_vm1, %v434_v2  ;;  %v439_v7 = vld [vmem:[%s4365_s11 + $0x30] sm:$0xff]  ;;  %v440_v8 = vld [vmem:[%s4365_s11 + $0x38] sm:$0xff]  ;;  %v441_v12 = vld [vmem:[%s4365_s11 + $0x40] sm:$0xff]  ;;  %397 = vst.msk [vmem:[#allocation2 + $0x80] sm:$0xff] %vm392_vm2, %v4277_v45  ;;  %p389_p11 = scmp.gt.s32.totalorder %s4259_s18, 0  ;;  %p390_p12 = scmp.lt.s32.totalorder %s4259_s18, 1 }
  0x19   : > { %4120 = vmatpush3.msk.msra.mxu0 %vm498_vm0, %v391_v0  ;;  %4072 = vmatprep.mubr.msk.f32.mxu0 %vm449_vm1, %v435_v3  ;;  %s10569_s12 = smov (!%p350_p9, %s3918_s12), 15  ;;  %s10571_s13 = smov (!%p367_p10, %s3922_s13), 15  ;;  %v442_v15 = vld [vmem:[%s4365_s11 + $0x48] sm:$0xff]  ;;  %v443_v16 = vld [vmem:[%s4365_s11 + $0x50] sm:$0xff]  ;;  %v444_v19 = vld [vmem:[%s4365_s11 + $0x58] sm:$0xff]  ;;  %398 = vst.msk [vmem:[#allocation2 + $0xa0] sm:$0xff] %vm392_vm2, %v4277_v45 }
  0x1a   : > { %s3919_s14 = sshll.u32 %s10569_s12, 1  ;;  %s3923_s26 = sshll.u32 %s10571_s13, 1  ;;  %v445_v20 = vld [vmem:[%s4365_s11 + $0x60] sm:$0xff]  ;;  %v446_v23 = vld [vmem:[%s4365_s11 + $0x68] sm:$0xff]  ;;  %v447_v24 = vld [vmem:[%s4365_s11 + $0x70] sm:$0xff]  ;;  %404 = vst.msk [vmem:[#allocation2 + $0x160] sm:$0xff] %vm392_vm2, %v4277_v45 }
  0x1b   : > { %s354_s15 = sadd.s32 %s3919_s14, %s4353_s29  ;;  %s371_s27 = sadd.s32 %s3923_s26, %s4353_s29  ;;  %v448_v27 = vld [vmem:[%s4365_s11 + $0x78] sm:$0xff]  ;;  %405 = vst.msk [vmem:[#allocation2 + $0x180] sm:$0xff] %vm392_vm2, %v4277_v45  ;;  %406 = vst.msk [vmem:[#allocation2 + $0x1a0] sm:$0xff] %vm392_vm2, %v4277_v45  ;;  %v4511_v47 = vld [vmem:[#allocation2 + $0xc0] sm:$0xff] }
  0x1c   : > { %4073 = vmatmul.mubr.msk.f32.gmra.mxu0 %vm449_vm1, %v436_v4  ;;  %s3921_s16 = sshll.u32 %s354_s15, 3  ;;  %s3925_s28 = sshll.u32 %s371_s27, 3  ;;  %407 = vst.msk [vmem:[#allocation2 + $0x1c0] sm:$0xff] %vm392_vm2, %v4277_v45  ;;  %408 = vst.msk [vmem:[#allocation2 + $0x1e0] sm:$0xff] %vm392_vm2, %v4277_v45  ;;  %v4513_v48 = vld [vmem:[#allocation2 + $0xd8] sm:$0xff]  ;;  %v4518_v50 = vld [vmem:[#allocation2 + $0xe0] sm:$0xff] }
  0x1d   : > { %4075 = vmatprep.mubr.msk.f32.mxu0 %vm449_vm1, %v437_v5  ;;  %s4384_s25 = scalar_lea.vmem %s9159_s1, %s3921_s16  ;;  %s4423_s6 = scalar_lea.vmem %s9160_s2, %s3925_s28  ;;  %409 = vst.msk [vmem:[#allocation2 + $0x200] sm:$0xff] %vm392_vm2, %v4277_v45  ;;  %410 = vst.msk [vmem:[#allocation2 + $0x220] sm:$0xff] %vm392_vm2, %v4277_v45  ;;  %v4520_v51 = vld [vmem:[#allocation2 + $0xf8] sm:$0xff]  ;;  %v4522_v52 = vld [vmem:[#allocation2 + $0x100] sm:$0xff]  ;;  %v9214_v53 = vrot.slane %v4511_v47, 7  ;;  %v9205_v57 = vrot.slane %v4518_v50, 7 }
  0x1e   : > { %v712_v9 = vld [vmem:[%s4384_s25] sm:$0xff]  ;;  %v713_v10 = vld [vmem:[%s4384_s25 + $0x8] sm:$0xff]  ;;  %v714_v11 = vld [vmem:[%s4384_s25 + $0x10] sm:$0xff]  ;;  %411 = vst.msk [vmem:[#allocation2 + $0x240] sm:$0xff] %vm392_vm2, %v4277_v45  ;;  %s4509_s9 = scalar_select %p389_p11, 1, 0 }
  0x1f   : > { %4095 = vmatprep.mubr.msk.f32.mxu1 %vm449_vm1, %v712_v9  ;;  %v715_v13 = vld [vmem:[%s4384_s25 + $0x18] sm:$0xff]  ;;  %v716_v14 = vld [vmem:[%s4384_s25 + $0x20] sm:$0xff]  ;;  %v717_v17 = vld [vmem:[%s4384_s25 + $0x28] sm:$0xff]  ;;  %412 = vst.msk [vmem:[#allocation2 + $0x260] sm:$0xff] %vm392_vm2, %v4277_v45  ;;  %v9204_v58 = vrot.slane %v4522_v52, 7  ;;  %v9217_v60 = vrot.slane %v4513_v48, 7  ;;  %s9109_s17 = scalar_lea.vmem %s9163_s5, %s3916_s8 }
  0x20   : > { %4076 = vmatmul.mubr.msk.f32.gmra.mxu0 %vm449_vm1, %v438_v6  ;;  %4096 = vmatmul.mubr.msk.f32.vlgmr.msra.gmra.mxu1 %vm449_vm1, %v713_v10  ;;  %v718_v18 = vld [vmem:[%s4384_s25 + $0x30] sm:$0xff]  ;;  %v719_v21 = vld [vmem:[%s4384_s25 + $0x38] sm:$0xff]  ;;  %v720_v22 = vld [vmem:[%s4384_s25 + $0x40] sm:$0xff]  ;;  %413 = vst.msk [vmem:[#allocation2 + $0x18] sm:$0xff] %vm392_vm2, %v4277_v45  ;;  %v9176_v0 = vrot.slane %v4520_v51, 7  ;;  %v9213_v1 = vrot.slane %v4511_v47, 1 }
  0x21   : > { %4078 = vmatprep.mubr.msk.f32.mxu0 %vm449_vm1, %v439_v7  ;;  %4098 = vmatprep.mubr.msk.f32.mxu1 %vm449_vm1, %v714_v11  ;;  %v721_v25 = vld [vmem:[%s4384_s25 + $0x48] sm:$0xff]  ;;  %v722_v26 = vld [vmem:[%s4384_s25 + $0x50] sm:$0xff]  ;;  %v980_v28 = vld [vmem:[%s4423_s6] sm:$0xff]  ;;  %414 = vst.msk [vmem:[#allocation2 + $0x38] sm:$0xff] %vm392_vm2, %v4277_v45  ;;  %s4545_s10 = scalar_select %p390_p12, 1, 0  ;;  %v4556_v5 = vsel %vm1411_vm3, %v9217_v60, %v9214_v53 }
  0x22   : > { %v723_v29 = vld [vmem:[%s4384_s25 + $0x58] sm:$0xff]  ;;  %v724_v30 = vld [vmem:[%s4384_s25 + $0x60] sm:$0xff]  ;;  %v981_v31 = vld [vmem:[%s4423_s6 + $0x8] sm:$0xff]  ;;  %415 = vst.msk [vmem:[#allocation2 + $0x58] sm:$0xff] %vm392_vm2, %v4277_v45  ;;  %v4564_v6 = vsel %vm1411_vm3, %v9176_v0, %v9205_v57  ;;  %v9199_v7 = vrot.slane %v4518_v50, 1  ;;  %v9206_v9 = vrot.slane %v4511_v47, 6 }
  0x23   : > { %v982_v32 = vld [vmem:[%s4423_s6 + $0x10] sm:$0xff]  ;;  %v725_v33 = vld [vmem:[%s4384_s25 + $0x68] sm:$0xff]  ;;  %v983_v35 = vld [vmem:[%s4423_s6 + $0x18] sm:$0xff]  ;;  %416 = vst.msk [vmem:[#allocation2 + $0x78] sm:$0xff] %vm392_vm2, %v4277_v45  ;;  %s4278_s18 = smov 2   ;;  %s4279_s11 = smov 4  }
  0x24   : > { %4079 = vmatmul.mubr.msk.f32.gmra.mxu0 %vm449_vm1, %v440_v8  ;;  %4099 = vmatmul.mubr.msk.f32.gmra.mxu1 %vm449_vm1, %v715_v13  ;;  %v726_v34 = vld [vmem:[%s4384_s25 + $0x70] sm:$0xff]  ;;  %v984_v36 = vld [vmem:[%s4423_s6 + $0x20] sm:$0xff]  ;;  %v727_v37 = vld [vmem:[%s4384_s25 + $0x78] sm:$0xff]  ;;  %417 = vst.msk [vmem:[#allocation2 + $0x98] sm:$0xff] %vm392_vm2, %v4277_v45  ;;  %v9196_v8 = vrot.slane %v4522_v52, 1  ;;  %s4280_s12 = smov 6  }
  0x25   : > { %4081 = vmatprep.mubr.msk.f32.mxu0 %vm449_vm1, %v441_v12  ;;  %4101 = vmatprep.mubr.msk.f32.mxu1 %vm449_vm1, %v716_v14  ;;  %v985_v38 = vld [vmem:[%s4423_s6 + $0x28] sm:$0xff]  ;;  %v986_v39 = vld [vmem:[%s4423_s6 + $0x30] sm:$0xff]  ;;  %v987_v40 = vld [vmem:[%s4423_s6 + $0x38] sm:$0xff]  ;;  %418 = vst.msk [vmem:[#allocation2 + $0xb8] sm:$0xff] %vm392_vm2, %v4277_v45 }
  0x26   : > { %v988_v41 = vld [vmem:[%s4423_s6 + $0x40] sm:$0xff]  ;;  %v989_v42 = vld [vmem:[%s4423_s6 + $0x48] sm:$0xff]  ;;  %v990_v43 = vld [vmem:[%s4423_s6 + $0x50] sm:$0xff]  ;;  %424 = vst.msk [vmem:[#allocation2 + $0x178] sm:$0xff] %vm392_vm2, %v4277_v45 }
  0x27   : > { %v991_v44 = vld [vmem:[%s4423_s6 + $0x58] sm:$0xff]  ;;  %425 = vst.msk [vmem:[#allocation2 + $0x198] sm:$0xff] %vm392_vm2, %v4277_v45  ;;  %426 = vst.msk [vmem:[#allocation2 + $0x1b8] sm:$0xff] %vm392_vm2, %v4277_v45  ;;  %v4527_v55 = vld [vmem:[#allocation2 + $0x120] sm:$0xff] }
  0x28   : > { %4082 = vmatmul.mubr.msk.f32.gmra.mxu0 %vm449_vm1, %v442_v15  ;;  %4102 = vmatmul.mubr.msk.f32.gmra.mxu1 %vm449_vm1, %v717_v17  ;;  %427 = vst.msk [vmem:[#allocation2 + $0x1d8] sm:$0xff] %vm392_vm2, %v4277_v45  ;;  %428 = vst.msk [vmem:[#allocation2 + $0x1f8] sm:$0xff] %vm392_vm2, %v4277_v45  ;;  %v4525_v54 = vld [vmem:[#allocation2 + $0x118] sm:$0xff]  ;;  %v9203_v59 = vrot.slane %v4527_v55, 7  ;;  %v4536_v62 = vld [vmem:[#allocation2 + $0x140] sm:$0xff]  ;;  %v9195_v13 = vrot.slane %v4527_v55, 1 }
  0x29   : > { %4084 = vmatprep.mubr.msk.f32.mxu0 %vm449_vm1, %v443_v16  ;;  %4104 = vmatprep.mubr.msk.f32.mxu1 %vm449_vm1, %v718_v18  ;;  %429 = vst.msk [vmem:[#allocation2 + $0x218] sm:$0xff] %vm392_vm2, %v4277_v45  ;;  %430 = vst.msk [vmem:[#allocation2 + $0x238] sm:$0xff] %vm392_vm2, %v4277_v45  ;;  %v4529_v56 = vld [vmem:[#allocation2 + $0x138] sm:$0xff]  ;;  %v9200_v2 = vrot.slane %v4536_v62, 7  ;;  %v9174_v3 = vrot.slane %v4525_v54, 7  ;;  %v9194_v14 = vrot.slane %v4536_v62, 1 }
  0x2a   : > { %431 = vst.msk [vmem:[#allocation2 + $0x258] sm:$0xff] %vm392_vm2, %v4277_v45  ;;  %432 = vst.msk [vmem:[#allocation2 + $0x278] sm:$0xff] %vm392_vm2, %v4277_v45  ;;  %v4538_v63 = vld [vmem:[#allocation2 + $0x158] sm:$0xff]  ;;  %v9173_v4 = vrot.slane %v4529_v56, 7  ;;  %v9193_v15 = vrot.slane %v4518_v50, 6  ;;  %v9168_v16 = vrot.slane %v4513_v48, 6 }
  0x2b   : > { %9625 = vst [vmem:[#allocation4_spill] sm:$0xff] %v4556_v5  ;;  %9626 = vst [vmem:[#allocation5_spill] sm:$0xff] %v4564_v6  ;;  %v9172_v10 = vrot.slane %v4538_v63, 7  ;;  %v4576_v11 = vsel %vm1411_vm3, %v9174_v3, %v9204_v58  ;;  %v4712_v3 = vld [vmem:[#allocation2 + $0x180] sm:$0xff] }
  0x2c   : > { %4085 = vmatmul.mubr.msk.f32.gmra.mxu0 %vm449_vm1, %v444_v19  ;;  %4105 = vmatmul.mubr.msk.f32.gmra.mxu1 %vm449_vm1, %v719_v21  ;;  %9627 = vst [vmem:[#allocation6_spill] sm:$0xff] %v4576_v11  ;;  %v4584_v12 = vsel %vm1411_vm3, %v9173_v4, %v9203_v59  ;;  %v9190_v19 = vrot.slane %v4522_v52, 6  ;;  %v4609_v21 = vsel %vm1893_vm5, %v9168_v16, %v9206_v9  ;;  %9637 = vst [vmem:[#allocation16_spill] sm:$0xff] %v4712_v3  ;;  %v4893_v61 = vld [vmem:[#allocation2 + $0xb8] sm:$0xff] }
  0x2d   : > { %4087 = vmatprep.mubr.msk.f32.mxu0 %vm449_vm1, %v445_v20  ;;  %4107 = vmatprep.mubr.msk.f32.mxu1 %vm449_vm1, %v720_v22  ;;  %9628 = vst [vmem:[#allocation7_spill] sm:$0xff] %v4584_v12  ;;  %v4598_v18 = vsel %vm1411_vm3, %v9172_v10, %v9200_v2  ;;  %v9167_v20 = vrot.slane %v4520_v51, 6  ;;  %9630 = vst [vmem:[#allocation9_spill] sm:$0xff] %v4609_v21  ;;  %v9187_v22 = vrot.slane %v4511_v47, 2 }
  0x2e   : > { %9629 = vst [vmem:[#allocation8_spill] sm:$0xff] %v4598_v18  ;;  %9661 = vst [vmem:[#allocation40_spill] sm:$0xff] %v4893_v61 }
  0x2f   : > { %v4802_v59 = vld [vmem:[#allocation2 + $0x1d8] sm:$0xff] }
  0x30   : > { %4088 = vmatmul.mubr.msk.f32.gmra.mxu0 %vm449_vm1, %v446_v23  ;;  %4108 = vmatmul.mubr.msk.f32.gmra.mxu1 %vm449_vm1, %v721_v25  ;;  %v9186_v23 = vrot.slane %v4518_v50, 2  ;;  %v9178_v25 = vrot.slane %v4536_v62, 6  ;;  %9648 = vst [vmem:[#allocation27_spill] sm:$0xff] %v4802_v59 }
  0x31   : > { %4090 = vmatprep.mubr.msk.f32.mxu0 %vm449_vm1, %v447_v24  ;;  %4110 = vmatprep.mubr.msk.f32.mxu1 %vm449_vm1, %v722_v26  ;;  %v9179_v24 = vrot.slane %v4527_v55, 6  ;;  %v9165_v26 = vrot.slane %v4525_v54, 6 }
  0x34   : > { %4091 = vmatmul.mubr.msk.f32.gmra.mxu0 %vm449_vm1, %v448_v27  ;;  %4111 = vmatmul.mubr.msk.f32.gmra.mxu1 %vm449_vm1, %v723_v29  ;;  %v9164_v27 = vrot.slane %v4529_v56, 6  ;;  %v4624_v29 = vsel %vm1893_vm5, %v9167_v20, %v9193_v15  ;;  %v9216_v15 = vrot.slane %v4712_v3, 6 }
  0x35   : > { %4121 = vmatprep.mubr.msk.f32.mxu0 %vm449_vm1, %v980_v28  ;;  %4113 = vmatprep.mubr.msk.f32.mxu1 %vm449_vm1, %v724_v30  ;;  %v9166_v28 = vrot.slane %v4538_v63, 6  ;;  %9631 = vst [vmem:[#allocation10_spill] sm:$0xff] %v4624_v29  ;;  %v9183_v30 = vrot.slane %v4522_v52, 2 }
  0x37   : > { %v4664_v45 = vsel %vm1893_vm5, %v9166_v28, %v9178_v25 }
  0x38   : > { %4122 = vmatmul.mubr.msk.f32.vlgmr.msra.gmra.mxu0 %vm449_vm1, %v981_v31  ;;  %4114 = vmatmul.mubr.msk.f32.gmra.mxu1 %vm449_vm1, %v725_v33  ;;  %v9169_v31 = vrot.slane %v4513_v48, 1  ;;  %v9170_v33 = vrot.slane %v4520_v51, 1  ;;  %9636 = vst [vmem:[#allocation15_spill] sm:$0xff] %v4664_v45 }
  0x39   : > { %4124 = vmatprep.mubr.msk.f32.mxu0 %vm449_vm1, %v982_v32  ;;  %4116 = vmatprep.mubr.msk.f32.mxu1 %vm449_vm1, %v726_v34  ;;  %v4634_v32 = vsel %vm1893_vm5, %v9165_v26, %v9190_v19  ;;  %v9171_v34 = vrot.slane %v4525_v54, 1  ;;  %v9188_v26 = vrot.slane %v4538_v63, 2 }
  0x3a   : > { %9632 = vst [vmem:[#allocation11_spill] sm:$0xff] %v4634_v32  ;;  %v4672_v46 = vsel %vm1572_vm4, %v9169_v31, %v9213_v1  ;;  %v4682_v28 = vsel %vm1572_vm4, %v9170_v33, %v9199_v7 }
  0x3b   : > { %v4690_v20 = vsel %vm1572_vm4, %v9171_v34, %v9196_v8  ;;  %v9219_v8 = vrot.slane %v4712_v3, 2 }
  0x3c   : > { %4125 = vmatmul.mubr.msk.f32.gmra.mxu0 %vm449_vm1, %v983_v35  ;;  %4117 = vmatmul.mubr.msk.f32.gmra.mxu1 %vm449_vm1, %v727_v37  ;;  %v9175_v35 = vrot.slane %v4529_v56, 1  ;;  %v9189_v37 = vrot.slane %v4536_v62, 2 }
  0x3d   : > { %4127 = vmatprep.mubr.msk.f32.mxu0 %vm449_vm1, %v984_v36  ;;  %v9185_v36 = vrot.slane %v4527_v55, 2 }
  0x3e   : > { %v4698_v16 = vsel %vm1572_vm4, %v9175_v35, %v9195_v13  ;;  %v4714_v35 = vld [vmem:[#allocation2 + $0x198] sm:$0xff] }
  0x3f   : > { %9638 = vst [vmem:[#allocation17_spill] sm:$0xff] %v4714_v35  ;;  %v9215_v13 = vrot.slane %v4714_v35, 6 }
  0x40   : > { %4128 = vmatmul.mubr.msk.f32.gmra.mxu0 %vm449_vm1, %v985_v38  ;;  %v9177_v38 = vrot.slane %v4538_v63, 1 }
  0x41   : > { %4130 = vmatprep.mubr.msk.f32.mxu0 %vm449_vm1, %v986_v39  ;;  %v4649_v39 = vsel %vm1893_vm5, %v9164_v27, %v9179_v24  ;;  %v9184_v27 = vrot.slane %v4529_v56, 2 }
  0x42   : > { %9633 = vst [vmem:[#allocation12_spill] sm:$0xff] %v4649_v39  ;;  %v4707_v33 = vsel %vm1572_vm4, %v9177_v38, %v9194_v14  ;;  %v9211_v14 = vrot.slane %v4714_v35, 7 }
  0x44   : > { %4131 = vmatmul.mubr.msk.f32.gmra.mxu0 %vm449_vm1, %v987_v40  ;;  %v9180_v40 = vrot.slane %v4513_v48, 2 }
  0x45   : > { %4133 = vmatprep.mubr.msk.f32.mxu0 %vm449_vm1, %v988_v41  ;;  %v9181_v41 = vrot.slane %v4520_v51, 2 }
  0x46   : > { %v4722_v0 = vsel %vm2054_vm6, %v9180_v40, %v9187_v22  ;;  %v4747_v40 = vsel %vm2054_vm6, %v9184_v27, %v9185_v36  ;;  %v9208_v22 = vrot.slane %v4714_v35, 1 }
  0x47   : > { %v4730_v38 = vsel %vm2054_vm6, %v9181_v41, %v9186_v23  ;;  %9640 = vst [vmem:[#allocation19_spill] sm:$0xff] %v4747_v40  ;;  %v4755_v41 = vsel %vm2054_vm6, %v9188_v26, %v9189_v37  ;;  %v9209_v23 = vrot.slane %v4712_v3, 1  ;;  %v4770_v26 = vld [vmem:[#allocation2 + $0x1a0] sm:$0xff]  ;;  %v4772_v37 = vld [vmem:[#allocation2 + $0x1b8] sm:$0xff] }
  0x48   : > { %4134 = vmatmul.mubr.msk.f32.gmra.mxu0 %vm449_vm1, %v989_v42  ;;  %v9182_v42 = vrot.slane %v4525_v54, 2  ;;  %9641 = vst [vmem:[#allocation20_spill] sm:$0xff] %v4755_v41  ;;  %9643 = vst [vmem:[#allocation22_spill] sm:$0xff] %v4770_v26  ;;  %v9225_v7 = vrot.slane %v4770_v26, 1  ;;  %v9223_v2 = vrot.slane %v4770_v26, 6  ;;  %v9227_v57 = vrot.slane %v4770_v26, 2 }
  0x49   : > { %4136 = vmatprep.mubr.msk.f32.mxu0 %vm449_vm1, %v990_v43  ;;  %v4654_v43 = vld [vmem:[#allocation2 + $0x160] sm:$0xff]  ;;  %9644 = vst [vmem:[#allocation23_spill] sm:$0xff] %v4772_v37  ;;  %v4818_v58 = vsel %vm1572_vm4, %v9208_v22, %v9209_v23  ;;  %v9226_v9 = vrot.slane %v4772_v37, 2  ;;  %v4836_v22 = vsel %vm1893_vm5, %v9215_v13, %v9216_v15  ;;  %v9220_v23 = vrot.slane %v4772_v37, 7  ;;  %v4853_v15 = vld [vmem:[#allocation2 + $0x98] sm:$0xff] }
  0x4a   : > { %9634 = vst [vmem:[#allocation13_spill] sm:$0xff] %v4654_v43  ;;  %v9192_v31 = vrot.slane %v4654_v43, 7  ;;  %v9202_v34 = vrot.slane %v4654_v43, 1  ;;  %v9198_v10 = vrot.slane %v4654_v43, 6  ;;  %v4738_v25 = vsel %vm2054_vm6, %v9182_v42, %v9183_v30  ;;  %9650 = vst [vmem:[#allocation29_spill] sm:$0xff] %v4818_v58  ;;  %v4851_v13 = vld [vmem:[#allocation2 + $0x80] sm:$0xff] }
  0x4b   : > { %9639 = vst [vmem:[#allocation18_spill] sm:$0xff] %v4738_v25  ;;  %v9210_v30 = vrot.slane %v4654_v43, 2  ;;  %9652 = vst [vmem:[#allocation31_spill] sm:$0xff] %v4836_v22 }
  0x4c   : > { %4137 = vmatmul.mubr.msk.f32.gmra.mxu0 %vm449_vm1, %v991_v44  ;;  %v4656_v44 = vld [vmem:[#allocation2 + $0x178] sm:$0xff]  ;;  %9654 = vst [vmem:[#allocation33_spill] sm:$0xff] %v4851_v13  ;;  %9655 = vst [vmem:[#allocation34_spill] sm:$0xff] %v4853_v15 }
  0x4d   : > { %9635 = vst [vmem:[#allocation14_spill] sm:$0xff] %v4656_v44  ;;  %v9201_v4 = vrot.slane %v4656_v44, 1  ;;  %v9191_v24 = vrot.slane %v4656_v44, 7  ;;  %v9197_v42 = vrot.slane %v4656_v44, 6  ;;  %v9207_v36 = vrot.slane %v4656_v44, 2 }
  0x4f   : > { %v4765_v27 = vsel %vm1411_vm3, %v9191_v24, %v9192_v31  ;;  %v4780_v19 = vsel %vm1893_vm5, %v9197_v42, %v9198_v10  ;;  %v4788_v24 = vsel %vm1572_vm4, %v9201_v4, %v9202_v34  ;;  %v9212_v31 = vrot.slane %v4712_v3, 7  ;;  %v4800_v34 = vld [vmem:[#allocation2 + $0x1c0] sm:$0xff] }
  0x50   : > { %9642 = vst [vmem:[#allocation21_spill] sm:$0xff] %v4765_v27  ;;  %9645 = vst [vmem:[#allocation24_spill] sm:$0xff] %v4780_v19  ;;  %v9218_v42 = vrot.slane %v4714_v35, 2  ;;  %v9221_v10 = vrot.slane %v4770_v26, 7  ;;  %v9224_v4 = vrot.slane %v4772_v37, 1  ;;  %v4810_v17 = vsel %vm2054_vm6, %v9207_v36, %v9210_v30 }
  0x51   : > { %9646 = vst [vmem:[#allocation25_spill] sm:$0xff] %v4788_v24  ;;  %9647 = vst [vmem:[#allocation26_spill] sm:$0xff] %v4800_v34  ;;  %v4828_v36 = vsel %vm1411_vm3, %v9211_v14, %v9212_v31  ;;  %v9222_v30 = vrot.slane %v4772_v37, 6  ;;  %v9664_v53 = vrot.slane %v4800_v34, 1  ;;  %v9673_v31 = vrot.slane %v4851_v13, 7 }
  0x52   : > { %9649 = vst [vmem:[#allocation28_spill] sm:$0xff] %v4810_v17  ;;  %9651 = vst [vmem:[#allocation30_spill] sm:$0xff] %v4828_v36  ;;  %v4846_v14 = vsel %vm2054_vm6, %v9218_v42, %v9219_v8  ;;  %v4861_v60 = vsel %vm1411_vm3, %v9220_v23, %v9221_v10  ;;  %v4877_v8 = vsel %vm1572_vm4, %v9224_v4, %v9225_v7  ;;  %v4891_v7 = vld [vmem:[#allocation2 + $0xa0] sm:$0xff]  ;;  %v9667_v36 = vrot.slane %v4800_v34, 6 }
  0x53   : > { %9653 = vst [vmem:[#allocation32_spill] sm:$0xff] %v4846_v14  ;;  %9656 = vst [vmem:[#allocation35_spill] sm:$0xff] %v4861_v60  ;;  %v4869_v42 = vsel %vm1893_vm5, %v9222_v30, %v9223_v2  ;;  %v4886_v10 = vsel %vm2054_vm6, %v9226_v9, %v9227_v57  ;;  %v9228_v30 = vrot.slane %v4802_v59, 7  ;;  %v9662_v9 = vrot.slane %v4800_v34, 7 }
  0x54   : > { %9657 = vst [vmem:[#allocation36_spill] sm:$0xff] %v4869_v42  ;;  %9658 = vst [vmem:[#allocation37_spill] sm:$0xff] %v4877_v8  ;;  %v9665_v2 = vrot.slane %v4802_v59, 1  ;;  %v9686_v27 = vrot.slane %v4893_v61, 1 }
  0x55   : > { %9659 = vst [vmem:[#allocation38_spill] sm:$0xff] %v4886_v10  ;;  %9660 = vst [vmem:[#allocation39_spill] sm:$0xff] %v4891_v7  ;;  %v4903_v57 = vsel %vm1411_vm3, %v9228_v30, %v9662_v9  ;;  %v9668_v9 = vrot.slane %v4802_v59, 6 }
  0x56   : > { %9663 = vst [vmem:[#allocation41_spill] sm:$0xff] %v4903_v57  ;;  %v4911_v22 = vsel %vm1572_vm4, %v9665_v2, %v9664_v53 }
  0x57   : > { %9666 = vst [vmem:[#allocation42_spill] sm:$0xff] %v4911_v22  ;;  %v4921_v30 = vsel %vm1893_vm5, %v9668_v9, %v9667_v36 }
  0x58   : > { %9669 = vst [vmem:[#allocation43_spill] sm:$0xff] %v4921_v30  ;;  %v9679_v30 = vrot.slane %v4851_v13, 6 }
  0xd8   : > { %v4071_v23 = vpop.f32.mrf.mxu0 }
  0xd9   : > { %vm648_vm7 = vcmp.ge.f32.partialorder %v4071_v23, 0.0  ;;  %v664_v4 = vmul.f32 0.015625, %v4071_v23 }
  0xda   : > { %v568_v42 = vpop.f32.mrf.mxu0 }
  0xdb   : > { %v680_v19 = vsel %vm648_vm7, %v4071_v23, %v664_v4  ;;  %vm647_vm8 = vcmp.ge.f32.partialorder %v568_v42, 0.0  ;;  %v663_v60 = vmul.f32 0.015625, %v568_v42 }
  0xdc   : > { %697 = vst.msk [vmem:[#allocation2 + $0xd0] sm:$0xff] %vm392_vm2, %v680_v19  ;;  %3232 = vst.msk [vmem:[#allocation3 + $0x8] sm:$0xff] %vm392_vm2, %v680_v19  ;;  %v4074_v53 = vpop.f32.mrf.mxu0  ;;  %v9671_v19 = vrot.slane %v4802_v59, 2 }
  0xdd   : > { %v679_v1 = vsel %vm647_vm8, %v568_v42, %v663_v60  ;;  %vm650_vm9 = vcmp.ge.f32.partialorder %v4074_v53, 0.0  ;;  %v666_v57 = vmul.f32 0.015625, %v4074_v53  ;;  %v9676_v42 = vrot.slane %v4891_v7, 7 }
  0xde   : > { %696 = vst.msk [vmem:[#allocation2 + $0xc8] sm:$0xff] %vm392_vm2, %v679_v1  ;;  %3231 = vst.msk [vmem:[#allocation3] sm:$0xff] %vm392_vm2, %v679_v1  ;;  %v578_v36 = vpop.f32.mrf.mxu0  ;;  %v9670_v1 = vrot.slane %v4800_v34, 2 }
  0xdf   : > { %v682_v2 = vsel %vm650_vm9, %v4074_v53, %v666_v57  ;;  %vm649_vm10 = vcmp.ge.f32.partialorder %v578_v36, 0.0  ;;  %v665_v60 = vmul.f32 0.015625, %v578_v36  ;;  %v9674_v57 = vrot.slane %v4853_v15, 7 }
  0xe0   : > { %699 = vst.msk [vmem:[#allocation2 + $0xf0] sm:$0xff] %vm392_vm2, %v682_v2  ;;  %3234 = vst.msk [vmem:[#allocation3 + $0x18] sm:$0xff] %vm392_vm2, %v682_v2  ;;  %v4077_v23 = vpop.f32.mrf.mxu0  ;;  %v4945_v9 = vsel %vm2054_vm6, %v9671_v19, %v9670_v1  ;;  %v9677_v2 = vrot.slane %v4893_v61, 7 }
  0xe1   : > { %9672 = vst [vmem:[#allocation44_spill] sm:$0xff] %v4945_v9  ;;  %v4953_v53 = vsel %vm1411_vm3, %v9674_v57, %v9673_v31  ;;  %v681_v19 = vsel %vm649_vm10, %v578_v36, %v665_v60  ;;  %vm652_vm11 = vcmp.ge.f32.partialorder %v4077_v23, 0.0  ;;  %v668_v1 = vmul.f32 0.015625, %v4077_v23 }
  0xe2   : > { %9675 = vst [vmem:[#allocation45_spill] sm:$0xff] %v4953_v53  ;;  %v4961_v4 = vsel %vm1411_vm3, %v9677_v2, %v9676_v42  ;;  %v9680_v9 = vrot.slane %v4853_v15, 6  ;;  %698 = vst.msk [vmem:[#allocation2 + $0xe8] sm:$0xff] %vm392_vm2, %v681_v19  ;;  %v588_v42 = vpop.f32.mrf.mxu0  ;;  %v9682_v57 = vrot.slane %v4891_v7, 6  ;;  %v9683_v36 = vrot.slane %v4893_v61, 6 }
  0xe3   : > { %9678 = vst [vmem:[#allocation46_spill] sm:$0xff] %v4961_v4  ;;  %3233 = vst.msk [vmem:[#allocation3 + $0x10] sm:$0xff] %vm392_vm2, %v681_v19  ;;  %v9685_v2 = vrot.slane %v4891_v7, 1  ;;  %v9689_v19 = vrot.slane %v4893_v61, 2  ;;  %vm651_vm12 = vcmp.ge.f32.partialorder %v588_v42, 0.0  ;;  %v4999_v14 = vld [vmem:[#allocation2 + $0xd0] sm:$0xff] }
  0xe4   : > { %v4970_v31 = vsel %vm1893_vm5, %v9680_v9, %v9679_v30  ;;  %v4980_v60 = vsel %vm1893_vm5, %v9683_v36, %v9682_v57  ;;  %v9688_v9 = vrot.slane %v4891_v7, 2  ;;  %v4097_v57 = vpop.f32.mrf.mxu1  ;;  %v684_v36 = vsel %vm652_vm11, %v4077_v23, %v668_v1 }
  0xe5   : > { %9681 = vst [vmem:[#allocation47_spill] sm:$0xff] %v4970_v31  ;;  %9684 = vst [vmem:[#allocation48_spill] sm:$0xff] %v4980_v60  ;;  %v4988_v30 = vsel %vm1572_vm4, %v9686_v27, %v9685_v2  ;;  %v667_v60 = vmul.f32 0.015625, %v588_v42  ;;  %v4080_v27 = vpop.f32.mrf.mxu0  ;;  %v9691_v2 = vstv %s4509_s9 }
  0xe6   : > { %9687 = vst [vmem:[#allocation49_spill] sm:$0xff] %v4988_v30  ;;  %v4996_v4 = vsel %vm2054_vm6, %v9689_v19, %v9688_v9  ;;  %701 = vst.msk [vmem:[#allocation2 + $0x110] sm:$0xff] %vm392_vm2, %v684_v36  ;;  %vm5006_vm13 = vcmp.eq.s32.totalorder %v9691_v2, 1  ;;  %v842_v57 = vpop.f32.mrf.mxu1  ;;  %vm654_vm14 = vcmp.ge.f32.partialorder %v4080_v27, 0.0  ;;  %v670_v10 = vmul.f32 0.015625, %v4080_v27 }
  0xe7   : > { %9690 = vst [vmem:[#allocation50_spill] sm:$0xff] %v4996_v4  ;;  %3236 = vst.msk [vmem:[#allocation3 + $0x28] sm:$0xff] %vm392_vm2, %v684_v36  ;;  %v683_v17 = vsel %vm651_vm12, %v588_v42, %v667_v60  ;;  %v5014_v4 = vld [vmem:[#allocation2 + $0xc8] sm:$0xff]  ;;  %v9694_v36 = vrot.slane %v4851_v13, 1  ;;  %v9695_v2 = vrot.slane %v4853_v15, 1  ;;  %v598_v23 = vpop.f32.mrf.mxu0  ;;  %v5030_v58 = vld [vmem:[#allocation2 + $0xf0] sm:$0xff] }
  0xe8   : > { %700 = vst.msk [vmem:[#allocation2 + $0x108] sm:$0xff] %vm392_vm2, %v683_v17  ;;  %3235 = vst.msk [vmem:[#allocation3 + $0x20] sm:$0xff] %vm392_vm2, %v683_v17  ;;  %v9232_v57 = vrot.slane %v5014_v4, 7  ;;  %v1518_v42 = vrot.slane %v5014_v4, 1  ;;  %v4100_v9 = vpop.f32.mrf.mxu1  ;;  %v686_v1 = vsel %vm654_vm14, %v4080_v27, %v670_v10  ;;  %vm653_vm15 = vcmp.ge.f32.partialorder %v598_v23, 0.0 }
  0xe9   : > { %v5022_v22 = vsel %vm1572_vm4, %v9695_v2, %v9694_v36  ;;  %v669_v8 = vmul.f32 0.015625, %v598_v23  ;;  %v9697_v36 = vrot.slane %v4513_v48, 7  ;;  %v9698_v2 = vrot.slane %v4999_v14, 7  ;;  %703 = vst.msk [vmem:[#allocation2 + $0x130] sm:$0xff] %vm392_vm2, %v686_v1  ;;  %3238 = vst.msk [vmem:[#allocation3 + $0x38] sm:$0xff] %vm392_vm2, %v686_v1  ;;  %v4083_v60 = vpop.f32.mrf.mxu0 }
  0xea   : > { %9696 = vst [vmem:[#allocation51_spill] sm:$0xff] %v5022_v22  ;;  %v9699_v10 = vrot.slane %v4511_v47, 7  ;;  %v9700_v19 = vrot.slane %v4999_v14, 1  ;;  %v850_v24 = vpop.f32.mrf.mxu1  ;;  %vm656_vm0 = vcmp.ge.f32.partialorder %v4083_v60, 0.0  ;;  %v672_v15 = vmul.f32 0.015625, %v4083_v60 }
  0xeb   : > { %v5038_v17 = vsel %vm1411_vm3, %v9698_v2, %v9697_v36  ;;  %v9701_v2 = vrot.slane %v4511_v47, 1  ;;  %v685_v22 = vsel %vm653_vm15, %v598_v23, %v669_v8  ;;  %v9707_v7 = vrot.slane %v5030_v58, 1 }
  0xec   : > { %v5048_v27 = vsel %vm1411_vm3, %v9699_v10, %v9232_v57  ;;  %v5055_v36 = vsel %vm1572_vm4, %v1518_v42, %v9700_v19  ;;  %v5063_v10 = vld [vmem:[#allocation2 + $0xe8] sm:$0xff]  ;;  %702 = vst.msk [vmem:[#allocation2 + $0x128] sm:$0xff] %vm392_vm2, %v685_v22  ;;  %3237 = vst.msk [vmem:[#allocation3 + $0x30] sm:$0xff] %vm392_vm2, %v685_v22  ;;  %v608_v19 = vpop.f32.mrf.mxu0  ;;  %v4103_v23 = vpop.f32.mrf.mxu1  ;;  %v9703_v57 = vrot.slane %v5014_v4, 6  ;;  %v9704_v22 = vrot.slane %v4511_v47, 6 }
  0xed   : > { %v5061_v1 = vsel %vm1572_vm4, %v9701_v2, %v1518_v42  ;;  %v688_v42 = vsel %vm656_vm0, %v4083_v60, %v672_v15  ;;  %vm655_vm7 = vcmp.ge.f32.partialorder %v608_v19, 0.0  ;;  %v671_v2 = vmul.f32 0.015625, %v608_v19  ;;  %v5074_v31 = vld [vmem:[#allocation2 + $0x110] sm:$0xff] }
  0xee   : > { %9702 = vst [vmem:[#allocation52_spill] sm:$0xff] %v5061_v1  ;;  %v5082_v9 = vsel %vm1893_vm5, %v9704_v22, %v9703_v57  ;;  %vm918_vm8 = vcmp.ge.f32.partialorder %v4103_v23, 0.0  ;;  %v930_v61 = vmul.f32 0.015625, %v4103_v23  ;;  %705 = vst.msk [vmem:[#allocation2 + $0x150] sm:$0xff] %vm392_vm2, %v688_v42  ;;  %v4086_v8 = vpop.f32.mrf.mxu0  ;;  %v9705_v15 = vrot.slane %v5063_v10, 7  ;;  %v858_v5 = vpop.f32.mrf.mxu1 }
  0xef   : > { %3240 = vst.msk [vmem:[#allocation3 + $0x48] sm:$0xff] %vm392_vm2, %v688_v42  ;;  %v9706_v60 = vrot.slane %v4518_v50, 7  ;;  %v687_v57 = vsel %vm655_vm7, %v608_v19, %v671_v2  ;;  %vm658_vm9 = vcmp.ge.f32.partialorder %v4086_v8, 0.0  ;;  %v674_v22 = vmul.f32 0.015625, %v4086_v8  ;;  %v5095_v53 = vld [vmem:[#allocation2 + $0x108] sm:$0xff] }
  0xf0   : > { %v9708_v42 = vrot.slane %v5063_v10, 1  ;;  %v942_v59 = vsel %vm918_vm8, %v4103_v23, %v930_v61  ;;  %vm917_vm10 = vcmp.ge.f32.partialorder %v858_v5, 0.0  ;;  %704 = vst.msk [vmem:[#allocation2 + $0x148] sm:$0xff] %vm392_vm2, %v687_v57  ;;  %3239 = vst.msk [vmem:[#allocation3 + $0x40] sm:$0xff] %vm392_vm2, %v687_v57  ;;  %v618_v19 = vpop.f32.mrf.mxu0  ;;  %v9251_v2 = vrot.slane %v5095_v53, 7  ;;  %v4106_v1 = vpop.f32.mrf.mxu1 }
  0xf1   : > { %v5092_v24 = vsel %vm1411_vm3, %v9706_v60, %v9705_v15  ;;  %v929_v15 = vmul.f32 0.015625, %v858_v5  ;;  %v957_v60 = vsel %vm5006_vm13, %v942_v59, -inf  ;;  %v690_v34 = vsel %vm658_vm9, %v4086_v8, %v674_v22 }
  0xf2   : > { %v5103_v13 = vsel %vm1572_vm4, %v9708_v42, %v9707_v7  ;;  %vm657_vm11 = vcmp.ge.f32.partialorder %v618_v19, 0.0  ;;  %v673_v37 = vmul.f32 0.015625, %v618_v19  ;;  %969 = vst.msk [vmem:[#allocation2 + $0x10] sm:$0xff] %vm392_vm2, %v957_v60  ;;  %vm920_vm12 = vcmp.ge.f32.partialorder %v4106_v1, 0.0  ;;  %707 = vst.msk [vmem:[#allocation2 + $0x170] sm:$0xff] %vm392_vm2, %v690_v34  ;;  %v4089_v23 = vpop.f32.mrf.mxu0  ;;  %v868_v22 = vpop.f32.mrf.mxu1 }
  0xf3   : > { %v941_v61 = vsel %vm917_vm10, %v858_v5, %v929_v15  ;;  %v932_v7 = vmul.f32 0.015625, %v4106_v1  ;;  %3242 = vst.msk [vmem:[#allocation3 + $0x58] sm:$0xff] %vm392_vm2, %v690_v34  ;;  %v9709_v57 = vrot.slane %v4522_v52, 7  ;;  %vm660_vm14 = vcmp.ge.f32.partialorder %v4089_v23, 0.0  ;;  %v5129_v34 = vld [vmem:[#allocation2 + $0x128] sm:$0xff] }
  0xf4   : > { %v956_v8 = vsel %vm5006_vm13, %v941_v61, -inf  ;;  %v689_v5 = vsel %vm657_vm11, %v618_v19, %v673_v37  ;;  %v676_v42 = vmul.f32 0.015625, %v4089_v23  ;;  %v9710_v15 = vstv %s4545_s10  ;;  %v628_v61 = vpop.f32.mrf.mxu0 }
  0xf5   : > { %v5119_v59 = vsel %vm1411_vm3, %v9709_v57, %v9251_v2  ;;  %vm5125_vm15 = vcmp.eq.s32.totalorder %v9710_v15, 1  ;;  %968 = vst.msk [vmem:[#allocation2 + $0x8] sm:$0xff] %vm392_vm2, %v956_v8  ;;  %v944_v26 = vsel %vm920_vm12, %v4106_v1, %v932_v7  ;;  %vm919_vm0 = vcmp.ge.f32.partialorder %v868_v22, 0.0  ;;  %706 = vst.msk [vmem:[#allocation2 + $0x168] sm:$0xff] %vm392_vm2, %v689_v5  ;;  %v4109_v15 = vpop.f32.mrf.mxu1 }
  0xf6   : > { %v931_v57 = vmul.f32 0.015625, %v868_v22  ;;  %3241 = vst.msk [vmem:[#allocation3 + $0x50] sm:$0xff] %vm392_vm2, %v689_v5  ;;  %v9256_v37 = vrot.slane %v5129_v34, 7  ;;  %v959_v19 = vsel %vm5006_vm13, %v944_v26, -inf  ;;  %v692_v2 = vsel %vm660_vm14, %v4089_v23, %v676_v42  ;;  %v4092_v7 = vpop.f32.mrf.mxu0 }
  0xf7   : > { %vm659_vm7 = vcmp.ge.f32.partialorder %v628_v61, 0.0  ;;  %v675_v35 = vmul.f32 0.015625, %v628_v61  ;;  %971 = vst.msk [vmem:[#allocation2 + $0x30] sm:$0xff] %vm392_vm2, %v959_v19  ;;  %vm922_vm8 = vcmp.ge.f32.partialorder %v4109_v15, 0.0  ;;  %v934_v1 = vmul.f32 0.015625, %v4109_v15  ;;  %709 = vst.msk [vmem:[#allocation2 + $0x190] sm:$0xff] %vm392_vm2, %v692_v2  ;;  %v878_v42 = vpop.f32.mrf.mxu1 }
  0xf8   : > { %v943_v8 = vsel %vm919_vm0, %v868_v22, %v931_v57  ;;  %3244 = vst.msk [vmem:[#allocation3 + $0x68] sm:$0xff] %vm392_vm2, %v692_v2  ;;  %v9713_v5 = vrot.slane %v4527_v55, 7  ;;  %vm662_vm9 = vcmp.ge.f32.partialorder %v4092_v7, 0.0  ;;  %v678_v57 = vmul.f32 0.015625, %v4092_v7  ;;  %v5150_v19 = vld [vmem:[#allocation2 + $0x148] sm:$0xff] }
  0xf9   : > { %v958_v23 = vsel %vm5006_vm13, %v943_v8, -inf  ;;  %v691_v22 = vsel %vm659_vm7, %v628_v61, %v675_v35  ;;  %v946_v2 = vsel %vm922_vm8, %v4109_v15, %v934_v1  ;;  %vm921_vm10 = vcmp.ge.f32.partialorder %v878_v42, 0.0  ;;  %v4112_v35 = vpop.f32.mrf.mxu1 }
  0xfa   : > { %v5146_v26 = vsel %vm1411_vm3, %v9713_v5, %v9256_v37  ;;  %970 = vst.msk [vmem:[#allocation2 + $0x28] sm:$0xff] %vm392_vm2, %v958_v23  ;;  %v933_v3 = vmul.f32 0.015625, %v878_v42  ;;  %708 = vst.msk [vmem:[#allocation2 + $0x188] sm:$0xff] %vm392_vm2, %v691_v22  ;;  %v638_v5 = vpop.f32.mrf.mxu0  ;;  %v9261_v37 = vrot.slane %v5150_v19, 7  ;;  %v961_v8 = vsel %vm5006_vm13, %v946_v2, -inf }
  0xfb   : > { %3243 = vst.msk [vmem:[#allocation3 + $0x60] sm:$0xff] %vm392_vm2, %v691_v22  ;;  %v694_v61 = vsel %vm662_vm9, %v4092_v7, %v678_v57  ;;  %vm661_vm11 = vcmp.ge.f32.partialorder %v638_v5, 0.0  ;;  %v677_v44 = vmul.f32 0.015625, %v638_v5  ;;  %973 = vst.msk [vmem:[#allocation2 + $0x50] sm:$0xff] %vm392_vm2, %v961_v8  ;;  %vm924_vm12 = vcmp.ge.f32.partialorder %v4112_v35, 0.0  ;;  %v888_v57 = vpop.f32.mrf.mxu1 }
  0xfc   : > { %v945_v23 = vsel %vm921_vm10, %v878_v42, %v933_v3  ;;  %v936_v15 = vmul.f32 0.015625, %v4112_v35  ;;  %711 = vst.msk [vmem:[#allocation2 + $0x1b0] sm:$0xff] %vm392_vm2, %v694_v61  ;;  %3246 = vst.msk [vmem:[#allocation3 + $0x78] sm:$0xff] %vm392_vm2, %v694_v61  ;;  %v4123_v1 = vpop.f32.mrf.mxu0  ;;  %v9714_v22 = vrot.slane %v4536_v62, 7  ;;  %vm923_vm0 = vcmp.ge.f32.partialorder %v888_v57, 0.0 }
  0xfd   : > { %v960_v7 = vsel %vm5006_vm13, %v945_v23, -inf  ;;  %v693_v3 = vsel %vm661_vm11, %v638_v5, %v677_v44  ;;  %vm1186_vm14 = vcmp.ge.f32.partialorder %v4123_v1, 0.0  ;;  %v1198_v42 = vmul.f32 0.015625, %v4123_v1  ;;  %v4115_v23 = vpop.f32.mrf.mxu1 }
  0xfe   : > { %v5167_v2 = vsel %vm1411_vm3, %v9714_v22, %v9261_v37  ;;  %972 = vst.msk [vmem:[#allocation2 + $0x48] sm:$0xff] %vm392_vm2, %v960_v7  ;;  %v948_v8 = vsel %vm924_vm12, %v4112_v35, %v936_v15  ;;  %v935_v61 = vmul.f32 0.015625, %v888_v57  ;;  %710 = vst.msk [vmem:[#allocation2 + $0x1a8] sm:$0xff] %vm392_vm2, %v693_v3  ;;  %v1110_v43 = vpop.f32.mrf.mxu0  ;;  %vm926_vm8 = vcmp.ge.f32.partialorder %v4115_v23, 0.0 }
  0xff   : > { %3245 = vst.msk [vmem:[#allocation3 + $0x70] sm:$0xff] %vm392_vm2, %v693_v3  ;;  %v963_v37 = vsel %vm5006_vm13, %v948_v8, -inf  ;;  %v1210_v41 = vsel %vm1186_vm14, %v4123_v1, %v1198_v42  ;;  %vm1185_vm7 = vcmp.ge.f32.partialorder %v1110_v43, 0.0  ;;  %v1197_v44 = vmul.f32 0.015625, %v1110_v43  ;;  %v898_v22 = vpop.f32.mrf.mxu1 }
 0x100   : > { %975 = vst.msk [vmem:[#allocation2 + $0x70] sm:$0xff] %vm392_vm2, %v963_v37  ;;  %v947_v5 = vsel %vm923_vm0, %v888_v57, %v935_v61  ;;  %v938_v35 = vmul.f32 0.015625, %v4115_v23  ;;  %v1225_v15 = vsel %vm5125_vm15, %v1210_v41, -inf  ;;  %v4126_v7 = vpop.f32.mrf.mxu0  ;;  %vm925_vm10 = vcmp.ge.f32.partialorder %v898_v22, 0.0 }
 0x101   : > { %v962_v3 = vsel %vm5006_vm13, %v947_v5, -inf  ;;  %1238 = vst.msk [vmem:[#allocation2 + $0x1d0] sm:$0xff] %vm392_vm2, %v1225_v15  ;;  %v1209_v8 = vsel %vm1185_vm7, %v1110_v43, %v1197_v44  ;;  %vm1188_vm9 = vcmp.ge.f32.partialorder %v4126_v7, 0.0  ;;  %v1200_v1 = vmul.f32 0.015625, %v4126_v7  ;;  %v4118_v40 = vpop.f32.mrf.mxu1 }
 0x102   : > { %974 = vst.msk [vmem:[#allocation2 + $0x68] sm:$0xff] %vm392_vm2, %v962_v3  ;;  %v950_v42 = vsel %vm926_vm8, %v4115_v23, %v938_v35  ;;  %v937_v37 = vmul.f32 0.015625, %v898_v22  ;;  %v1224_v57 = vsel %vm5125_vm15, %v1209_v8, -inf  ;;  %v1120_v61 = vpop.f32.mrf.mxu0  ;;  %vm928_vm12 = vcmp.ge.f32.partialorder %v4118_v40, 0.0 }
 0x103   : > { %v965_v41 = vsel %vm5006_vm13, %v950_v42, -inf  ;;  %1237 = vst.msk [vmem:[#allocation2 + $0x1c8] sm:$0xff] %vm392_vm2, %v1224_v57  ;;  %v1212_v5 = vsel %vm1188_vm9, %v4126_v7, %v1200_v1  ;;  %vm1187_vm11 = vcmp.ge.f32.partialorder %v1120_v61, 0.0  ;;  %v1199_v43 = vmul.f32 0.015625, %v1120_v61  ;;  %v908_v8 = vpop.f32.mrf.mxu1 }
 0x104   : > { %977 = vst.msk [vmem:[#allocation2 + $0x90] sm:$0xff] %vm392_vm2, %v965_v41  ;;  %v949_v44 = vsel %vm925_vm10, %v898_v22, %v937_v37  ;;  %v940_v23 = vmul.f32 0.015625, %v4118_v40  ;;  %v1227_v35 = vsel %vm5125_vm15, %v1212_v5, -inf  ;;  %v4129_v15 = vpop.f32.mrf.mxu0  ;;  %vm927_vm0 = vcmp.ge.f32.partialorder %v908_v8, 0.0 }
 0x105   : > { %v964_v3 = vsel %vm5006_vm13, %v949_v44, -inf  ;;  %1240 = vst.msk [vmem:[#allocation2 + $0x1f0] sm:$0xff] %vm392_vm2, %v1227_v35  ;;  %v1211_v42 = vsel %vm1187_vm11, %v1120_v61, %v1199_v43  ;;  %vm1190_vm14 = vcmp.ge.f32.partialorder %v4129_v15, 0.0  ;;  %v1202_v7 = vmul.f32 0.015625, %v4129_v15  ;;  %v5201_v61 = vld [vmem:[#allocation2 + $0x130] sm:$0xff] }
 0x106   : > { %976 = vst.msk [vmem:[#allocation2 + $0x88] sm:$0xff] %vm392_vm2, %v964_v3  ;;  %v952_v1 = vsel %vm928_vm12, %v4118_v40, %v940_v23  ;;  %v939_v22 = vmul.f32 0.015625, %v908_v8  ;;  %v1226_v37 = vsel %vm5125_vm15, %v1211_v42, -inf  ;;  %v1130_v57 = vpop.f32.mrf.mxu0  ;;  %v5203_v43 = vld [vmem:[#allocation2 + $0x150] sm:$0xff]  ;;  %v1521_v3 = vrot.slane %v5129_v34, 1 }
 0x107   : > { %v967_v41 = vsel %vm5006_vm13, %v952_v1, -inf  ;;  %1239 = vst.msk [vmem:[#allocation2 + $0x1e8] sm:$0xff] %vm392_vm2, %v1226_v37  ;;  %v1214_v5 = vsel %vm1190_vm14, %v4129_v15, %v1202_v7  ;;  %vm1189_vm7 = vcmp.ge.f32.partialorder %v1130_v57, 0.0  ;;  %v1201_v44 = vmul.f32 0.015625, %v1130_v57 }
 0x108   : > { %979 = vst.msk [vmem:[#allocation2 + $0xb0] sm:$0xff] %vm392_vm2, %v967_v41  ;;  %v951_v40 = vsel %vm927_vm0, %v908_v8, %v939_v22  ;;  %v1229_v23 = vsel %vm5125_vm15, %v1214_v5, -inf  ;;  %v4132_v35 = vpop.f32.mrf.mxu0  ;;  %v1522_v42 = vrot.slane %v5150_v19, 1  ;;  %v9264_v22 = vrot.slane %v5201_v61, 1 }
 0x109   : > { %v966_v15 = vsel %vm5006_vm13, %v951_v40, -inf  ;;  %1242 = vst.msk [vmem:[#allocation2 + $0x210] sm:$0xff] %vm392_vm2, %v1229_v23  ;;  %v1213_v7 = vsel %vm1189_vm7, %v1130_v57, %v1201_v44  ;;  %vm1192_vm8 = vcmp.ge.f32.partialorder %v4132_v35, 0.0  ;;  %v1204_v1 = vmul.f32 0.015625, %v4132_v35 }
 0x10a   : > { %978 = vst.msk [vmem:[#allocation2 + $0xa8] sm:$0xff] %vm392_vm2, %v966_v15  ;;  %v1228_v8 = vsel %vm5125_vm15, %v1213_v7, -inf  ;;  %v9715_v41 = vrot.slane %v5074_v31, 1  ;;  %v9716_v5 = vrot.slane %v5095_v53, 1  ;;  %v9717_v44 = vrot.slane %v5063_v10, 1 }
 0x10b   : > { %1241 = vst.msk [vmem:[#allocation2 + $0x208] sm:$0xff] %vm392_vm2, %v1228_v8  ;;  %v1216_v57 = vsel %vm1192_vm8, %v4132_v35, %v1204_v1  ;;  %v9718_v40 = vrot.slane %v4518_v50, 1  ;;  %v9721_v7 = vrot.slane %v4522_v52, 1  ;;  %v1602_v8 = vsel %vm1572_vm4, %v1521_v3, %v9264_v22 }
 0x10c   : > { %v1601_v30 = vsel %vm1572_vm4, %v9716_v5, %v9715_v41  ;;  %v9720_v15 = vmov %v9716_v5  ;;  %v9723_v41 = vrot.slane %v4527_v55, 1  ;;  %v1231_v1 = vsel %vm5125_vm15, %v1216_v57, -inf }
 0x10d   : > { %v5231_v23 = vsel %vm1572_vm4, %v9718_v40, %v9717_v44  ;;  %v5239_v37 = vsel %vm1572_vm4, %v9721_v7, %v9720_v15  ;;  %v9725_v5 = vrot.slane %v5203_v43, 1  ;;  %v9726_v40 = vrot.slane %v4536_v62, 1  ;;  %1244 = vst.msk [vmem:[#allocation2 + $0x230] sm:$0xff] %vm392_vm2, %v1231_v1 }
 0x10e   : > { %9719 = vst [vmem:[#allocation53_spill] sm:$0xff] %v5231_v23  ;;  %9722 = vst [vmem:[#allocation54_spill] sm:$0xff] %v5239_v37  ;;  %v5245_v35 = vsel %vm1572_vm4, %v9723_v41, %v1521_v3  ;;  %v1682_v7 = vmax.f32 %v5092_v24, %v5103_v13  ;;  %v1686_v41 = vmax.f32 %v5119_v59, %v1601_v30  ;;  %v9265_v59 = vrot.slane %v5095_v53, 6 }
 0x10f   : > { %9724 = vst [vmem:[#allocation55_spill] sm:$0xff] %v5245_v35  ;;  %v1603_v44 = vsel %vm1572_vm4, %v1522_v42, %v9725_v5  ;;  %v5261_v15 = vsel %vm1572_vm4, %v9726_v40, %v1522_v42  ;;  %v1690_v22 = vmax.f32 %v5146_v26, %v1602_v8  ;;  %v9728_v40 = vmax.f32 %v5048_v27, %v5055_v36 }
 0x110   : > { %9727 = vst [vmem:[#allocation56_spill] sm:$0xff] %v5261_v15  ;;  %v1694_v1 = vmax.f32 %v5167_v2, %v1603_v44  ;;  %v1762_v24 = vmax.f32 %v5063_v10, %v1682_v7  ;;  %v1766_v3 = vmax.f32 %v5095_v53, %v1686_v41  ;;  %v9268_v8 = vrot.slane %v5129_v34, 6 }
 0x111   : > { %v1758_v13 = vmax.f32 %v5014_v4, %v9728_v40  ;;  %v1770_v30 = vmax.f32 %v5129_v34, %v1690_v22  ;;  %v9270_v42 = vrot.slane %v5150_v19, 6  ;;  %v9729_v2 = vrot.slane %v5063_v10, 6 }
 0x112   : > { %v1774_v26 = vmax.f32 %v5150_v19, %v1694_v1  ;;  %v9730_v27 = vrot.slane %v4518_v50, 6  ;;  %v9731_v44 = vrot.slane %v4522_v52, 6  ;;  %v2001_v7 = vrot.slane %v5063_v10, 2 }
 0x113   : > { %v2002_v41 = vrot.slane %v5095_v53, 2  ;;  %v9732_v1 = vrot.slane %v4527_v55, 6  ;;  %v2004_v5 = vrot.slane %v5150_v19, 2  ;;  %v9741_v15 = vrot.slane %v4522_v52, 2 }
 0x114   : > { %v1941_v36 = vsel %vm1893_vm5, %v9730_v27, %v9729_v2  ;;  %v1942_v22 = vsel %vm1893_vm5, %v9731_v44, %v9265_v59  ;;  %v9733_v2 = vrot.slane %v4536_v62, 6  ;;  %v2003_v44 = vrot.slane %v5129_v34, 2 }
 0x115   : > { %v1943_v40 = vsel %vm1893_vm5, %v9732_v1, %v9268_v8  ;;  %v9734_v1 = vrot.slane %v4999_v14, 2  ;;  %v9735_v8 = vrot.slane %v5014_v4, 2  ;;  %v9739_v59 = vrot.slane %v4518_v50, 2 }
 0x116   : > { %v1944_v27 = vsel %vm1893_vm5, %v9733_v2, %v9270_v42  ;;  %v9737_v42 = vrot.slane %v4511_v47, 2  ;;  %v5344_v12 = vsel %vm2054_vm6, %v9741_v15, %v2002_v41  ;;  %v9746_v52 = vrot.slane %v5203_v43, 2 }
 0x117   : > { %v2081_v35 = vsel %vm2054_vm6, %v9735_v8, %v9734_v1  ;;  %v9736_v2 = vmov %v9735_v8  ;;  %v5338_v18 = vsel %vm2054_vm6, %v9739_v59, %v2001_v7  ;;  %9742 = vst [vmem:[#allocation59_spill] sm:$0xff] %v5344_v12  ;;  %v9743_v8 = vrot.slane %v5030_v58, 2 }
 0x118   : > { %v5332_v57 = vsel %vm2054_vm6, %v9737_v42, %v9736_v2  ;;  %9740 = vst [vmem:[#allocation58_spill] sm:$0xff] %v5338_v18  ;;  %v9744_v42 = vrot.slane %v5074_v31, 2  ;;  %v9745_v1 = vrot.slane %v5201_v61, 2  ;;  %v2085_v15 = vsel %vm2054_vm6, %v2004_v5, %v9746_v52 }
 0x119   : > { %9738 = vst [vmem:[#allocation57_spill] sm:$0xff] %v5332_v57  ;;  %v2082_v47 = vsel %vm2054_vm6, %v2001_v7, %v9743_v8  ;;  %v9747_v2 = vrot.slane %v4527_v55, 2  ;;  %v9749_v8 = vrot.slane %v4536_v62, 2  ;;  %v9756_v62 = vrot.slane %v4525_v54, 7 }
 0x11a   : > { %v2083_v50 = vsel %vm2054_vm6, %v2002_v41, %v9744_v42  ;;  %v2084_v59 = vsel %vm2054_vm6, %v2003_v44, %v9745_v1  ;;  %v2160_v1 = vmax.f32 %v5082_v9, %v2081_v35  ;;  %v2164_v37 = vmax.f32 %v1941_v36, %v2082_v47 }
 0x11b   : > { %v5366_v7 = vsel %vm2054_vm6, %v9747_v2, %v2003_v44  ;;  %v5372_v41 = vsel %vm2054_vm6, %v9749_v8, %v2004_v5  ;;  %v2168_v44 = vmax.f32 %v1942_v22, %v2083_v50  ;;  %v2172_v2 = vmax.f32 %v1943_v40, %v2084_v59 }
 0x11c   : > { %9748 = vst [vmem:[#allocation60_spill] sm:$0xff] %v5366_v7  ;;  %9750 = vst [vmem:[#allocation61_spill] sm:$0xff] %v5372_v41  ;;  %v2176_v8 = vmax.f32 %v1944_v27, %v2085_v15  ;;  %v5385_v11 = vmax.f32 %v1758_v13, %v2160_v1  ;;  %v5387_v42 = vmax.f32 %v1762_v24, %v2164_v37  ;;  %v1376_v35 = vrot.slane %v5030_v58, 7 }
 0x11d   : > { %v5389_v9 = vmax.f32 %v1766_v3, %v2168_v44  ;;  %v5392_v36 = vmax.f32 %v1770_v30, %v2172_v2  ;;  %v1377_v22 = vrot.slane %v5074_v31, 7  ;;  %v1378_v40 = vrot.slane %v5201_v61, 7 }
 0x11e   : > { %9751 = vst [vmem:[#allocation62_spill] sm:$0xff] %v5387_v42  ;;  %v5394_v47 = vmax.f32 %v1774_v26, %v2176_v8  ;;  %v5408_v59 = vmax.f32 %v5385_v11, %v5387_v42  ;;  %v1379_v26 = vrot.slane %v5203_v43, 7  ;;  %v9755_v30 = vrot.slane %v4520_v51, 7 }
 0x11f   : > { %9752 = vst [vmem:[#allocation63_spill] sm:$0xff] %v5389_v9  ;;  %9753 = vst [vmem:[#allocation64_spill] sm:$0xff] %v5392_v36  ;;  %v5412_v15 = vmax.f32 %v5387_v42, %v5389_v9  ;;  %v5416_v1 = vmax.f32 %v5389_v9, %v5392_v36  ;;  %v5443_v8 = vsel %vm1411_vm3, %v1377_v22, %v9756_v62  ;;  %v9757_v55 = vrot.slane %v4529_v56, 7 }
 0x120   : > { %9754 = vst [vmem:[#allocation65_spill] sm:$0xff] %v5394_v47  ;;  %v5420_v44 = vmax.f32 %v5392_v36, %v5394_v47  ;;  %v5429_v24 = vsel %vm1411_vm3, %v1376_v35, %v9755_v30  ;;  %v9758_v52 = vrot.slane %v4538_v63, 7  ;;  %v9759_v3 = vrot.slane %v4999_v14, 7 }
 0x121   : > { %v5433_v37 = vmax.f32 %v5408_v59, %v5416_v1  ;;  %v5449_v30 = vsel %vm1411_vm3, %v1378_v40, %v9757_v55  ;;  %v9760_v13 = vrot.slane %v5014_v4, 7  ;;  %v9761_v27 = vrot.slane %v5063_v10, 7 }
 0x122   : > { %v5437_v5 = vmax.f32 %v5412_v15, %v5420_v44  ;;  %v5455_v2 = vsel %vm1411_vm3, %v1379_v26, %v9758_v52  ;;  %v9762_v55 = vrot.slane %v5095_v53, 7  ;;  %v9763_v45 = vrot.slane %v5129_v34, 7 }
 0x123   : > { %v1438_v62 = vsel %vm1411_vm3, %v9760_v13, %v9759_v3  ;;  %v1439_v50 = vsel %vm1411_vm3, %v9761_v27, %v1376_v35  ;;  %v9764_v13 = vrot.slane %v5150_v19, 7  ;;  %v9765_v35 = vrot.slane %v4513_v48, 1 }
 0x124   : > { %v1440_v41 = vsel %vm1411_vm3, %v9762_v55, %v1377_v22  ;;  %v2979_v52 = vmax.f32 %v5433_v37, %v5437_v5  ;;  %v1441_v7 = vsel %vm1411_vm3, %v9763_v45, %v1378_v40  ;;  %v9766_v27 = vrot.slane %v4999_v14, 1 }
 0x125   : > { %v1442_v3 = vsel %vm1411_vm3, %v9764_v13, %v1379_v26  ;;  %v9767_v55 = vrot.slane %v4520_v51, 1  ;;  %v9768_v39 = vrot.slane %v5030_v58, 1  ;;  %v9769_v45 = vrot.slane %v4525_v54, 1 }
 0x126   : > { %v1579_v22 = vsel %vm1572_vm4, %v9766_v27, %v9765_v35  ;;  %v9770_v40 = vrot.slane %v5074_v31, 1  ;;  %v9771_v13 = vrot.slane %v4529_v56, 1  ;;  %v9772_v32 = vrot.slane %v5201_v61, 1  ;;  %3271 = vrot.lane.b32.xlu0 %v2979_v52, %s4278_s18 }
 0x127   : > { %v1580_v12 = vsel %vm1572_vm4, %v9768_v39, %v9767_v55  ;;  %v9773_v27 = vrot.slane %v4538_v63, 1  ;;  %v9774_v18 = vrot.slane %v5203_v43, 1  ;;  %v1679_v55 = vmax.f32 %v1438_v62, %v1579_v22 }
 0x128   : > { %v1581_v26 = vsel %vm1572_vm4, %v9770_v40, %v9769_v45  ;;  %v1582_v35 = vsel %vm1572_vm4, %v9772_v32, %v9771_v13  ;;  %v1683_v40 = vmax.f32 %v1439_v50, %v1580_v12  ;;  %v9781_v21 = vrot.slane %v5014_v4, 6 }
 0x129   : > { %v1583_v39 = vsel %vm1572_vm4, %v9774_v18, %v9773_v27  ;;  %v1687_v57 = vmax.f32 %v1440_v41, %v1581_v26  ;;  %v1691_v13 = vmax.f32 %v1441_v7, %v1582_v35  ;;  %v1759_v62 = vmax.f32 %v4999_v14, %v1679_v55 }
 0x12a   : > { %v1695_v18 = vmax.f32 %v1442_v3, %v1583_v39  ;;  %v1763_v22 = vmax.f32 %v5030_v58, %v1683_v40  ;;  %v1860_v41 = vrot.slane %v5030_v58, 6  ;;  %v1861_v26 = vrot.slane %v5074_v31, 6 }
 0x12b   : > { %v1767_v12 = vmax.f32 %v5074_v31, %v1687_v57  ;;  %v1771_v50 = vmax.f32 %v5201_v61, %v1691_v13  ;;  %v1862_v35 = vrot.slane %v5201_v61, 6  ;;  %v1863_v3 = vrot.slane %v5203_v43, 6 }
 0x12c   : > { %v1775_v7 = vmax.f32 %v5203_v43, %v1695_v18  ;;  %v9775_v27 = vrot.slane %v4513_v48, 6  ;;  %v9776_v39 = vrot.slane %v4999_v14, 6  ;;  %v9777_v57 = vrot.slane %v4520_v51, 6 }
 0x12d   : > { %v9778_v13 = vrot.slane %v4525_v54, 6  ;;  %v9787_v4 = vrot.slane %v5095_v53, 6  ;;  %v9792_v23 = vrot.slane %v4520_v51, 2 }
 0x12e   : > { %v5537_v55 = vsel %vm1893_vm5, %v9776_v39, %v9775_v27  ;;  %v5543_v40 = vsel %vm1893_vm5, %v1860_v41, %v9777_v57  ;;  %v9780_v52 = vmov %v9776_v39  ;;  %v9782_v39 = vrot.slane %v5063_v10, 6 }
 0x12f   : > { %v5549_v18 = vsel %vm1893_vm5, %v1861_v26, %v9778_v13  ;;  %v1920_v27 = vsel %vm1893_vm5, %v9781_v21, %v9780_v52  ;;  %v9783_v57 = vrot.slane %v4529_v56, 6  ;;  %v9785_v13 = vrot.slane %v4538_v63, 6 }
 0x130   : > { %9779 = vst [vmem:[#allocation66_spill] sm:$0xff] %v5549_v18  ;;  %v1921_v32 = vsel %vm1893_vm5, %v9782_v39, %v1860_v41  ;;  %v1922_v21 = vsel %vm1893_vm5, %v9787_v4, %v1861_v26  ;;  %v9788_v10 = vrot.slane %v5129_v34, 6  ;;  %v9789_v41 = vrot.slane %v5150_v19, 6 }
 0x131   : > { %v5565_v29 = vsel %vm1893_vm5, %v1862_v35, %v9783_v57  ;;  %v5571_v45 = vsel %vm1893_vm5, %v1863_v3, %v9785_v13  ;;  %v9790_v57 = vrot.slane %v4513_v48, 2  ;;  %v9791_v13 = vrot.slane %v4999_v14, 2  ;;  %v1140_v48 = vpop.f32.mrf.mxu0 }
 0x132   : > { %9784 = vst [vmem:[#allocation67_spill] sm:$0xff] %v5565_v29  ;;  %9786 = vst [vmem:[#allocation68_spill] sm:$0xff] %v5571_v45  ;;  %v1923_v52 = vsel %vm1893_vm5, %v9788_v10, %v1862_v35  ;;  %v1924_v39 = vsel %vm1893_vm5, %v9789_v41, %v1863_v3  ;;  %v9793_v26 = vrot.slane %v5030_v58, 2  ;;  %v9794_v35 = vrot.slane %v4525_v54, 2 }
 0x133   : > { %v2061_v53 = vsel %vm2054_vm6, %v9791_v13, %v9790_v57  ;;  %v9795_v19 = vrot.slane %v5074_v31, 2  ;;  %v9796_v14 = vrot.slane %v4529_v56, 2  ;;  %v9797_v4 = vrot.slane %v5201_v61, 2 }
 0x134   : > { %v2062_v34 = vsel %vm2054_vm6, %v9793_v26, %v9792_v23  ;;  %v9798_v58 = vrot.slane %v4538_v63, 2  ;;  %v9799_v10 = vrot.slane %v5203_v43, 2  ;;  %v2161_v23 = vmax.f32 %v1920_v27, %v2061_v53  ;;  %v5909_v26 = vld [vmem:[#allocation2 + $0x88] sm:$0xff] }
 0x135   : > { %v2063_v3 = vsel %vm2054_vm6, %v9795_v19, %v9794_v35  ;;  %v2064_v51 = vsel %vm2054_vm6, %v9797_v4, %v9796_v14  ;;  %v2165_v41 = vmax.f32 %v1921_v32, %v2062_v34  ;;  %vm1191_vm13 = vcmp.ge.f32.partialorder %v1140_v48, 0.0  ;;  %v4135_v34 = vpop.f32.mrf.mxu0  ;;  %v9807_v14 = vld [vmem:[#allocation13_spill] sm:$0xff] }
 0x136   : > { %v2065_v54 = vsel %vm2054_vm6, %v9799_v10, %v9798_v58  ;;  %v2169_v57 = vmax.f32 %v1922_v21, %v2063_v3  ;;  %v2173_v13 = vmax.f32 %v1923_v52, %v2064_v51  ;;  %v5625_v27 = vmax.f32 %v1759_v62, %v2161_v23 }
 0x137   : > { %v2177_v43 = vmax.f32 %v1924_v39, %v2065_v54  ;;  %v5627_v53 = vmax.f32 %v1763_v22, %v2165_v41  ;;  %v1203_v52 = vmul.f32 0.015625, %v1140_v48  ;;  %vm1194_vm9 = vcmp.ge.f32.partialorder %v4135_v34, 0.0  ;;  %v1295_v41 = vld [vmem:[#allocation2 + $0x170] sm:$0xff]  ;;  %v1150_v61 = vpop.f32.mrf.mxu0 }
 0x138   : > { %9802 = vst [vmem:[#allocation69_spill] sm:$0xff] %v5625_v27  ;;  %v5629_v32 = vmax.f32 %v1767_v12, %v2169_v57  ;;  %v5631_v21 = vmax.f32 %v1771_v50, %v2173_v13  ;;  %v1206_v50 = vmul.f32 0.015625, %v4135_v34  ;;  %v1543_v4 = vrot.slane %v1295_v41, 1 }
 0x139   : > { %9803 = vst [vmem:[#allocation70_spill] sm:$0xff] %v5627_v53  ;;  %v5633_v3 = vmax.f32 %v1775_v7, %v2177_v43  ;;  %v1294_v7 = vld [vmem:[#allocation2 + $0x168] sm:$0xff]  ;;  %v5645_v58 = vmax.f32 %v5625_v27, %v5627_v53  ;;  %v1215_v43 = vsel %vm1191_vm13, %v1140_v48, %v1203_v52  ;;  %v9808_v19 = vrot.slane %v9807_v14, 7 }
 0x13a   : > { %9804 = vst [vmem:[#allocation71_spill] sm:$0xff] %v5629_v32  ;;  %9805 = vst [vmem:[#allocation72_spill] sm:$0xff] %v5631_v21  ;;  %v5649_v10 = vmax.f32 %v5627_v53, %v5629_v32  ;;  %v5653_v54 = vmax.f32 %v5629_v32, %v5631_v21  ;;  %v1230_v62 = vsel %vm5125_vm15, %v1215_v43, -inf  ;;  %v1360_v22 = vrot.slane %v1294_v7, 7  ;;  %v1303_v53 = vld [vmem:[#allocation2 + $0x1b0] sm:$0xff] }
 0x13b   : > { %9806 = vst [vmem:[#allocation73_spill] sm:$0xff] %v5633_v3  ;;  %v5657_v23 = vmax.f32 %v5631_v21, %v5633_v3  ;;  %1243 = vst.msk [vmem:[#allocation2 + $0x228] sm:$0xff] %vm392_vm2, %v1230_v62  ;;  %v1218_v57 = vsel %vm1194_vm9, %v4135_v34, %v1206_v50  ;;  %v1523_v13 = vrot.slane %v1294_v7, 1  ;;  %v1844_v48 = vrot.slane %v1294_v7, 6  ;;  %v9814_v21 = vld [vmem:[#allocation14_spill] sm:$0xff] }
 0x13c   : > { %v5664_v51 = vmax.f32 %v5645_v58, %v5653_v54  ;;  %v1233_v39 = vsel %vm5125_vm15, %v1218_v57, -inf  ;;  %v1463_v63 = vsel %vm1411_vm3, %v9808_v19, %v1360_v22  ;;  %v2005_v43 = vrot.slane %v1294_v7, 2 }
 0x13d   : > { %v5668_v12 = vmax.f32 %v5649_v10, %v5657_v23  ;;  %1246 = vst.msk [vmem:[#allocation2 + $0x250] sm:$0xff] %vm392_vm2, %v1233_v39  ;;  %v1604_v34 = vsel %vm1572_vm4, %v1523_v13, %v1543_v4  ;;  %v9809_v62 = vrot.slane %v9807_v14, 1  ;;  %v9811_v57 = vrot.slane %v9807_v14, 6 }
 0x13e   : > { %v2025_v31 = vrot.slane %v1295_v41, 2  ;;  %v1698_v19 = vmax.f32 %v1463_v63, %v1604_v34  ;;  %v9812_v39 = vrot.slane %v9807_v14, 2  ;;  %v1380_v36 = vrot.slane %v1295_v41, 7 }
 0x13f   : > { %v2980_v52 = vmax.f32 %v5664_v51, %v5668_v12  ;;  %v5689_v50 = vsel %vm1572_vm4, %v9809_v62, %v1523_v13  ;;  %v1945_v56 = vsel %vm1893_vm5, %v9811_v57, %v1844_v48  ;;  %v9815_v9 = vrot.slane %v9814_v21, 1 }
 0x140   : > { %9810 = vst [vmem:[#allocation13_spill] sm:$0xff] %v5689_v50  ;;  %v5700_v6 = vsel %vm2054_vm6, %v9812_v39, %v2005_v43  ;;  %v2086_v62 = vsel %vm2054_vm6, %v2005_v43, %v2025_v31  ;;  %v1864_v57 = vrot.slane %v1295_v41, 6  ;;  %v9816_v50 = vrot.slane %v9814_v21, 2 }
 0x141   : > { %3273 = vrot.lane.b32.xlu1 %v2980_v52, %s4278_s18  ;;  %9813 = vst [vmem:[#allocation74_spill] sm:$0xff] %v5700_v6  ;;  %v1584_v13 = vsel %vm1572_vm4, %v1543_v4, %v9815_v9  ;;  %vm1193_vm10 = vcmp.ge.f32.partialorder %v1150_v61, 0.0  ;;  %v1778_v14 = vmax.f32 %v1294_v7, %v1698_v19  ;;  %v2180_v52 = vmax.f32 %v1945_v56, %v2086_v62  ;;  %v1298_v4 = vld [vmem:[#allocation2 + $0x188] sm:$0xff]  ;;  %v4138_v7 = vpop.f32.mrf.mxu0 }
 0x142   : > { %v2066_v63 = vsel %vm2054_vm6, %v2025_v31, %v9816_v50  ;;  %v9817_v34 = vrot.slane %v9814_v21, 7  ;;  %v1443_v9 = vsel %vm1411_vm3, %v1360_v22, %v1380_v36  ;;  %v9818_v6 = vrot.slane %v9814_v21, 6  ;;  %v1299_v50 = vld [vmem:[#allocation2 + $0x190] sm:$0xff] }
 0x143   : > { %v1699_v43 = vmax.f32 %v1443_v9, %v1584_v13  ;;  %v1925_v31 = vsel %vm1893_vm5, %v1844_v48, %v1864_v57  ;;  %v1205_v56 = vmul.f32 0.015625, %v1150_v61  ;;  %v5728_v19 = vmax.f32 %v1778_v14, %v2180_v52 }
 0x144   : > { %v5716_v39 = vsel %vm1411_vm3, %v1380_v36, %v9817_v34  ;;  %v5724_v32 = vsel %vm1893_vm5, %v1864_v57, %v9818_v6  ;;  %v2181_v62 = vmax.f32 %v1925_v31, %v2066_v63  ;;  %vm1196_vm11 = vcmp.ge.f32.partialorder %v4138_v7, 0.0  ;;  %v9821_v63 = vld [vmem:[#allocation16_spill] sm:$0xff] }
 0x145   : > { %9819 = vst [vmem:[#allocation14_spill] sm:$0xff] %v5728_v19  ;;  %v1208_v34 = vmul.f32 0.015625, %v4138_v7  ;;  %v1779_v36 = vmax.f32 %v1295_v41, %v1699_v43  ;;  %v1217_v22 = vsel %vm1193_vm10, %v1150_v61, %v1205_v56  ;;  %v1361_v13 = vrot.slane %v1298_v4, 7 }
 0x146   : > { %v1524_v21 = vrot.slane %v1298_v4, 1  ;;  %v5733_v6 = vmax.f32 %v5394_v47, %v5728_v19  ;;  %v1232_v48 = vsel %vm5125_vm15, %v1217_v22, -inf  ;;  %v1544_v9 = vrot.slane %v1299_v50, 1 }
 0x147   : > { %v1220_v57 = vsel %vm1196_vm11, %v4138_v7, %v1208_v34  ;;  %v5737_v42 = vmax.f32 %v1779_v36, %v2181_v62  ;;  %1245 = vst.msk [vmem:[#allocation2 + $0x248] sm:$0xff] %vm392_vm2, %v1232_v48  ;;  %v9822_v61 = vrot.slane %v9821_v63, 7  ;;  %v9823_v52 = vrot.slane %v9821_v63, 1 }
 0x148   : > { %v1235_v41 = vsel %vm5125_vm15, %v1220_v57, -inf  ;;  %v5754_v31 = vmax.f32 %v5416_v1, %v5733_v6  ;;  %v1605_v56 = vsel %vm1572_vm4, %v1524_v21, %v1544_v9  ;;  %v1845_v7 = vrot.slane %v1298_v4, 6 }
 0x149   : > { %9820 = vst [vmem:[#allocation75_spill] sm:$0xff] %v5737_v42  ;;  %v1464_v14 = vsel %vm1411_vm3, %v9822_v61, %v1361_v13  ;;  %v5750_v43 = vsel %vm1572_vm4, %v9823_v52, %v1524_v21  ;;  %1248 = vst.msk [vmem:[#allocation2 + $0x270] sm:$0xff] %vm392_vm2, %v1235_v41  ;;  %v2006_v62 = vrot.slane %v1298_v4, 2  ;;  %v5761_v34 = vmax.f32 %v5633_v3, %v5737_v42  ;;  %v9828_v52 = vld [vmem:[#allocation17_spill] sm:$0xff] }
 0x14a   : > { %9824 = vst [vmem:[#allocation16_spill] sm:$0xff] %v5750_v43  ;;  %v1702_v36 = vmax.f32 %v1464_v14, %v1605_v56  ;;  %v2026_v22 = vrot.slane %v1299_v50, 2  ;;  %v1381_v48 = vrot.slane %v1299_v50, 7  ;;  %v2981_v57 = vmax.f32 %v5437_v5, %v5754_v31  ;;  %v1160_v56 = vpop.f32.mrf.mxu0 }
 0x14b   : > { %v9825_v1 = vrot.slane %v9821_v63, 6  ;;  %v9826_v61 = vrot.slane %v9821_v63, 2  ;;  %v9829_v43 = vrot.slane %v9828_v52, 1  ;;  %v5781_v5 = vmax.f32 %v5653_v54, %v5761_v34 }
 0x14c   : > { %v1782_v47 = vmax.f32 %v1298_v4, %v1702_v36  ;;  %v9830_v63 = vrot.slane %v9828_v52, 7  ;;  %3275 = vrot.lane.b32.xlu0 %v2981_v57, %s4278_s18  ;;  %v9831_v54 = vrot.slane %v9828_v52, 2  ;;  %vm1195_vm12 = vcmp.ge.f32.partialorder %v1160_v56, 0.0 }
 0x14d   : > { %v1946_v41 = vsel %vm1893_vm5, %v9825_v1, %v1845_v7  ;;  %v5773_v21 = vsel %vm2054_vm6, %v9826_v61, %v2006_v62  ;;  %v1585_v14 = vsel %vm1572_vm4, %v1544_v9, %v9829_v43  ;;  %v2087_v1 = vsel %vm2054_vm6, %v2006_v62, %v2026_v22 }
 0x14e   : > { %9827 = vst [vmem:[#allocation76_spill] sm:$0xff] %v5773_v21  ;;  %v5789_v61 = vsel %vm1411_vm3, %v1381_v48, %v9830_v63  ;;  %v1302_v21 = vld [vmem:[#allocation2 + $0x1a8] sm:$0xff]  ;;  %v2184_v3 = vmax.f32 %v1946_v41, %v2087_v1  ;;  %v1444_v9 = vsel %vm1411_vm3, %v1361_v13, %v1381_v48  ;;  %v1865_v43 = vrot.slane %v1299_v50, 6 }
 0x14f   : > { %v2067_v4 = vsel %vm2054_vm6, %v2026_v22, %v9831_v54  ;;  %v2982_v62 = vmax.f32 %v5668_v12, %v5781_v5  ;;  %v1703_v36 = vmax.f32 %v1444_v9, %v1585_v14  ;;  %v1207_v63 = vmul.f32 0.015625, %v1160_v56 }
 0x150   : > { %v5800_v35 = vmax.f32 %v1782_v47, %v2184_v3  ;;  %v9833_v57 = vrot.slane %v9828_v52, 6  ;;  %v1926_v48 = vsel %vm1893_vm5, %v1845_v7, %v1865_v43  ;;  %v1362_v41 = vrot.slane %v1302_v21, 7  ;;  %v9834_v52 = vld [vmem:[#allocation22_spill] sm:$0xff] }
 0x151   : > { %3277 = vrot.lane.b32.xlu1 %v2982_v62, %s4278_s18  ;;  %v1783_v22 = vmax.f32 %v1299_v50, %v1703_v36  ;;  %v2185_v12 = vmax.f32 %v1926_v48, %v2067_v4  ;;  %v1219_v14 = vsel %vm1195_vm12, %v1160_v56, %v1207_v63  ;;  %v1525_v1 = vrot.slane %v1302_v21, 1 }
 0x152   : > { %9832 = vst [vmem:[#allocation17_spill] sm:$0xff] %v5800_v35  ;;  %v5806_v13 = vsel %vm1893_vm5, %v1865_v43, %v9833_v57  ;;  %v5813_v47 = vmax.f32 %v5728_v19, %v5800_v35  ;;  %v1234_v3 = vsel %vm5125_vm15, %v1219_v14, -inf  ;;  %v9835_v9 = vrot.slane %v9834_v52, 7 }
 0x153   : > { %v1545_v7 = vrot.slane %v1303_v53, 1  ;;  %v5821_v43 = vmax.f32 %v1783_v22, %v2185_v12  ;;  %1247 = vst.msk [vmem:[#allocation2 + $0x268] sm:$0xff] %vm392_vm2, %v1234_v3  ;;  %v9837_v50 = vrot.slane %v9834_v52, 1  ;;  %v1846_v4 = vrot.slane %v1302_v21, 6 }
 0x154   : > { %v1465_v54 = vsel %vm1411_vm3, %v9835_v9, %v1362_v41  ;;  %v2007_v62 = vrot.slane %v1302_v21, 2  ;;  %v2967_v60 = vmax.f32 %v5420_v44, %v5813_v47  ;;  %v2027_v63 = vrot.slane %v1303_v53, 2  ;;  %v1306_v9 = vld [vmem:[#allocation2 + $0x1c8] sm:$0xff] }
 0x155   : > { %9836 = vst [vmem:[#allocation22_spill] sm:$0xff] %v5821_v43  ;;  %v5828_v56 = vsel %vm1572_vm4, %v9837_v50, %v1525_v1  ;;  %v1606_v36 = vsel %vm1572_vm4, %v1525_v1, %v1545_v7  ;;  %v1382_v57 = vrot.slane %v1303_v53, 7  ;;  %v5836_v48 = vmax.f32 %v5737_v42, %v5821_v43 }
 0x156   : > { %9838 = vst [vmem:[#allocation77_spill] sm:$0xff] %v5828_v56  ;;  %v1706_v22 = vmax.f32 %v1465_v54, %v1606_v36  ;;  %v9839_v12 = vrot.slane %v9834_v52, 6  ;;  %v9840_v3 = vrot.slane %v9834_v52, 2  ;;  %v2983_v1 = vmax.f32 %v5754_v31, %v2967_v60  ;;  %v9842_v56 = vld [vmem:[#allocation23_spill] sm:$0xff]  ;;  %v1307_v52 = vld [vmem:[#allocation2 + $0x1d0] sm:$0xff] }
 0x157   : > { %v2088_v50 = vsel %vm2054_vm6, %v2007_v62, %v2027_v63  ;;  %v9843_v42 = vrot.slane %v9842_v56, 7  ;;  %v1445_v36 = vsel %vm1411_vm3, %v1362_v41, %v1382_v57  ;;  %v9844_v31 = vrot.slane %v9842_v56, 1 }
 0x158   : > { %v1947_v14 = vsel %vm1893_vm5, %v9839_v12, %v1846_v4  ;;  %v5846_v44 = vsel %vm2054_vm6, %v9840_v3, %v2007_v62  ;;  %v5861_v12 = vmax.f32 %v5657_v23, %v5836_v48  ;;  %v1786_v3 = vmax.f32 %v1302_v21, %v1706_v22  ;;  %3279 = vrot.lane.b32.xlu0 %v2983_v1, %s4278_s18 }
 0x159   : > { %9841 = vst [vmem:[#allocation78_spill] sm:$0xff] %v5846_v44  ;;  %v5855_v54 = vsel %vm1411_vm3, %v1382_v57, %v9843_v42  ;;  %v2188_v44 = vmax.f32 %v1947_v14, %v2088_v50  ;;  %v1586_v62 = vsel %vm1572_vm4, %v1545_v7, %v9844_v31  ;;  %v1866_v42 = vrot.slane %v1303_v53, 6  ;;  %v9848_v31 = vld [vmem:[#allocation26_spill] sm:$0xff] }
 0x15a   : > { %v1707_v19 = vmax.f32 %v1445_v36, %v1586_v62  ;;  %v9845_v45 = vrot.slane %v9842_v56, 2  ;;  %v1363_v57 = vrot.slane %v1306_v9, 7  ;;  %v2984_v23 = vmax.f32 %v5781_v5, %v5861_v12 }
 0x15b   : > { %v5874_v21 = vmax.f32 %v1786_v3, %v2188_v44  ;;  %v1526_v22 = vrot.slane %v1306_v9, 1  ;;  %v1546_v14 = vrot.slane %v1307_v52, 1  ;;  %v9847_v7 = vrot.slane %v9842_v56, 6 }
 0x15c   : > { %v2068_v41 = vsel %vm2054_vm6, %v2027_v63, %v9845_v45  ;;  %v1787_v50 = vmax.f32 %v1303_v53, %v1707_v19  ;;  %v1927_v36 = vsel %vm1893_vm5, %v1846_v4, %v1866_v42  ;;  %v9849_v45 = vrot.slane %v9848_v31, 7  ;;  %3281 = vrot.lane.b32.xlu1 %v2984_v23, %s4278_s18 }
 0x15d   : > { %9846 = vst [vmem:[#allocation23_spill] sm:$0xff] %v5874_v21  ;;  %v5880_v1 = vsel %vm1893_vm5, %v1866_v42, %v9847_v7  ;;  %v5891_v5 = vmax.f32 %v5800_v35, %v5874_v21  ;;  %v2189_v53 = vmax.f32 %v1927_v36, %v2068_v41  ;;  %v1607_v19 = vsel %vm1572_vm4, %v1526_v22, %v1546_v14  ;;  %v9854_v41 = vld [vmem:[#allocation27_spill] sm:$0xff] }
 0x15e   : > { %v1466_v63 = vsel %vm1411_vm3, %v9849_v45, %v1363_v57  ;;  %v9851_v56 = vrot.slane %v9848_v31, 1  ;;  %v1847_v3 = vrot.slane %v1306_v9, 6  ;;  %v2008_v62 = vrot.slane %v1306_v9, 2 }
 0x15f   : > { %9850 = vst [vmem:[#allocation26_spill] sm:$0xff] %v5891_v5  ;;  %v1710_v44 = vmax.f32 %v1466_v63, %v1607_v19  ;;  %v2028_v42 = vrot.slane %v1307_v52, 2  ;;  %v2969_v23 = vmax.f32 %v5733_v6, %v5891_v5  ;;  %v5903_v7 = vmax.f32 %v1787_v50, %v2189_v53  ;;  %v5923_v53 = vld [vmem:[#allocation2 + $0xa8] sm:$0xff]  ;;  %v9866_v5 = vld [vmem:[#allocation39_spill] sm:$0xff] }
 0x160   : > { %v5899_v4 = vsel %vm1572_vm4, %v9851_v56, %v1526_v22  ;;  %v1383_v45 = vrot.slane %v1307_v52, 7  ;;  %v9855_v36 = vrot.slane %v9854_v41, 1  ;;  %v9856_v22 = vrot.slane %v9848_v31, 6 }
 0x161   : > { %9852 = vst [vmem:[#allocation79_spill] sm:$0xff] %v5899_v4  ;;  %9853 = vst [vmem:[#allocation80_spill] sm:$0xff] %v5903_v7  ;;  %v1790_v29 = vmax.f32 %v1306_v9, %v1710_v44  ;;  %v2089_v19 = vsel %vm2054_vm6, %v2008_v62, %v2028_v42  ;;  %v9857_v6 = vrot.slane %v9848_v31, 2  ;;  %v5927_v9 = vmax.f32 %v5821_v43, %v5903_v7  ;;  %v5949_v4 = vld [vmem:[#allocation2 + $0xb0] sm:$0xff] }
 0x162   : > { %v1587_v35 = vsel %vm1572_vm4, %v1546_v14, %v9855_v36  ;;  %v1948_v63 = vsel %vm1893_vm5, %v9856_v22, %v1847_v3  ;;  %v2985_v14 = vmax.f32 %v2967_v60, %v2969_v23  ;;  %v9860_v44 = vrot.slane %v9854_v41, 7 }
 0x163   : > { %v5921_v50 = vsel %vm2054_vm6, %v9857_v6, %v2008_v62  ;;  %9859 = vst [vmem:[#allocation81_spill] sm:$0xff] %v5927_v9  ;;  %v2192_v56 = vmax.f32 %v1948_v63, %v2089_v19  ;;  %v1446_v31 = vsel %vm1411_vm3, %v1363_v57, %v1383_v45  ;;  %v1867_v22 = vrot.slane %v1307_v52, 6 }
 0x164   : > { %9858 = vst [vmem:[#allocation27_spill] sm:$0xff] %v5921_v50  ;;  %v5933_v36 = vsel %vm1411_vm3, %v1383_v45, %v9860_v44  ;;  %v9861_v62 = vrot.slane %v9854_v41, 2  ;;  %v9314_v6 = vrot.slane %v5909_v26, 7  ;;  %3283 = vrot.lane.b32.xlu0 %v2985_v14, %s4278_s18  ;;  %v2970_v63 = vmax.f32 %v5761_v34, %v5927_v9  ;;  %v5947_v50 = vld [vmem:[#allocation2 + $0x90] sm:$0xff] }
 0x165   : > { %v5945_v19 = vmax.f32 %v1790_v29, %v2192_v56  ;;  %v1711_v44 = vmax.f32 %v1446_v31, %v1587_v35  ;;  %v1354_v57 = vrot.slane %v5923_v53, 7  ;;  %v9863_v45 = vrot.slane %v9854_v41, 6  ;;  %v9864_v29 = vld [vmem:[#allocation33_spill] sm:$0xff] }
 0x166   : > { %v2069_v60 = vsel %vm2054_vm6, %v2028_v42, %v9861_v62  ;;  %v1928_v14 = vsel %vm1893_vm5, %v1847_v3, %v1867_v22  ;;  %v9865_v34 = vrot.slane %v9864_v29, 7  ;;  %v1516_v56 = vrot.slane %v5909_v26, 1 }
 0x167   : > { %9862 = vst [vmem:[#allocation82_spill] sm:$0xff] %v5945_v19  ;;  %v5956_v42 = vsel %vm1893_vm5, %v1867_v22, %v9863_v45  ;;  %v2986_v31 = vmax.f32 %v5861_v12, %v2970_v63  ;;  %v2953_v41 = vmax.f32 %v5874_v21, %v5945_v19  ;;  %v1791_v62 = vmax.f32 %v1307_v52, %v1711_v44 }
 0x168   : > { %v1456_v35 = vsel %vm1411_vm3, %v9865_v34, %v9314_v6  ;;  %v2193_v45 = vmax.f32 %v1928_v14, %v2069_v60  ;;  %v9867_v43 = vrot.slane %v9866_v5, 7  ;;  %v1517_v22 = vrot.slane %v5923_v53, 1 }
 0x169   : > { %v1536_v9 = vrot.slane %v5947_v50, 1  ;;  %v1537_v34 = vrot.slane %v5949_v4, 1  ;;  %3285 = vrot.lane.b32.xlu1 %v2986_v31, %s4278_s18  ;;  %v5979_v12 = vmax.f32 %v5813_v47, %v2953_v41  ;;  %v9870_v52 = vrot.slane %v9864_v29, 1 }
 0x16a   : > { %v1457_v3 = vsel %vm1411_vm3, %v9867_v43, %v1354_v57  ;;  %v5981_v6 = vmax.f32 %v1791_v62, %v2193_v45  ;;  %v1837_v43 = vrot.slane %v5909_v26, 6  ;;  %v9872_v31 = vrot.slane %v9866_v5, 1 }
 0x16b   : > { %9868 = vst [vmem:[#allocation33_spill] sm:$0xff] %v5979_v12  ;;  %v5987_v60 = vsel %vm1572_vm4, %v9870_v52, %v1516_v56  ;;  %v1597_v44 = vsel %vm1572_vm4, %v1516_v56, %v1536_v9  ;;  %v1598_v14 = vsel %vm1572_vm4, %v1517_v22, %v1537_v34  ;;  %v2987_v45 = vmax.f32 %v2969_v23, %v5979_v12 }
 0x16c   : > { %9869 = vst [vmem:[#allocation39_spill] sm:$0xff] %v5981_v6  ;;  %9871 = vst [vmem:[#allocation83_spill] sm:$0xff] %v5987_v60  ;;  %v5998_v47 = vsel %vm1572_vm4, %v9872_v31, %v1517_v22  ;;  %v2954_v52 = vmax.f32 %v5903_v7, %v5981_v6  ;;  %v1670_v19 = vmax.f32 %v1456_v35, %v1597_v44  ;;  %v1838_v56 = vrot.slane %v5923_v53, 6 }
 0x16d   : > { %9873 = vst [vmem:[#allocation84_spill] sm:$0xff] %v5998_v47  ;;  %v1674_v21 = vmax.f32 %v1457_v3, %v1598_v14  ;;  %v9875_v25 = vrot.slane %v9864_v29, 6  ;;  %v1998_v22 = vrot.slane %v5909_v26, 2  ;;  %v1999_v31 = vrot.slane %v5923_v53, 2  ;;  %3287 = vrot.lane.b32.xlu0 %v2987_v45, %s4278_s18  ;;  %v9882_v47 = vld [vmem:[#allocation40_spill] sm:$0xff] }
 0x16e   : > { %v6014_v23 = vmax.f32 %v5836_v48, %v2954_v52  ;;  %v1750_v62 = vmax.f32 %v5909_v26, %v1670_v19  ;;  %v2018_v3 = vrot.slane %v5947_v50, 2  ;;  %v9876_v44 = vrot.slane %v9866_v5, 6  ;;  %v9881_v52 = vld [vmem:[#allocation47_spill] sm:$0xff] }
 0x16f   : > { %v1938_v18 = vsel %vm1893_vm5, %v9875_v25, %v1837_v43  ;;  %v1754_v35 = vmax.f32 %v5923_v53, %v1674_v21  ;;  %v2019_v14 = vrot.slane %v5949_v4, 2  ;;  %v9877_v60 = vrot.slane %v9864_v29, 2 }
 0x170   : > { %v1939_v25 = vsel %vm1893_vm5, %v9876_v44, %v1838_v56  ;;  %v9879_v48 = vrot.slane %v9866_v5, 2  ;;  %v2988_v53 = vmax.f32 %v2970_v63, %v6014_v23  ;;  %v2079_v19 = vsel %vm2054_vm6, %v1998_v22, %v2018_v3 }
 0x171   : > { %v6028_v45 = vsel %vm2054_vm6, %v9877_v60, %v1998_v22  ;;  %v1374_v41 = vrot.slane %v5949_v4, 7  ;;  %v2080_v60 = vsel %vm2054_vm6, %v1999_v31, %v2019_v14  ;;  %v2152_v12 = vmax.f32 %v1938_v18, %v2079_v19 }
 0x172   : > { %9878 = vst [vmem:[#allocation85_spill] sm:$0xff] %v6028_v45  ;;  %v6034_v21 = vsel %vm2054_vm6, %v9879_v48, %v1999_v31  ;;  %v9883_v5 = vrot.slane %v9882_v47, 1  ;;  %3289 = vrot.lane.b32.xlu1 %v2988_v53, %s4278_s18  ;;  %v2156_v63 = vmax.f32 %v1939_v25, %v2080_v60  ;;  %v9884_v22 = vrot.slane %v9882_v47, 7 }
 0x173   : > { %9880 = vst [vmem:[#allocation86_spill] sm:$0xff] %v6034_v21  ;;  %v1858_v21 = vrot.slane %v5949_v4, 6  ;;  %v1437_v31 = vsel %vm1411_vm3, %v1354_v57, %v1374_v41  ;;  %v9886_v18 = vrot.slane %v9882_v47, 2  ;;  %v9887_v53 = vrot.slane %v9882_v47, 6 }
 0x174   : > { %v1578_v48 = vsel %vm1572_vm4, %v1537_v34, %v9883_v5  ;;  %v6054_v44 = vsel %vm1411_vm3, %v1374_v41, %v9884_v22  ;;  %v6062_v34 = vmax.f32 %v1750_v62, %v2152_v12  ;;  %v6072_v22 = vmax.f32 %v1754_v35, %v2156_v63 }
 0x175   : > { %9885 = vst [vmem:[#allocation47_spill] sm:$0xff] %v6054_v44  ;;  %v2060_v19 = vsel %vm2054_vm6, %v2019_v14, %v9886_v18  ;;  %v1675_v5 = vmax.f32 %v1437_v31, %v1578_v48  ;;  %v6068_v25 = vsel %vm1893_vm5, %v1858_v21, %v9887_v53  ;;  %v1919_v60 = vsel %vm1893_vm5, %v1838_v56, %v1858_v21  ;;  %v9889_v44 = vld [vmem:[#allocation34_spill] sm:$0xff] }
 0x176   : > { %9888 = vst [vmem:[#allocation40_spill] sm:$0xff] %v6068_v25  ;;  %v2157_v57 = vmax.f32 %v1919_v60, %v2060_v19  ;;  %v1373_v41 = vrot.slane %v5947_v50, 7  ;;  %v9890_v45 = vrot.slane %v9889_v44, 1  ;;  %v1857_v48 = vrot.slane %v5947_v50, 6  ;;  %v6107_v60 = vld [vmem:[#allocation2 + $0x1e8] sm:$0xff]  ;;  %v4225_v25 = vld [vmem:[#allocation2 + $0xa0] sm:$0xff] }
 0x177   : > { %v1755_v14 = vmax.f32 %v5949_v4, %v1675_v5  ;;  %v2935_v56 = vmax.f32 %v6062_v34, %v6072_v22  ;;  %v2937_v35 = vmax.f32 %v6072_v22, %v5385_v11  ;;  %v9891_v21 = vrot.slane %v9889_v44, 7 }
 0x178   : > { %v1577_v12 = vsel %vm1572_vm4, %v1536_v9, %v9890_v45  ;;  %v9893_v9 = vrot.slane %v5909_v26, 7  ;;  %v9896_v5 = vrot.slane %v9889_v44, 6  ;;  %vm3311_vm2 = vcmask 31760  }
 0x179   : > { %v6091_v63 = vsel %vm1411_vm3, %v1373_v41, %v9891_v21  ;;  %v6097_v4 = vmax.f32 %v1755_v14, %v2157_v57  ;;  %v6109_v21 = vld [vmem:[#allocation2 + $0x1f0] sm:$0xff]  ;;  %v2957_v26 = vmax.f32 %v2935_v56, %v5408_v59  ;;  %v1918_v57 = vsel %vm1893_vm5, %v1837_v43, %v1857_v48 }
 0x17a   : > { %9892 = vst [vmem:[#allocation34_spill] sm:$0xff] %v6091_v63  ;;  %v1436_v45 = vsel %vm1411_vm3, %v9893_v9, %v1373_v41  ;;  %v6105_v53 = vsel %vm1893_vm5, %v1857_v48, %v9896_v5  ;;  %v6113_v41 = vmax.f32 %v2937_v35, %v5412_v15  ;;  %v6121_v9 = vld [vmem:[#allocation2 + $0x1e0] sm:$0xff]  ;;  %v9901_v15 = vrot.slane %v9864_v29, 2 }
 0x17b   : > { %9894 = vst [vmem:[#allocation87_spill] sm:$0xff] %v6097_v4  ;;  %v1671_v31 = vmax.f32 %v1436_v45, %v1577_v12  ;;  %9897 = vst [vmem:[#allocation88_spill] sm:$0xff] %v6105_v53  ;;  %v9898_v12 = vrot.slane %v9889_v44, 2  ;;  %v6123_v45 = vld [vmem:[#allocation2 + $0x1f8] sm:$0xff]  ;;  %v2938_v5 = vmax.f32 %v6097_v4, %v5625_v27  ;;  %v1384_v19 = vrot.slane %v6109_v21, 7 }
 0x17c   : > { %9899 = vst [vmem:[#allocation89_spill] sm:$0xff] %v6121_v9  ;;  %9900 = vst [vmem:[#allocation90_spill] sm:$0xff] %v6123_v45  ;;  %v9329_v29 = vrot.slane %v6123_v45, 7  ;;  %v9324_v44 = vrot.slane %v6121_v9, 1  ;;  %vm3507_vm15 = vcmask 64512  }
 0x17d   : > { %v2059_v14 = vsel %vm2054_vm6, %v2018_v3, %v9898_v12  ;;  %v1751_v59 = vmax.f32 %v5947_v50, %v1671_v31  ;;  %v9902_v56 = vmov %v9898_v12  ;;  %v2975_v3 = vmax.f32 %v2957_v26, %v6113_v41 }
 0x17e   : > { %v6134_v43 = vsel %vm2054_vm6, %v9902_v56, %v9901_v15  ;;  %v2153_v48 = vmax.f32 %v1918_v57, %v2059_v14  ;;  %v9331_v12 = vrot.slane %v6107_v60, 7  ;;  %v2960_v50 = vmax.f32 %v2938_v5, %v5649_v10 }
 0x17f   : > { %9903 = vst [vmem:[#allocation91_spill] sm:$0xff] %v6134_v43  ;;  %3263 = vrot.lane.b32.xlu0 %v2975_v3, %s4278_s18  ;;  %v9325_v57 = vrot.slane %v6109_v21, 1  ;;  %v1567_v14 = vrot.slane %v6123_v45, 1  ;;  %v9328_v15 = vrot.slane %v6107_v60, 6  ;;  %v1868_v5 = vrot.slane %v6109_v21, 6 }
 0x180   : > { %v6142_v31 = vmax.f32 %v1751_v59, %v2153_v48  ;;  %v1447_v26 = vsel %vm1411_vm3, %v9331_v12, %v1384_v19  ;;  %v2978_v10 = vmax.f32 %v2960_v50, %v5664_v51  ;;  %v6163_v48 = vsel %vm1411_vm3, %v1384_v19, %v9329_v29  ;;  %v9910_v19 = vld [vmem:[#allocation29_spill] sm:$0xff] }
 0x181   : > { %9905 = vst [vmem:[#allocation93_spill] sm:$0xff] %v6163_v48  ;;  %v1588_v3 = vsel %vm1572_vm4, %v9325_v57, %v1567_v14  ;;  %v6173_v51 = vsel %vm1572_vm4, %v1567_v14, %v9324_v44  ;;  %v9326_v59 = vrot.slane %v6123_v45, 6  ;;  %v1929_v62 = vsel %vm1893_vm5, %v9328_v15, %v1868_v5  ;;  %v9912_v15 = vld [vmem:[#allocation42_spill] sm:$0xff]  ;;  %v6547_v48 = vld [vmem:[#allocation2 + $0x60] sm:$0xff] }
 0x182   : > { %9904 = vst [vmem:[#allocation92_spill] sm:$0xff] %v6142_v31  ;;  %v2936_v56 = vmax.f32 %v6142_v31, %v6097_v4  ;;  %9906 = vst [vmem:[#allocation94_spill] sm:$0xff] %v6173_v51  ;;  %3269 = vrot.lane.b32.xlu1 %v2978_v10, %s4278_s18  ;;  %v1715_v47 = vmax.f32 %v1447_v26, %v1588_v3  ;;  %v9330_v14 = vrot.slane %v6121_v9, 2  ;;  %v9327_v44 = vrot.slane %v6109_v21, 2 }
 0x183   : > { %v2049_v57 = vrot.slane %v6123_v45, 2  ;;  %v6193_v26 = vsel %vm1893_vm5, %v1868_v5, %v9326_v59  ;;  %v1704_v5 = vmax.f32 %v5789_v61, %v9910_v19  ;;  %v9911_v59 = vld [vmem:[#allocation37_spill] sm:$0xff]  ;;  %v1712_v29 = vmax.f32 %v5933_v36, %v9912_v15  ;;  %10024 = vst [vmem:[#allocation122_spill] sm:$0xff] %v6547_v48 }
 0x184   : > { %v2958_v35 = vmax.f32 %v2936_v56, %v5645_v58  ;;  %v1795_v58 = vmax.f32 %v6109_v21, %v1715_v47  ;;  %9907 = vst [vmem:[#allocation95_spill] sm:$0xff] %v6193_v26  ;;  %v2977_v56 = vmax.f32 %v6113_v41, %v5433_v37  ;;  %v9909_v47 = vld [vmem:[#allocation25_spill] sm:$0xff]  ;;  %v9914_v61 = vmax.f32 %v5429_v24, %v4682_v28  ;;  %v4218_v41 = vld [vmem:[#allocation2 + $0x138] sm:$0xff] }
 0x185   : > { %v2070_v3 = vsel %vm2054_vm6, %v9327_v44, %v2049_v57  ;;  %v1708_v44 = vmax.f32 %v5855_v54, %v9911_v59  ;;  %v9916_v54 = vmax.f32 %v5449_v30, %v4698_v16  ;;  %v4219_v59 = vld [vmem:[#allocation2 + $0x158] sm:$0xff]  ;;  %v9920_v16 = vld [vmem:[#allocation32_spill] sm:$0xff] }
 0x186   : > { %v2976_v10 = vmax.f32 %v2958_v35, %v2960_v50  ;;  %v6205_v35 = vsel %vm2054_vm6, %v2049_v57, %v9330_v14  ;;  %v1700_v50 = vmax.f32 %v5716_v39, %v9909_v47  ;;  %v2197_v37 = vmax.f32 %v1929_v62, %v2070_v3  ;;  %v4215_v57 = vld [vmem:[#allocation2 + $0xd8] sm:$0xff] }
 0x187   : > { %9908 = vst [vmem:[#allocation96_spill] sm:$0xff] %v6205_v35  ;;  %v9913_v14 = vmax.f32 %v5038_v17, %v4672_v46  ;;  %v4216_v47 = vld [vmem:[#allocation2 + $0xf8] sm:$0xff]  ;;  %v1772_v36 = vmax.f32 %v4218_v41, %v9916_v54  ;;  %v9918_v46 = vmax.f32 %v5455_v2, %v4707_v33  ;;  %v2186_v30 = vmax.f32 %v5806_v13, %v9920_v16  ;;  %v9921_v2 = vld [vmem:[#allocation38_spill] sm:$0xff] }
 0x188   : > { %3265 = vrot.lane.b32.xlu0 %v2976_v10, %s4278_s18  ;;  %v1764_v19 = vmax.f32 %v4216_v47, %v9914_v61  ;;  %v4217_v62 = vld [vmem:[#allocation2 + $0x118] sm:$0xff]  ;;  %v9915_v10 = vmax.f32 %v5443_v8, %v4690_v20  ;;  %v6230_v15 = vmax.f32 %v1795_v58, %v2197_v37  ;;  %v9925_v13 = vmax.f32 %v5543_v40, %v4730_v38  ;;  %v9927_v54 = vld [vmem:[#allocation66_spill] sm:$0xff]  ;;  %v9962_v37 = vld [vmem:[#allocation64_spill] sm:$0xff] }
 0x189   : > { %v1760_v39 = vmax.f32 %v4215_v57, %v9913_v14  ;;  %v1776_v17 = vmax.f32 %v4219_v59, %v9918_v46  ;;  %v4220_v14 = vld [vmem:[#allocation2 + $0x178] sm:$0xff]  ;;  %v9928_v59 = vld [vmem:[#allocation18_spill] sm:$0xff]  ;;  %v9963_v12 = vrot.slane %v9962_v37, 6 }
 0x18a   : > { %v1768_v3 = vmax.f32 %v4217_v62, %v9915_v10  ;;  %9917 = vst [vmem:[#allocation25_spill] sm:$0xff] %v6230_v15  ;;  %v1780_v28 = vmax.f32 %v4220_v14, %v1700_v50  ;;  %v4221_v24 = vld [vmem:[#allocation2 + $0x198] sm:$0xff]  ;;  %v9919_v62 = vld [vmem:[#allocation28_spill] sm:$0xff]  ;;  %v2956_v33 = vmax.f32 %v5981_v6, %v6230_v15  ;;  %v6256_v41 = vmax.f32 %v1764_v19, %v9925_v13  ;;  %v9931_v14 = vld [vmem:[#allocation81_spill] sm:$0xff] }
 0x18b   : > { %v1784_v57 = vmax.f32 %v4221_v24, %v1704_v5  ;;  %v4222_v47 = vld [vmem:[#allocation2 + $0x1b8] sm:$0xff]  ;;  %v2182_v10 = vmax.f32 %v5724_v32, %v9919_v62  ;;  %v9922_v50 = vld [vmem:[#allocation44_spill] sm:$0xff]  ;;  %v9923_v32 = vmax.f32 %v5537_v55, %v4722_v0  ;;  %v9929_v46 = vmax.f32 %v9927_v54, %v9928_v59  ;;  %v9944_v16 = vld [vmem:[#allocation14_spill] sm:$0xff] }
 0x18c   : > { %v1788_v61 = vmax.f32 %v4222_v47, %v1708_v44  ;;  %v4223_v20 = vld [vmem:[#allocation2 + $0x1d8] sm:$0xff]  ;;  %3267 = vrot.lane.b32.xlu0 %v2977_v56, %s4278_s18  ;;  %v2190_v44 = vmax.f32 %v5880_v1, %v9921_v2  ;;  %9926 = vst [vmem:[#allocation37_spill] sm:$0xff] %v6256_v41  ;;  %v2974_v1 = vmax.f32 %v9931_v14, %v2956_v33  ;;  %v9936_v0 = vld [vmem:[#allocation68_spill] sm:$0xff]  ;;  %v9333_v33 = vrot.slane %v9944_v16, 6  ;;  %v9947_v54 = vld [vmem:[#allocation82_spill] sm:$0xff] }
 0x18d   : > { %v1792_v8 = vmax.f32 %v4223_v20, %v1712_v29  ;;  %v2194_v29 = vmax.f32 %v5956_v42, %v9922_v50  ;;  %v6251_v5 = vmax.f32 %v1760_v39, %v9923_v32  ;;  %v6261_v56 = vmax.f32 %v1768_v3, %v9929_v46  ;;  %v9932_v24 = vld [vmem:[#allocation67_spill] sm:$0xff]  ;;  %v9937_v55 = vld [vmem:[#allocation20_spill] sm:$0xff]  ;;  %v9945_v50 = vld [vmem:[#allocation17_spill] sm:$0xff] }
 0x18e   : > { %v9933_v47 = vld [vmem:[#allocation19_spill] sm:$0xff]  ;;  %v9938_v39 = vmax.f32 %v9936_v0, %v9937_v55  ;;  %v6274_v38 = vmax.f32 %v1780_v28, %v2182_v10  ;;  %v6276_v40 = vmax.f32 %v1784_v57, %v2186_v30  ;;  %v6278_v19 = vmax.f32 %v1788_v61, %v2190_v44  ;;  %v9949_v28 = vld [vmem:[#allocation22_spill] sm:$0xff]  ;;  %v9966_v61 = vld [vmem:[#allocation65_spill] sm:$0xff] }
 0x18f   : > { %9924 = vst [vmem:[#allocation29_spill] sm:$0xff] %v6251_v5  ;;  %9930 = vst [vmem:[#allocation42_spill] sm:$0xff] %v6261_v56  ;;  %v9934_v42 = vmax.f32 %v9932_v24, %v9933_v47  ;;  %v6280_v3 = vmax.f32 %v1792_v8, %v2194_v29  ;;  %v2990_v2 = vmax.f32 %v6014_v23, %v2974_v1  ;;  %v9946_v32 = vld [vmem:[#allocation23_spill] sm:$0xff]  ;;  %v9334_v10 = vrot.slane %v9949_v28, 6  ;;  %v9952_v44 = vld [vmem:[#allocation70_spill] sm:$0xff] }
 0x190   : > { %v6272_v62 = vmax.f32 %v1776_v17, %v9938_v39  ;;  %9940 = vst [vmem:[#allocation38_spill] sm:$0xff] %v6274_v38  ;;  %9941 = vst [vmem:[#allocation44_spill] sm:$0xff] %v6276_v40  ;;  %v9948_v17 = vld [vmem:[#allocation75_spill] sm:$0xff]  ;;  %v9338_v57 = vrot.slane %v5903_v7, 6  ;;  %v9950_v8 = vrot.slane %v5625_v27, 6  ;;  %v9951_v23 = vrot.slane %v5385_v11, 6 }
 0x191   : > { %v6267_v20 = vmax.f32 %v1772_v36, %v9934_v42  ;;  %9942 = vst [vmem:[#allocation66_spill] sm:$0xff] %v6278_v19  ;;  %9943 = vst [vmem:[#allocation18_spill] sm:$0xff] %v6280_v3  ;;  %v9335_v36 = vrot.slane %v9945_v50, 6  ;;  %v9332_v46 = vrot.slane %v9948_v17, 6  ;;  %3293 = vrot.lane.b32.xlu1 %v2990_v2, %s4278_s18  ;;  %v9953_v29 = vrot.slane %v9952_v44, 6  ;;  %v9954_v14 = vld [vmem:[#allocation62_spill] sm:$0xff] }
 0x192   : > { %9939 = vst [vmem:[#allocation32_spill] sm:$0xff] %v6272_v62  ;;  %v2401_v30 = vsel %vm1893_vm5, %v9951_v23, %v9950_v8  ;;  %v9955_v1 = vrot.slane %v9954_v14, 6  ;;  %v9956_v47 = vld [vmem:[#allocation71_spill] sm:$0xff]  ;;  %v9960_v2 = vld [vmem:[#allocation72_spill] sm:$0xff]  ;;  %v9964_v23 = vld [vmem:[#allocation73_spill] sm:$0xff]  ;;  %v9967_v13 = vrot.slane %v9966_v61, 6 }
 0x193   : > { %9935 = vst [vmem:[#allocation28_spill] sm:$0xff] %v6267_v20  ;;  %v9957_v42 = vrot.slane %v9956_v47, 6  ;;  %v9958_v0 = vld [vmem:[#allocation63_spill] sm:$0xff]  ;;  %v9961_v58 = vrot.slane %v9960_v2, 6  ;;  %v9965_v59 = vrot.slane %v9964_v23, 6  ;;  %v9340_v35 = vrot.slane %v6251_v5, 2 }
 0x194   : > { %v2402_v24 = vsel %vm1893_vm5, %v9955_v1, %v9953_v29  ;;  %v9959_v55 = vrot.slane %v9958_v0, 6  ;;  %v2406_v1 = vsel %vm1893_vm5, %v9333_v33, %v9332_v46  ;;  %v9343_v26 = vrot.slane %v6256_v41, 2 }
 0x195   : > { %v2404_v8 = vsel %vm1893_vm5, %v9963_v12, %v9961_v58  ;;  %v2405_v29 = vsel %vm1893_vm5, %v9967_v13, %v9965_v59  ;;  %v2407_v12 = vsel %vm1893_vm5, %v9335_v36, %v9334_v10  ;;  %v9968_v58 = vrot.slane %v9946_v32, 6 }
 0x196   : > { %v2403_v39 = vsel %vm1893_vm5, %v9959_v55, %v9957_v42  ;;  %v9969_v59 = vrot.slane %v5981_v6, 6  ;;  %v9970_v42 = vrot.slane %v9947_v54, 6  ;;  %v9971_v36 = vrot.slane %v5625_v27, 2 }
 0x197   : > { %v2408_v13 = vsel %vm1893_vm5, %v9968_v58, %v9338_v57  ;;  %v9346_v58 = vrot.slane %v6261_v56, 2  ;;  %v9972_v57 = vrot.slane %v9952_v44, 2  ;;  %v9973_v33 = vrot.slane %v9956_v47, 2 }
 0x198   : > { %v2409_v55 = vsel %vm1893_vm5, %v9970_v42, %v9969_v59  ;;  %v2541_v46 = vsel %vm2054_vm6, %v9971_v36, %v9340_v35  ;;  %v9974_v42 = vrot.slane %v6267_v20, 2  ;;  %v9975_v51 = vrot.slane %v9960_v2, 2 }
 0x199   : > { %v2542_v59 = vsel %vm2054_vm6, %v9972_v57, %v9343_v26  ;;  %v2543_v10 = vsel %vm2054_vm6, %v9973_v33, %v9346_v58  ;;  %v9976_v35 = vrot.slane %v6272_v62, 2  ;;  %v9977_v41 = vrot.slane %v9964_v23, 2 }
 0x19a   : > { %v2544_v36 = vsel %vm2054_vm6, %v9975_v51, %v9974_v42  ;;  %v9978_v26 = vrot.slane %v6274_v38, 2  ;;  %v9979_v56 = vrot.slane %v9948_v17, 2  ;;  %v9980_v58 = vrot.slane %v6276_v40, 2 }
 0x19b   : > { %v2545_v57 = vsel %vm2054_vm6, %v9977_v41, %v9976_v35  ;;  %v9981_v20 = vrot.slane %v9949_v28, 2  ;;  %v9982_v42 = vrot.slane %v6278_v19, 2  ;;  %v9983_v62 = vrot.slane %v5903_v7, 2 }
 0x19c   : > { %v2546_v33 = vsel %vm2054_vm6, %v9979_v56, %v9978_v26  ;;  %v9984_v41 = vrot.slane %v6280_v3, 2  ;;  %v9985_v38 = vrot.slane %v5981_v6, 2  ;;  %v6413_v56 = vmax.f32 %v2401_v30, %v2541_v46 }
 0x19d   : > { %v2547_v51 = vsel %vm2054_vm6, %v9981_v20, %v9980_v58  ;;  %v2548_v35 = vsel %vm2054_vm6, %v9983_v62, %v9982_v42  ;;  %v6415_v40 = vmax.f32 %v2402_v24, %v2542_v59  ;;  %v6417_v5 = vmax.f32 %v2403_v39, %v2543_v10 }
 0x19e   : > { %v2549_v26 = vsel %vm2054_vm6, %v9985_v38, %v9984_v41  ;;  %9986 = vst [vmem:[#allocation81_spill] sm:$0xff] %v6413_v56  ;;  %v6419_v20 = vmax.f32 %v2404_v8, %v2544_v36  ;;  %v6421_v58 = vmax.f32 %v2405_v29, %v2545_v57  ;;  %v6423_v19 = vmax.f32 %v2406_v1, %v2546_v33 }
 0x19f   : > { %9987 = vst [vmem:[#allocation67_spill] sm:$0xff] %v6415_v40  ;;  %9988 = vst [vmem:[#allocation19_spill] sm:$0xff] %v6417_v5  ;;  %v6425_v62 = vmax.f32 %v2407_v12, %v2547_v51  ;;  %v6427_v42 = vmax.f32 %v2408_v13, %v2548_v35  ;;  %v6429_v3 = vmax.f32 %v2409_v55, %v2549_v26  ;;  %v1344_v13 = vrot.slane %v6121_v9, 7 }
 0x1a0   : > { %9989 = vst [vmem:[#allocation68_spill] sm:$0xff] %v6419_v20  ;;  %9990 = vst [vmem:[#allocation20_spill] sm:$0xff] %v6421_v58  ;;  %v6433_v38 = vmax.f32 %v6413_v56, %v6415_v40  ;;  %v6437_v46 = vmax.f32 %v6415_v40, %v6417_v5  ;;  %v6441_v10 = vmax.f32 %v6417_v5, %v6419_v20  ;;  %v1527_v55 = vrot.slane %v6107_v60, 1  ;;  %v6515_v40 = vld [vmem:[#allocation2 + $0x68] sm:$0xff] }
 0x1a1   : > { %9991 = vst [vmem:[#allocation97_spill] sm:$0xff] %v6423_v19  ;;  %9992 = vst [vmem:[#allocation98_spill] sm:$0xff] %v6425_v62  ;;  %v6445_v30 = vmax.f32 %v6419_v20, %v6421_v58  ;;  %v6449_v24 = vmax.f32 %v6421_v58, %v6423_v19  ;;  %v6453_v39 = vmax.f32 %v6423_v19, %v6425_v62  ;;  %v1828_v57 = vrot.slane %v6121_v9, 6 }
 0x1a2   : > { %9993 = vst [vmem:[#allocation99_spill] sm:$0xff] %v6427_v42  ;;  %9994 = vst [vmem:[#allocation100_spill] sm:$0xff] %v6429_v3  ;;  %v6457_v8 = vmax.f32 %v6425_v62, %v6427_v42  ;;  %v6461_v29 = vmax.f32 %v6427_v42, %v6429_v3  ;;  %v6465_v1 = vmax.f32 %v6433_v38, %v6441_v10  ;;  %v2009_v33 = vrot.slane %v6107_v60, 2  ;;  %v6539_v3 = vld [vmem:[#allocation2 + $0x70] sm:$0xff] }
 0x1a3   : > { %9995 = vst [vmem:[#allocation101_spill] sm:$0xff] %v6433_v38  ;;  %9996 = vst [vmem:[#allocation102_spill] sm:$0xff] %v6437_v46  ;;  %v6469_v12 = vmax.f32 %v6437_v46, %v6445_v30  ;;  %v10008_v35 = vrot.slane %v6107_v60, 7  ;;  %v10009_v26 = vrot.slane %v6123_v45, 7  ;;  %v10012_v58 = vrot.slane %v6121_v9, 1 }
 0x1a4   : > { %9997 = vst [vmem:[#allocation103_spill] sm:$0xff] %v6441_v10  ;;  %9998 = vst [vmem:[#allocation104_spill] sm:$0xff] %v6445_v30  ;;  %v6475_v59 = vmax.f32 %v6449_v24, %v6457_v8  ;;  %v6479_v36 = vmax.f32 %v6453_v39, %v6461_v29  ;;  %v10014_v5 = vrot.slane %v6107_v60, 6  ;;  %v1332_v15 = vrot.slane %v6547_v48, 7  ;;  %v10031_v30 = vld [vmem:[#allocation46_spill] sm:$0xff] }
 0x1a5   : > { %9999 = vst [vmem:[#allocation105_spill] sm:$0xff] %v6449_v24  ;;  %10000 = vst [vmem:[#allocation106_spill] sm:$0xff] %v6453_v39  ;;  %v6485_v51 = vmax.f32 %v6465_v1, %v6469_v12  ;;  %v1467_v41 = vsel %vm1411_vm3, %v1344_v13, %v10008_v35  ;;  %v6495_v42 = vsel %vm1411_vm3, %v10009_v26, %v1344_v13  ;;  %v6513_v26 = vld [vmem:[#allocation2 + $0x48] sm:$0xff]  ;;  %v10034_v46 = vrot.slane %v6547_v48, 1  ;;  %v4224_v24 = vld [vmem:[#allocation2 + $0x80] sm:$0xff] }
 0x1a6   : > { %10001 = vst [vmem:[#allocation107_spill] sm:$0xff] %v6457_v8  ;;  %10002 = vst [vmem:[#allocation108_spill] sm:$0xff] %v6461_v29  ;;  %v10011_v29 = vrot.slane %v6109_v21, 1  ;;  %v3064_v19 = vmax.f32 %v6475_v59, %v6479_v36  ;;  %v6507_v20 = vsel %vm1572_vm4, %v10012_v58, %v1527_v55  ;;  %v1949_v13 = vsel %vm1893_vm5, %v1828_v57, %v10014_v5 }
 0x1a7   : > { %10003 = vst [vmem:[#allocation109_spill] sm:$0xff] %v6465_v1  ;;  %10004 = vst [vmem:[#allocation110_spill] sm:$0xff] %v6469_v12  ;;  %v10017_v58 = vrot.slane %v6109_v21, 2  ;;  %v10018_v5 = vrot.slane %v6121_v9, 2  ;;  %v10029_v9 = vld [vmem:[#allocation26_spill] sm:$0xff] }
 0x1a8   : > { %10005 = vst [vmem:[#allocation111_spill] sm:$0xff] %v6475_v59  ;;  %10006 = vst [vmem:[#allocation112_spill] sm:$0xff] %v6479_v36  ;;  %v1608_v62 = vsel %vm1572_vm4, %v1527_v55, %v10011_v29  ;;  %v10015_v36 = vrot.slane %v6123_v45, 6  ;;  %v6537_v29 = vld [vmem:[#allocation2 + $0x58] sm:$0xff]  ;;  %v6545_v45 = vld [vmem:[#allocation2 + $0x40] sm:$0xff]  ;;  %v1351_v59 = vrot.slane %v6513_v26, 7 }
 0x1a9   : > { %10007 = vst [vmem:[#allocation113_spill] sm:$0xff] %v6485_v51  ;;  %10010 = vst [vmem:[#allocation114_spill] sm:$0xff] %v6495_v42  ;;  %v1714_v35 = vmax.f32 %v1467_v41, %v1608_v62  ;;  %v2090_v62 = vsel %vm2054_vm6, %v2009_v33, %v10017_v58  ;;  %v6533_v55 = vsel %vm2054_vm6, %v10018_v5, %v2009_v33  ;;  %v6535_v41 = vld [vmem:[#allocation2 + $0x50] sm:$0xff]  ;;  %v6549_v33 = vld [vmem:[#allocation2 + $0x78] sm:$0xff]  ;;  %v1331_v5 = vrot.slane %v6545_v45, 7 }
 0x1aa   : > { %10013 = vst [vmem:[#allocation115_spill] sm:$0xff] %v6507_v20  ;;  %v6523_v8 = vsel %vm1893_vm5, %v10015_v36, %v1828_v57  ;;  %10019 = vst [vmem:[#allocation117_spill] sm:$0xff] %v6533_v55  ;;  %v3080_v36 = vmax.f32 %v6485_v51, %v3064_v19  ;;  %v2196_v58 = vmax.f32 %v1949_v13, %v2090_v62  ;;  %v1352_v19 = vrot.slane %v6515_v40, 7 }
 0x1ab   : > { %10016 = vst [vmem:[#allocation116_spill] sm:$0xff] %v6523_v8  ;;  %10020 = vst [vmem:[#allocation118_spill] sm:$0xff] %v6535_v41  ;;  %v1794_v57 = vmax.f32 %v6107_v60, %v1714_v35  ;;  %v9393_v35 = vrot.slane %v6535_v41, 7  ;;  %v9394_v13 = vrot.slane %v6539_v3, 7  ;;  %v1454_v55 = vsel %vm1411_vm3, %v1331_v5, %v1351_v59 }
 0x1ac   : > { %10021 = vst [vmem:[#allocation119_spill] sm:$0xff] %v6537_v29  ;;  %10022 = vst [vmem:[#allocation120_spill] sm:$0xff] %v6539_v3  ;;  %3362 = vrot.lane.b32.xlu1 %v3080_v36, %s4279_s11  ;;  %v1455_v8 = vsel %vm1411_vm3, %v1332_v15, %v1352_v19  ;;  %v10027_v1 = vrot.slane %v6537_v29, 7 }
 0x1ad   : > { %10023 = vst [vmem:[#allocation121_spill] sm:$0xff] %v6545_v45  ;;  %10025 = vst [vmem:[#allocation123_spill] sm:$0xff] %v6549_v33  ;;  %v6556_v60 = vmax.f32 %v1794_v57, %v2196_v58  ;;  %v1434_v21 = vsel %vm1411_vm3, %v1351_v59, %v9393_v35  ;;  %v1435_v62 = vsel %vm1411_vm3, %v1352_v19, %v9394_v13  ;;  %v10028_v57 = vrot.slane %v6549_v33, 7 }
 0x1ae   : > { %v1474_v36 = vsel %vm1411_vm3, %v10027_v1, %v1331_v5  ;;  %v1514_v59 = vrot.slane %v6513_v26, 1  ;;  %v1515_v35 = vrot.slane %v6515_v40, 1  ;;  %v1534_v19 = vrot.slane %v6535_v41, 1  ;;  %v10030_v5 = vld [vmem:[#allocation84_spill] sm:$0xff] }
 0x1af   : > { %10026 = vst [vmem:[#allocation124_spill] sm:$0xff] %v6556_v60  ;;  %v2955_v58 = vmax.f32 %v9947_v54, %v6556_v60  ;;  %v1475_v51 = vsel %vm1411_vm3, %v10028_v57, %v1332_v15  ;;  %v1535_v13 = vrot.slane %v6539_v3, 1  ;;  %v1673_v39 = vmax.f32 %v10031_v30, %v10030_v5  ;;  %v10032_v15 = vld [vmem:[#allocation33_spill] sm:$0xff] }
 0x1b0   : > { %v1616_v42 = vsel %vm1572_vm4, %v10034_v46, %v1515_v35  ;;  %v10035_v1 = vrot.slane %v6537_v29, 1 }
 0x1b1   : > { %v2973_v20 = vmax.f32 %v10029_v9, %v2955_v58  ;;  %v1595_v9 = vsel %vm1572_vm4, %v1514_v59, %v1534_v19  ;;  %v10033_v58 = vrot.slane %v6545_v45, 1  ;;  %v1665_v12 = vmax.f32 %v1475_v51, %v1616_v42  ;;  %v10040_v51 = vld [vmem:[#allocation4_spill] sm:$0xff] }
 0x1b2   : > { %v1575_v30 = vsel %vm1572_vm4, %v1534_v19, %v10035_v1  ;;  %v10037_v19 = vld [vmem:[#allocation45_spill] sm:$0xff]  ;;  %v10038_v1 = vld [vmem:[#allocation83_spill] sm:$0xff] }
 0x1b3   : > { %v2989_v57 = vmax.f32 %v10032_v15, %v2973_v20  ;;  %v1615_v60 = vsel %vm1572_vm4, %v10033_v58, %v1514_v59  ;;  %v10036_v20 = vrot.slane %v6549_v33, 1  ;;  %v1596_v15 = vsel %vm1572_vm4, %v1515_v35, %v1535_v13 }
 0x1b4   : > { %v1661_v38 = vmax.f32 %v1474_v36, %v1615_v60  ;;  %v1662_v59 = vmax.f32 %v1454_v55, %v1595_v9  ;;  %v1663_v58 = vmax.f32 %v1434_v21, %v1575_v30  ;;  %v1666_v46 = vmax.f32 %v1455_v8, %v1596_v15  ;;  %v4226_v8 = vld [vmem:[#allocation2 + $0xc0] sm:$0xff]  ;;  %v10043_v36 = vld [vmem:[#allocation5_spill] sm:$0xff]  ;;  %v10047_v9 = vld [vmem:[#allocation54_spill] sm:$0xff] }
 0x1b5   : > { %v1576_v5 = vsel %vm1572_vm4, %v1535_v13, %v10036_v20  ;;  %3291 = vrot.lane.b32.xlu0 %v2989_v57, %s4278_s18  ;;  %v10039_v43 = vmax.f32 %v10037_v19, %v10038_v1  ;;  %v1753_v20 = vmax.f32 %v4225_v25, %v1673_v39  ;;  %v1745_v35 = vmax.f32 %v6547_v48, %v1665_v12  ;;  %v4228_v39 = vld [vmem:[#allocation2 + $0x100] sm:$0xff]  ;;  %v10046_v57 = vld [vmem:[#allocation6_spill] sm:$0xff]  ;;  %v10049_v15 = vld [vmem:[#allocation7_spill] sm:$0xff] }
 0x1b6   : > { %v1667_v56 = vmax.f32 %v1435_v62, %v1576_v5  ;;  %v1741_v10 = vmax.f32 %v6545_v45, %v1661_v38  ;;  %v1742_v18 = vmax.f32 %v6513_v26, %v1662_v59  ;;  %v1743_v60 = vmax.f32 %v6535_v41, %v1663_v58  ;;  %v10041_v38 = vld [vmem:[#allocation52_spill] sm:$0xff]  ;;  %v10050_v59 = vld [vmem:[#allocation55_spill] sm:$0xff] }
 0x1b7   : > { %v1749_v53 = vmax.f32 %v4224_v24, %v10039_v43  ;;  %v1746_v55 = vmax.f32 %v6515_v40, %v1666_v46  ;;  %v10042_v21 = vmax.f32 %v10040_v51, %v10041_v38  ;;  %v4227_v62 = vld [vmem:[#allocation2 + $0xe0] sm:$0xff]  ;;  %v10044_v43 = vld [vmem:[#allocation53_spill] sm:$0xff]  ;;  %v10048_v30 = vmax.f32 %v10046_v57, %v10047_v9 }
 0x1b8   : > { %v1747_v42 = vmax.f32 %v6539_v3, %v1667_v56  ;;  %v10045_v24 = vmax.f32 %v10043_v36, %v10044_v43  ;;  %v4229_v12 = vld [vmem:[#allocation2 + $0x120] sm:$0xff]  ;;  %v10051_v58 = vmax.f32 %v10049_v15, %v10050_v59  ;;  %v1815_v38 = vrot.slane %v6545_v45, 6 }
 0x1b9   : > { %v1757_v13 = vmax.f32 %v4226_v8, %v10042_v21  ;;  %v1765_v5 = vmax.f32 %v4228_v39, %v10048_v30  ;;  %v4230_v46 = vld [vmem:[#allocation2 + $0x140] sm:$0xff]  ;;  %v1816_v21 = vrot.slane %v6547_v48, 6  ;;  %v1836_v36 = vrot.slane %v6515_v40, 6 }
 0x1ba   : > { %v1761_v25 = vmax.f32 %v4227_v62, %v10045_v24  ;;  %v1769_v56 = vmax.f32 %v4229_v12, %v10051_v58  ;;  %v10052_v19 = vld [vmem:[#allocation8_spill] sm:$0xff]  ;;  %v1835_v62 = vrot.slane %v6513_v26, 6  ;;  %v9408_v43 = vrot.slane %v6535_v41, 6 }
 0x1bb   : > { %v10053_v1 = vld [vmem:[#allocation56_spill] sm:$0xff]  ;;  %v9407_v24 = vrot.slane %v6539_v3, 6  ;;  %v9410_v39 = vrot.slane %v6537_v29, 6  ;;  %v9409_v57 = vrot.slane %v6549_v33, 6  ;;  %v9414_v9 = vrot.slane %v6545_v45, 2 }
 0x1bc   : > { %v10054_v51 = vmax.f32 %v10052_v19, %v10053_v1  ;;  %v9417_v30 = vrot.slane %v6547_v48, 2  ;;  %v1916_v12 = vsel %vm1893_vm5, %v1835_v62, %v9408_v43  ;;  %v1936_v59 = vsel %vm1893_vm5, %v1815_v38, %v1835_v62 }
 0x1bd   : > { %v1917_v15 = vsel %vm1893_vm5, %v1836_v36, %v9407_v24  ;;  %v1937_v58 = vsel %vm1893_vm5, %v1816_v21, %v1836_v36  ;;  %v1957_v19 = vsel %vm1893_vm5, %v9409_v57, %v1816_v21  ;;  %v1996_v1 = vrot.slane %v6513_v26, 2  ;;  %v10055_v21 = vld [vmem:[#allocation86_spill] sm:$0xff] }
 0x1be   : > { %v1773_v8 = vmax.f32 %v4230_v46, %v10054_v51  ;;  %v1956_v46 = vsel %vm1893_vm5, %v9410_v39, %v1815_v38  ;;  %v1997_v51 = vrot.slane %v6515_v40, 2  ;;  %v2016_v24 = vrot.slane %v6535_v41, 2  ;;  %v10056_v40 = vld [vmem:[#allocation48_spill] sm:$0xff]  ;;  %v10057_v39 = vld [vmem:[#allocation85_spill] sm:$0xff] }
 0x1bf   : > { %v2017_v62 = vrot.slane %v6539_v3, 2  ;;  %v9422_v36 = vrot.slane %v6537_v29, 2  ;;  %v2097_v38 = vsel %vm2054_vm6, %v9414_v9, %v1996_v1  ;;  %v2155_v57 = vmax.f32 %v10056_v40, %v10055_v21  ;;  %v10063_v29 = vld [vmem:[#allocation57_spill] sm:$0xff] }
 0x1c0   : > { %v2098_v26 = vsel %vm2054_vm6, %v9417_v30, %v1997_v51  ;;  %v10058_v63 = vmax.f32 %v9881_v52, %v10057_v39  ;;  %v10060_v9 = vrot.slane %v6549_v33, 2  ;;  %v2077_v30 = vsel %vm2054_vm6, %v1996_v1, %v2016_v24 }
 0x1c1   : > { %v2057_v43 = vsel %vm2054_vm6, %v2016_v24, %v9422_v36  ;;  %v2078_v21 = vsel %vm2054_vm6, %v1997_v51, %v2017_v62  ;;  %v2143_v40 = vmax.f32 %v1956_v46, %v2097_v38  ;;  %v2144_v52 = vmax.f32 %v1936_v59, %v2077_v30  ;;  %v10062_v36 = vld [vmem:[#allocation9_spill] sm:$0xff] }
 0x1c2   : > { %v6692_v3 = vmax.f32 %v1749_v53, %v10058_v63  ;;  %v2058_v48 = vsel %vm2054_vm6, %v2017_v62, %v10060_v9  ;;  %v2145_v63 = vmax.f32 %v1916_v12, %v2057_v43  ;;  %v2147_v53 = vmax.f32 %v1957_v19, %v2098_v26 }
 0x1c3   : > { %v2148_v39 = vmax.f32 %v1937_v58, %v2078_v21  ;;  %v2149_v45 = vmax.f32 %v1917_v15, %v2058_v48  ;;  %v6706_v41 = vmax.f32 %v1753_v20, %v2155_v57  ;;  %v10064_v33 = vmax.f32 %v10062_v36, %v10063_v29  ;;  %v10070_v48 = vld [vmem:[#allocation10_spill] sm:$0xff]  ;;  %v10074_v29 = vld [vmem:[#allocation11_spill] sm:$0xff]  ;;  %v10079_v15 = vld [vmem:[#allocation60_spill] sm:$0xff] }
 0x1c4   : > { %10059 = vst [vmem:[#allocation26_spill] sm:$0xff] %v6692_v3  ;;  %v6713_v9 = vmax.f32 %v1741_v10, %v2143_v40  ;;  %v6715_v7 = vmax.f32 %v1742_v18, %v2144_v52  ;;  %v6717_v24 = vmax.f32 %v1743_v60, %v2145_v63  ;;  %v6719_v1 = vmax.f32 %v1745_v35, %v2147_v53  ;;  %v10071_v20 = vld [vmem:[#allocation58_spill] sm:$0xff]  ;;  %v10078_v18 = vld [vmem:[#allocation12_spill] sm:$0xff]  ;;  %v10082_v35 = vld [vmem:[#allocation15_spill] sm:$0xff] }
 0x1c5   : > { %10061 = vst [vmem:[#allocation84_spill] sm:$0xff] %v6706_v41  ;;  %v6711_v6 = vmax.f32 %v1757_v13, %v10064_v33  ;;  %v6721_v30 = vmax.f32 %v1746_v55, %v2148_v39  ;;  %v6723_v43 = vmax.f32 %v1747_v42, %v2149_v45  ;;  %v10072_v57 = vmax.f32 %v10070_v48, %v10071_v20  ;;  %v10075_v33 = vld [vmem:[#allocation59_spill] sm:$0xff]  ;;  %v10083_v55 = vld [vmem:[#allocation61_spill] sm:$0xff] }
 0x1c6   : > { %10066 = vst [vmem:[#allocation33_spill] sm:$0xff] %v6713_v9  ;;  %10067 = vst [vmem:[#allocation45_spill] sm:$0xff] %v6717_v24  ;;  %v10076_v13 = vmax.f32 %v10074_v29, %v10075_v33  ;;  %v10080_v60 = vmax.f32 %v10078_v18, %v10079_v15  ;;  %v10084_v58 = vmax.f32 %v10082_v35, %v10083_v55  ;;  %v9440_v42 = vrot.slane %v6713_v9, 6 }
 0x1c7   : > { %10065 = vst [vmem:[#allocation46_spill] sm:$0xff] %v6711_v6  ;;  %10068 = vst [vmem:[#allocation83_spill] sm:$0xff] %v6719_v1  ;;  %v6728_v12 = vmax.f32 %v1761_v25, %v10072_v57  ;;  %v9438_v25 = vrot.slane %v6719_v1, 6  ;;  %v9437_v46 = vrot.slane %v6692_v3, 6  ;;  %v9436_v19 = vrot.slane %v6706_v41, 6 }
 0x1c8   : > { %10069 = vst [vmem:[#allocation4_spill] sm:$0xff] %v6723_v43  ;;  %v6733_v10 = vmax.f32 %v1765_v5, %v10076_v13  ;;  %v6738_v59 = vmax.f32 %v1769_v56, %v10080_v60  ;;  %v6743_v45 = vmax.f32 %v1773_v8, %v10084_v58  ;;  %v9435_v5 = vrot.slane %v6711_v6, 6 }
 0x1c9   : > { %10073 = vst [vmem:[#allocation52_spill] sm:$0xff] %v6728_v12  ;;  %v9434_v51 = vrot.slane %v6728_v12, 6  ;;  %v9448_v8 = vrot.slane %v6715_v7, 6  ;;  %v9447_v38 = vrot.slane %v6721_v30, 6  ;;  %v9444_v26 = vrot.slane %v6072_v22, 6 }
 0x1ca   : > { %10077 = vst [vmem:[#allocation5_spill] sm:$0xff] %v6733_v10  ;;  %10081 = vst [vmem:[#allocation53_spill] sm:$0xff] %v6738_v59  ;;  %v9433_v56 = vrot.slane %v6733_v10, 6  ;;  %v9431_v62 = vrot.slane %v6738_v59, 6  ;;  %v9432_v36 = vrot.slane %v6743_v45, 6  ;;  %v10086_v21 = vrot.slane %v6062_v34, 6 }
 0x1cb   : > { %10085 = vst [vmem:[#allocation6_spill] sm:$0xff] %v6743_v45  ;;  %v10087_v52 = vrot.slane %v5385_v11, 6  ;;  %v2417_v53 = vsel %vm1893_vm5, %v9440_v42, %v9448_v8  ;;  %v10088_v39 = vrot.slane %v9954_v14, 6  ;;  %v10089_v20 = vrot.slane %v9958_v0, 6  ;;  %v10120_v8 = vld [vmem:[#allocation41_spill] sm:$0xff] }
 0x1cc   : > { %v2419_v40 = vsel %vm1893_vm5, %v9437_v46, %v10086_v21  ;;  %v10090_v29 = vrot.slane %v9962_v37, 6  ;;  %v2418_v13 = vsel %vm1893_vm5, %v9438_v25, %v9447_v38  ;;  %v2420_v18 = vsel %vm1893_vm5, %v9436_v19, %v9444_v26 }
 0x1cd   : > { %v2421_v63 = vsel %vm1893_vm5, %v9435_v5, %v10087_v52  ;;  %v2422_v48 = vsel %vm1893_vm5, %v9434_v51, %v10088_v39  ;;  %v2423_v57 = vsel %vm1893_vm5, %v9433_v56, %v10089_v20  ;;  %v10091_v15 = vrot.slane %v9966_v61, 6 }
 0x1ce   : > { %v2424_v33 = vsel %vm1893_vm5, %v9431_v62, %v10090_v29  ;;  %v9439_v55 = vrot.slane %v6715_v7, 2  ;;  %v9442_v58 = vrot.slane %v6721_v30, 2  ;;  %v9445_v21 = vrot.slane %v6072_v22, 2 }
 0x1cf   : > { %v2425_v60 = vsel %vm1893_vm5, %v9432_v36, %v10091_v15  ;;  %v9441_v52 = vrot.slane %v6717_v24, 2  ;;  %v9443_v39 = vrot.slane %v6723_v43, 2  ;;  %v9446_v20 = vrot.slane %v6097_v4, 2 }
 0x1d0   : > { %v10092_v29 = vrot.slane %v6142_v31, 2  ;;  %v10093_v62 = vrot.slane %v6062_v34, 2  ;;  %v10094_v35 = vrot.slane %v5625_v27, 2  ;;  %v10095_v36 = vrot.slane %v5385_v11, 2  ;;  %v10121_v27 = vld [vmem:[#allocation74_spill] sm:$0xff] }
 0x1d1   : > { %v2557_v51 = vsel %vm2054_vm6, %v9439_v55, %v9441_v52  ;;  %v10096_v5 = vrot.slane %v9952_v44, 2  ;;  %v10097_v19 = vrot.slane %v9954_v14, 2  ;;  %v10099_v46 = vrot.slane %v9958_v0, 2 }
 0x1d2   : > { %v2559_v15 = vsel %vm2054_vm6, %v10093_v62, %v10092_v29  ;;  %v2561_v56 = vsel %vm2054_vm6, %v10095_v36, %v10094_v35  ;;  %v10098_v29 = vrot.slane %v9956_v47, 2  ;;  %v10100_v35 = vrot.slane %v9960_v2, 2  ;;  %v4233_v47 = vld [vmem:[#allocation2 + $0x1a0] sm:$0xff] }
 0x1d3   : > { %v2562_v62 = vsel %vm2054_vm6, %v10097_v19, %v10096_v5  ;;  %v10101_v25 = vrot.slane %v9962_v37, 2  ;;  %v2558_v19 = vsel %vm2054_vm6, %v9442_v58, %v9443_v39  ;;  %v10102_v5 = vrot.slane %v9964_v23, 2 }
 0x1d4   : > { %v2563_v36 = vsel %vm2054_vm6, %v10099_v46, %v10098_v29  ;;  %v2560_v46 = vsel %vm2054_vm6, %v9445_v21, %v9446_v20  ;;  %v10103_v29 = vrot.slane %v9966_v61, 2  ;;  %v6874_v42 = vmax.f32 %v2418_v13, %v2558_v19 }
 0x1d5   : > { %v2564_v55 = vsel %vm2054_vm6, %v10101_v25, %v10100_v35  ;;  %v6872_v35 = vmax.f32 %v2417_v53, %v2557_v51  ;;  %v6876_v52 = vmax.f32 %v2419_v40, %v2559_v15  ;;  %v6878_v58 = vmax.f32 %v2420_v18, %v2560_v46  ;;  %v10113_v18 = vld [vmem:[#allocation13_spill] sm:$0xff]  ;;  %v10115_v15 = vld [vmem:[#allocation16_spill] sm:$0xff] }
 0x1d6   : > { %v2565_v25 = vsel %vm2054_vm6, %v10103_v29, %v10102_v5  ;;  %10105 = vst [vmem:[#allocation7_spill] sm:$0xff] %v6874_v42  ;;  %v6880_v39 = vmax.f32 %v2421_v63, %v2561_v56  ;;  %v6882_v26 = vmax.f32 %v2422_v48, %v2562_v62  ;;  %v6884_v21 = vmax.f32 %v2423_v57, %v2563_v36  ;;  %v10116_v62 = vld [vmem:[#allocation30_spill] sm:$0xff]  ;;  %v10117_v29 = vld [vmem:[#allocation77_spill] sm:$0xff]  ;;  %v10119_v5 = vld [vmem:[#allocation79_spill] sm:$0xff] }
 0x1d7   : > { %10104 = vst [vmem:[#allocation54_spill] sm:$0xff] %v6872_v35  ;;  %10106 = vst [vmem:[#allocation55_spill] sm:$0xff] %v6876_v52  ;;  %v6886_v20 = vmax.f32 %v2424_v33, %v2564_v55  ;;  %v6888_v38 = vmax.f32 %v2425_v60, %v2565_v25  ;;  %v2991_v40 = vmax.f32 %v6872_v35, %v6874_v42  ;;  %v10114_v60 = vld [vmem:[#allocation21_spill] sm:$0xff]  ;;  %v10118_v25 = vld [vmem:[#allocation35_spill] sm:$0xff] }
 0x1d8   : > { %10107 = vst [vmem:[#allocation8_spill] sm:$0xff] %v6878_v58  ;;  %10108 = vst [vmem:[#allocation56_spill] sm:$0xff] %v6880_v39  ;;  %v2993_v53 = vmax.f32 %v6874_v42, %v6876_v52  ;;  %v6898_v56 = vmax.f32 %v6876_v52, %v6878_v58  ;;  %v6902_v63 = vmax.f32 %v6878_v58, %v6880_v39 }
 0x1d9   : > { %10109 = vst [vmem:[#allocation86_spill] sm:$0xff] %v6882_v26  ;;  %10110 = vst [vmem:[#allocation48_spill] sm:$0xff] %v6884_v21  ;;  %v6906_v48 = vmax.f32 %v6880_v39, %v6882_v26  ;;  %v6910_v57 = vmax.f32 %v6882_v26, %v6884_v21  ;;  %v6914_v33 = vmax.f32 %v6884_v21, %v6886_v20  ;;  %v10124_v21 = vld [vmem:[#allocation31_spill] sm:$0xff]  ;;  %v10125_v39 = vld [vmem:[#allocation78_spill] sm:$0xff] }
 0x1da   : > { %10111 = vst [vmem:[#allocation85_spill] sm:$0xff] %v6886_v20  ;;  %10112 = vst [vmem:[#allocation9_spill] sm:$0xff] %v6888_v38  ;;  %v6918_v13 = vmax.f32 %v6886_v20, %v6888_v38  ;;  %v1697_v55 = vmax.f32 %v10114_v60, %v10113_v18  ;;  %v1701_v36 = vmax.f32 %v10116_v62, %v10115_v15  ;;  %v4231_v60 = vld [vmem:[#allocation2 + $0x160] sm:$0xff] }
 0x1db   : > { %v3021_v19 = vmax.f32 %v2991_v40, %v6898_v56  ;;  %v6926_v46 = vmax.f32 %v2993_v53, %v6902_v63  ;;  %v1705_v51 = vmax.f32 %v10118_v25, %v10117_v29  ;;  %v1709_v23 = vmax.f32 %v10120_v8, %v10119_v5  ;;  %v4232_v40 = vld [vmem:[#allocation2 + $0x180] sm:$0xff] }
 0x1dc   : > { %v6934_v2 = vmax.f32 %v6906_v48, %v6914_v33  ;;  %v6938_v18 = vmax.f32 %v6910_v57, %v6918_v13  ;;  %v1777_v15 = vmax.f32 %v4231_v60, %v1697_v55  ;;  %v1781_v62 = vmax.f32 %v4232_v40, %v1701_v36  ;;  %v4234_v29 = vld [vmem:[#allocation2 + $0x1c0] sm:$0xff]  ;;  %v10127_v36 = vld [vmem:[#allocation27_spill] sm:$0xff] }
 0x1dd   : > { %v3047_v53 = vmax.f32 %v3021_v19, %v6926_v46  ;;  %v1785_v44 = vmax.f32 %v4233_v47, %v1705_v51  ;;  %v1789_v25 = vmax.f32 %v4234_v29, %v1709_v23  ;;  %v10122_v8 = vld [vmem:[#allocation24_spill] sm:$0xff]  ;;  %v10128_v40 = vld [vmem:[#allocation43_spill] sm:$0xff]  ;;  %v9467_v47 = vrot.slane %v9944_v16, 2 }
 0x1de   : > { %v2179_v5 = vmax.f32 %v10122_v8, %v10121_v27  ;;  %v6945_v35 = vmax.f32 %v6934_v2, %v6938_v18  ;;  %v10123_v20 = vld [vmem:[#allocation76_spill] sm:$0xff]  ;;  %v2191_v19 = vmax.f32 %v10128_v40, %v10127_v36  ;;  %v9466_v23 = vrot.slane %v9945_v50, 2 }
 0x1df   : > { %v2183_v26 = vmax.f32 %v10124_v21, %v10123_v20  ;;  %v10126_v55 = vld [vmem:[#allocation36_spill] sm:$0xff]  ;;  %v9468_v27 = vrot.slane %v9946_v32, 2  ;;  %v9471_v20 = vrot.slane %v9947_v54, 2  ;;  %v10137_v40 = vrot.slane %v9944_v16, 6  ;;  %v10181_v16 = vld [vmem:[#allocation91_spill] sm:$0xff] }
 0x1e0   : > { %v2187_v60 = vmax.f32 %v10126_v55, %v10125_v39  ;;  %v6953_v58 = vmax.f32 %v1777_v15, %v2179_v5  ;;  %v3071_v51 = vmax.f32 %v3047_v53, %v6945_v35  ;;  %v6963_v21 = vmax.f32 %v1789_v25, %v2191_v19  ;;  %v10135_v25 = vld [vmem:[#allocation80_spill] sm:$0xff]  ;;  %v10142_v53 = vld [vmem:[#allocation118_spill] sm:$0xff] }
 0x1e1   : > { %v6959_v29 = vmax.f32 %v1781_v62, %v2183_v26  ;;  %v10133_v15 = vrot.slane %v9948_v17, 2  ;;  %v10134_v55 = vrot.slane %v9949_v28, 2  ;;  %v10143_v62 = vrot.slane %v10142_v53, 7 }
 0x1e2   : > { %10129 = vst [vmem:[#allocation57_spill] sm:$0xff] %v6953_v58  ;;  %v6961_v8 = vmax.f32 %v1785_v44, %v2187_v60  ;;  %10132 = vst [vmem:[#allocation11_spill] sm:$0xff] %v6963_v21  ;;  %v9470_v39 = vrot.slane %v6953_v58, 6  ;;  %3344 = vrot.lane.b32.xlu1 %v3071_v51, %s4279_s11  ;;  %v10136_v60 = vrot.slane %v10135_v25, 2  ;;  %v10138_v51 = vld [vmem:[#allocation39_spill] sm:$0xff]  ;;  %v10146_v25 = vld [vmem:[#allocation120_spill] sm:$0xff] }
 0x1e3   : > { %10130 = vst [vmem:[#allocation10_spill] sm:$0xff] %v6959_v29  ;;  %v2566_v5 = vsel %vm2054_vm6, %v9467_v47, %v10133_v15  ;;  %v2567_v44 = vsel %vm2054_vm6, %v9466_v23, %v10134_v55  ;;  %v10139_v15 = vrot.slane %v10138_v51, 2  ;;  %v10140_v23 = vld [vmem:[#allocation119_spill] sm:$0xff]  ;;  %v10147_v28 = vrot.slane %v10146_v25, 7 }
 0x1e4   : > { %10131 = vst [vmem:[#allocation58_spill] sm:$0xff] %v6961_v8  ;;  %v2568_v36 = vsel %vm2054_vm6, %v9468_v27, %v10136_v60  ;;  %v2426_v19 = vsel %vm1893_vm5, %v9470_v39, %v10137_v40  ;;  %v10141_v47 = vrot.slane %v10140_v23, 7  ;;  %v10144_v27 = vld [vmem:[#allocation123_spill] sm:$0xff]  ;;  %v10148_v39 = vrot.slane %v9945_v50, 6 }
 0x1e5   : > { %v2569_v55 = vsel %vm2054_vm6, %v9471_v20, %v10139_v15  ;;  %v10145_v26 = vrot.slane %v10144_v27, 7  ;;  %v10149_v51 = vrot.slane %v6959_v29, 6  ;;  %v10150_v20 = vrot.slane %v9946_v32, 6 }
 0x1e6   : > { %v1414_v60 = vsel %vm1411_vm3, %v10143_v62, %v10141_v47  ;;  %v10151_v17 = vrot.slane %v6961_v8, 6  ;;  %v10152_v62 = vrot.slane %v9947_v54, 6  ;;  %v10153_v52 = vrot.slane %v6963_v21, 6  ;;  %v10161_v54 = vld [vmem:[#allocation122_spill] sm:$0xff]  ;;  %v4235_v21 = vld [vmem:[#allocation2 + $0x98] sm:$0xff] }
 0x1e7   : > { %v1415_v40 = vsel %vm1411_vm3, %v10147_v28, %v10145_v26  ;;  %v2427_v15 = vsel %vm1893_vm5, %v10149_v51, %v10148_v39  ;;  %v7031_v26 = vmax.f32 %v2426_v19, %v2566_v5  ;;  %v10158_v51 = vld [vmem:[#allocation121_spill] sm:$0xff]  ;;  %v10160_v8 = vrot.slane %v10140_v23, 1 }
 0x1e8   : > { %v2428_v47 = vsel %vm1893_vm5, %v10151_v17, %v10150_v20  ;;  %v2429_v28 = vsel %vm1893_vm5, %v10153_v52, %v10152_v62  ;;  %v7033_v42 = vmax.f32 %v2427_v15, %v2567_v44  ;;  %v10159_v32 = vrot.slane %v10158_v51, 1  ;;  %v10164_v19 = vld [vmem:[#allocation49_spill] sm:$0xff] }
 0x1e9   : > { %10154 = vst [vmem:[#allocation59_spill] sm:$0xff] %v7031_v26  ;;  %v7035_v50 = vmax.f32 %v2428_v47, %v2568_v36  ;;  %v7037_v39 = vmax.f32 %v2429_v28, %v2569_v55  ;;  %v3007_v20 = vmax.f32 %v6888_v38, %v7031_v26  ;;  %v10162_v52 = vrot.slane %v10161_v54, 1  ;;  %v10165_v55 = vld [vmem:[#allocation47_spill] sm:$0xff] }
 0x1ea   : > { %10155 = vst [vmem:[#allocation12_spill] sm:$0xff] %v7033_v42  ;;  %v1635_v17 = vsel %vm1572_vm4, %v10160_v8, %v10159_v32  ;;  %v10163_v5 = vrot.slane %v10144_v27, 1  ;;  %v1676_v15 = vmax.f32 %v10165_v55, %v10164_v19  ;;  %v3009_v47 = vmax.f32 %v7031_v26, %v7033_v42  ;;  %v4236_v19 = vld [vmem:[#allocation2 + $0xb8] sm:$0xff] }
 0x1eb   : > { %10156 = vst [vmem:[#allocation60_spill] sm:$0xff] %v7035_v50  ;;  %10157 = vst [vmem:[#allocation15_spill] sm:$0xff] %v7037_v39  ;;  %v1664_v36 = vmax.f32 %v1414_v60, %v1635_v17  ;;  %v7059_v32 = vmax.f32 %v7033_v42, %v7035_v50  ;;  %v7063_v8 = vmax.f32 %v7035_v50, %v7037_v39  ;;  %v10168_v60 = vld [vmem:[#allocation51_spill] sm:$0xff]  ;;  %v10170_v26 = vrot.slane %v10140_v23, 6 }
 0x1ec   : > { %v1636_v44 = vsel %vm1572_vm4, %v10163_v5, %v10162_v52  ;;  %v10167_v52 = vld [vmem:[#allocation34_spill] sm:$0xff]  ;;  %v1756_v55 = vmax.f32 %v4236_v19, %v1676_v15  ;;  %v10171_v38 = vrot.slane %v10142_v53, 6  ;;  %v10175_v53 = vrot.slane %v10140_v23, 2  ;;  %v10179_v19 = vld [vmem:[#allocation40_spill] sm:$0xff] }
 0x1ed   : > { %10166 = vst [vmem:[#allocation61_spill] sm:$0xff] %v7063_v8  ;;  %v1668_v62 = vmax.f32 %v1415_v40, %v1636_v44  ;;  %v1744_v28 = vmax.f32 %v10140_v23, %v1664_v36  ;;  %v10169_v17 = vmax.f32 %v10167_v52, %v10168_v60  ;;  %v3037_v50 = vmax.f32 %v3007_v20, %v7059_v32 }
 0x1ee   : > { %v1896_v42 = vsel %vm1893_vm5, %v10171_v38, %v10170_v26  ;;  %v7077_v40 = vmax.f32 %v3009_v47, %v7063_v8  ;;  %v10172_v36 = vrot.slane %v10144_v27, 6  ;;  %v10174_v52 = vrot.slane %v10158_v51, 2  ;;  %v10180_v8 = vld [vmem:[#allocation88_spill] sm:$0xff] }
 0x1ef   : > { %v1752_v5 = vmax.f32 %v4235_v21, %v10169_v17  ;;  %v1748_v44 = vmax.f32 %v10144_v27, %v1668_v62  ;;  %v10173_v21 = vrot.slane %v10146_v25, 6  ;;  %v10176_v26 = vrot.slane %v10161_v54, 2  ;;  %v10178_v17 = vld [vmem:[#allocation50_spill] sm:$0xff] }
 0x1f0   : > { %v2117_v38 = vsel %vm2054_vm6, %v10175_v53, %v10174_v52  ;;  %v10177_v60 = vrot.slane %v10144_v27, 2  ;;  %v2158_v25 = vmax.f32 %v10179_v19, %v10178_v17  ;;  %v3063_v23 = vmax.f32 %v3037_v50, %v7077_v40 }
 0x1f1   : > { %v1897_v15 = vsel %vm1893_vm5, %v10173_v21, %v10172_v36  ;;  %v10182_v36 = vmax.f32 %v10180_v8, %v10181_v16  ;;  %v2146_v51 = vmax.f32 %v1896_v42, %v2117_v38  ;;  %v9501_v52 = vrot.slane %v6717_v24, 6 }
 0x1f2   : > { %v2118_v62 = vsel %vm2054_vm6, %v10177_v60, %v10176_v26  ;;  %v7107_v54 = vmax.f32 %v1756_v55, %v2158_v25  ;;  %v9500_v27 = vrot.slane %v6723_v43, 6  ;;  %v9498_v53 = vrot.slane %v6097_v4, 6 }
 0x1f3   : > { %v7103_v21 = vmax.f32 %v1752_v5, %v10182_v36  ;;  %v2150_v61 = vmax.f32 %v1897_v15, %v2118_v62  ;;  %v10183_v26 = vrot.slane %v6142_v31, 6  ;;  %v10184_v60 = vrot.slane %v6062_v34, 6 }
 0x1f4   : > { %v3079_v8 = vmax.f32 %v6945_v35, %v3063_v23  ;;  %v7118_v5 = vmax.f32 %v1744_v28, %v2146_v51  ;;  %v10185_v55 = vrot.slane %v6715_v7, 6  ;;  %v10186_v38 = vrot.slane %v6721_v30, 6 }
 0x1f5   : > { %v2399_v16 = vsel %vm1893_vm5, %v10184_v60, %v10183_v26  ;;  %v7120_v42 = vmax.f32 %v1748_v44, %v2150_v61  ;;  %v10187_v35 = vrot.slane %v6072_v22, 6  ;;  %v9495_v28 = vrot.slane %v7103_v21, 2 }
 0x1f6   : > { %v2397_v15 = vsel %vm1893_vm5, %v10185_v55, %v9501_v52  ;;  %v2398_v62 = vsel %vm1893_vm5, %v10186_v38, %v9500_v27  ;;  %v9496_v44 = vrot.slane %v7107_v54, 2  ;;  %3360 = vrot.lane.b32.xlu0 %v3079_v8, %s4279_s11  ;;  %v9497_v19 = vrot.slane %v7118_v5, 2  ;;  %v10190_v55 = vld [vmem:[#allocation105_spill] sm:$0xff]  ;;  %v10191_v38 = vld [vmem:[#allocation103_spill] sm:$0xff]  ;;  %v10203_v52 = vld [vmem:[#allocation104_spill] sm:$0xff] }
 0x1f7   : > { %v2400_v61 = vsel %vm1893_vm5, %v10187_v35, %v9498_v53  ;;  %v9499_v25 = vrot.slane %v7120_v42, 2  ;;  %v3025_v36 = vmax.f32 %v6898_v56, %v6906_v48  ;;  %v10188_v23 = vrot.slane %v6142_v31, 2 }
 0x1f8   : > { %v10189_v26 = vrot.slane %v6097_v4, 2  ;;  %v3033_v8 = vmax.f32 %v6914_v33, %v3007_v20  ;;  %v3034_v35 = vmax.f32 %v10191_v38, %v10190_v55  ;;  %v10192_v56 = vrot.slane %v6717_v24, 2 }
 0x1f9   : > { %v2539_v51 = vsel %vm2054_vm6, %v10188_v23, %v9495_v28  ;;  %v10193_v23 = vrot.slane %v6723_v43, 2  ;;  %v3049_v38 = vmax.f32 %v6926_v46, %v3025_v36 }
 0x1fa   : > { %v2540_v60 = vsel %vm2054_vm6, %v10189_v26, %v9496_v44  ;;  %v2537_v48 = vsel %vm2054_vm6, %v10192_v56, %v9497_v19  ;;  %v7175_v26 = vmax.f32 %v2399_v16, %v2539_v51  ;;  %v7185_v44 = vmax.f32 %v6938_v18, %v3033_v8  ;;  %v10198_v19 = vld [vmem:[#allocation81_spill] sm:$0xff] }
 0x1fb   : > { %v2538_v28 = vsel %vm2054_vm6, %v10193_v23, %v9499_v25  ;;  %v7177_v33 = vmax.f32 %v2400_v61, %v2540_v60  ;;  %v7179_v20 = vmax.f32 %v2397_v15, %v2537_v48  ;;  %v10199_v23 = vld [vmem:[#allocation110_spill] sm:$0xff]  ;;  %v3027_v15 = vmax.f32 %v6902_v63, %v6910_v57  ;;  %v10200_v51 = vld [vmem:[#allocation101_spill] sm:$0xff] }
 0x1fc   : > { %10194 = vst [vmem:[#allocation13_spill] sm:$0xff] %v7175_v26  ;;  %v7181_v55 = vmax.f32 %v2398_v62, %v2538_v28  ;;  %v7192_v16 = vmax.f32 %v10199_v23, %v3034_v35  ;;  %v3073_v28 = vmax.f32 %v3049_v38, %v7185_v44  ;;  %v3035_v48 = vmax.f32 %v6918_v13, %v3009_v47  ;;  %v10201_v63 = vld [vmem:[#allocation102_spill] sm:$0xff]  ;;  %v10209_v13 = vld [vmem:[#allocation89_spill] sm:$0xff] }
 0x1fd   : > { %10195 = vst [vmem:[#allocation21_spill] sm:$0xff] %v7177_v33  ;;  %10196 = vst [vmem:[#allocation16_spill] sm:$0xff] %v7179_v20  ;;  %v2996_v56 = vmax.f32 %v7175_v26, %v7177_v33  ;;  %v2998_v53 = vmax.f32 %v7177_v33, %v10198_v19  ;;  %v3051_v23 = vmax.f32 %v3025_v36, %v3027_v15  ;;  %v10202_v62 = vld [vmem:[#allocation106_spill] sm:$0xff] }
 0x1fe   : > { %10197 = vst [vmem:[#allocation30_spill] sm:$0xff] %v7181_v55  ;;  %v2992_v46 = vmax.f32 %v7179_v20, %v7181_v55  ;;  %v2994_v18 = vmax.f32 %v7181_v55, %v7175_v26  ;;  %v3036_v61 = vmax.f32 %v10203_v52, %v10202_v62  ;;  %3348 = vrot.lane.b32.xlu0 %v3073_v28, %s4279_s11  ;;  %v10206_v38 = vld [vmem:[#allocation114_spill] sm:$0xff]  ;;  %v10212_v28 = vld [vmem:[#allocation111_spill] sm:$0xff] }
 0x1ff   : > { %v3026_v60 = vmax.f32 %v2996_v56, %v10200_v51  ;;  %v3028_v57 = vmax.f32 %v2998_v53, %v10201_v63  ;;  %v7209_v17 = vmax.f32 %v3033_v8, %v3035_v48  ;;  %v3053_v4 = vmax.f32 %v3027_v15, %v6934_v2  ;;  %v10207_v51 = vld [vmem:[#allocation115_spill] sm:$0xff]  ;;  %v10211_v8 = vld [vmem:[#allocation109_spill] sm:$0xff] }
 0x200   : > { %v3022_v25 = vmax.f32 %v2992_v46, %v2996_v56  ;;  %v3024_v27 = vmax.f32 %v2994_v18, %v2998_v53  ;;  %v7212_v31 = vmax.f32 %v3035_v48, %v3037_v50  ;;  %v10208_v43 = vmax.f32 %v10206_v38, %v10207_v51  ;;  %v7226_v50 = vld [vmem:[#allocation2] sm:$0xff]  ;;  %v7228_v15 = vld [vmem:[#allocation2 + $0x8] sm:$0xff] }
 0x201   : > { %10204 = vst [vmem:[#allocation77_spill] sm:$0xff] %v7209_v17  ;;  %v3052_v46 = vmax.f32 %v3026_v60, %v3028_v57  ;;  %v7218_v53 = vmax.f32 %v3034_v35, %v3036_v61  ;;  %v3075_v52 = vmax.f32 %v3051_v23, %v7209_v17  ;;  %v3054_v18 = vmax.f32 %v3028_v57, %v10211_v8  ;;  %v10214_v48 = vld [vmem:[#allocation113_spill] sm:$0xff]  ;;  %v10215_v35 = vld [vmem:[#allocation116_spill] sm:$0xff] }
 0x202   : > { %10205 = vst [vmem:[#allocation35_spill] sm:$0xff] %v7212_v31  ;;  %v1793_v47 = vmax.f32 %v10209_v13, %v10208_v43  ;;  %v3048_v36 = vmax.f32 %v3022_v25, %v3024_v27  ;;  %v3050_v56 = vmax.f32 %v3024_v27, %v3026_v60  ;;  %v3077_v62 = vmax.f32 %v3053_v4, %v7212_v31  ;;  %v10216_v60 = vld [vmem:[#allocation117_spill] sm:$0xff]  ;;  %v7238_v4 = vld [vmem:[#allocation2 + $0x10] sm:$0xff]  ;;  %v7266_v31 = vld [vmem:[#allocation2 + $0x38] sm:$0xff] }
 0x203   : > { %10210 = vst [vmem:[#allocation79_spill] sm:$0xff] %v7218_v53  ;;  %v7224_v2 = vmax.f32 %v3036_v61, %v10212_v28  ;;  %v3076_v25 = vmax.f32 %v3052_v46, %v7218_v53  ;;  %v10217_v23 = vmax.f32 %v10215_v35, %v10216_v60  ;;  %v7240_v57 = vld [vmem:[#allocation2 + $0x28] sm:$0xff]  ;;  %v7242_v61 = vld [vmem:[#allocation2 + $0x30] sm:$0xff]  ;;  %3352 = vrot.lane.b32.xlu0 %v3075_v52, %s4279_s11  ;;  %v1369_v17 = vrot.slane %v7238_v4, 7 }
 0x204   : > { %v3072_v43 = vmax.f32 %v3048_v36, %v10214_v48  ;;  %v3074_v27 = vmax.f32 %v3050_v56, %v7192_v16  ;;  %v10219_v51 = vld [vmem:[#allocation25_spill] sm:$0xff]  ;;  %v10221_v36 = vld [vmem:[#allocation124_spill] sm:$0xff]  ;;  %v10226_v48 = vld [vmem:[#allocation90_spill] sm:$0xff]  ;;  %v1370_v24 = vrot.slane %v7242_v61, 7  ;;  %v1390_v33 = vrot.slane %v7266_v31, 7 }
 0x205   : > { %10213 = vst [vmem:[#allocation41_spill] sm:$0xff] %v7224_v2  ;;  %v7236_v63 = vmax.f32 %v1793_v47, %v10217_v23  ;;  %v3078_v38 = vmax.f32 %v3054_v18, %v7224_v2  ;;  %v10220_v13 = vrot.slane %v10219_v51, 2  ;;  %v10222_v56 = vrot.slane %v10221_v36, 2  ;;  %v10223_v8 = vld [vmem:[#allocation93_spill] sm:$0xff]  ;;  %v10224_v47 = vld [vmem:[#allocation94_spill] sm:$0xff]  ;;  %v7262_v18 = vld [vmem:[#allocation2 + $0x18] sm:$0xff] }
 0x206   : > { %v10225_v28 = vmax.f32 %v10223_v8, %v10224_v47  ;;  %v10227_v60 = vrot.slane %v10219_v51, 6  ;;  %v10228_v23 = vrot.slane %v10221_v36, 6  ;;  %v7264_v2 = vld [vmem:[#allocation2 + $0x20] sm:$0xff]  ;;  %3346 = vrot.lane.b32.xlu1 %v3072_v43, %s4279_s11  ;;  %v1349_v47 = vrot.slane %v7228_v15, 7 }
 0x207   : > { %10218 = vst [vmem:[#allocation74_spill] sm:$0xff] %v7236_v63  ;;  %v2570_v46 = vsel %vm2054_vm6, %v10222_v56, %v10220_v13  ;;  %v9515_v13 = vrot.slane %v7236_v63, 6  ;;  %v1329_v56 = vrot.slane %v7226_v50, 7  ;;  %v1330_v8 = vrot.slane %v7264_v2, 7  ;;  %3356 = vrot.lane.b32.xlu0 %v3077_v62, %s4279_s11 }
 0x208   : > { %v1796_v35 = vmax.f32 %v10226_v48, %v10225_v28  ;;  %v2410_v52 = vsel %vm1893_vm5, %v10228_v23, %v10227_v60  ;;  %v10229_v28 = vld [vmem:[#allocation95_spill] sm:$0xff]  ;;  %v10230_v48 = vld [vmem:[#allocation96_spill] sm:$0xff]  ;;  %v1350_v23 = vrot.slane %v7240_v57, 7  ;;  %v10233_v43 = vrot.slane %v10221_v36, 6 }
 0x209   : > { %v10231_v53 = vmax.f32 %v10229_v28, %v10230_v48  ;;  %v1389_v19 = vrot.slane %v7262_v18, 7  ;;  %v1432_v48 = vsel %vm1411_vm3, %v1349_v47, %v1369_v17 }
 0x20a   : > { %v2430_v20 = vsel %vm1893_vm5, %v9515_v13, %v10233_v43  ;;  %v1433_v36 = vsel %vm1411_vm3, %v1350_v23, %v1370_v24  ;;  %3350 = vrot.lane.b32.xlu1 %v3074_v27, %s4279_s11  ;;  %v1413_v13 = vsel %vm1411_vm3, %v1370_v24, %v1390_v33  ;;  %v10236_v27 = vrot.slane %v10219_v51, 2 }
 0x20b   : > { %v7276_v60 = vmax.f32 %v1796_v35, %v10231_v53  ;;  %v1452_v53 = vsel %vm1411_vm3, %v1329_v56, %v1349_v47  ;;  %v7292_v35 = vmax.f32 %v2430_v20, %v2570_v46  ;;  %v1412_v43 = vsel %vm1411_vm3, %v1369_v17, %v1389_v19 }
 0x20c   : > { %v1453_v20 = vsel %vm1411_vm3, %v1330_v8, %v1350_v23  ;;  %v1472_v62 = vsel %vm1411_vm3, %v1389_v19, %v1329_v56  ;;  %v1473_v24 = vsel %vm1411_vm3, %v1390_v33, %v1330_v8  ;;  %v1492_v47 = vrot.slane %v7226_v50, 1 }
 0x20d   : > { %10232 = vst [vmem:[#allocation24_spill] sm:$0xff] %v7276_v60  ;;  %10234 = vst [vmem:[#allocation76_spill] sm:$0xff] %v7292_v35  ;;  %v9521_v28 = vrot.slane %v7276_v60, 2  ;;  %v7310_v46 = vmax.f32 %v7037_v39, %v7292_v35  ;;  %v1493_v19 = vrot.slane %v7264_v2, 1  ;;  %v1512_v56 = vrot.slane %v7228_v15, 1 }
 0x20e   : > { %v1513_v35 = vrot.slane %v7240_v57, 1  ;;  %v1532_v51 = vrot.slane %v7238_v4, 1  ;;  %v1552_v33 = vrot.slane %v7262_v18, 1  ;;  %3354 = vrot.lane.b32.xlu1 %v3076_v25, %s4279_s11 }
 0x20f   : > { %10235 = vst [vmem:[#allocation31_spill] sm:$0xff] %v7310_v46  ;;  %v2550_v17 = vsel %vm2054_vm6, %v10236_v27, %v9521_v28  ;;  %v7328_v63 = vmax.f32 %v7059_v32, %v7310_v46  ;;  %v1533_v27 = vrot.slane %v7242_v61, 1  ;;  %v1613_v28 = vsel %vm1572_vm4, %v1492_v47, %v1512_v56 }
 0x210   : > { %v7321_v23 = vmax.f32 %v2410_v52, %v2550_v17  ;;  %v10239_v52 = vld [vmem:[#allocation100_spill] sm:$0xff]  ;;  %v1553_v17 = vrot.slane %v7266_v31, 1  ;;  %v1614_v32 = vsel %vm1572_vm4, %v1493_v19, %v1513_v35  ;;  %v1573_v60 = vsel %vm1572_vm4, %v1532_v51, %v1552_v33 }
 0x211   : > { %10238 = vst [vmem:[#allocation36_spill] sm:$0xff] %v7328_v63  ;;  %v3065_v46 = vmax.f32 %v7077_v40, %v7328_v63  ;;  %v1593_v25 = vsel %vm1572_vm4, %v1512_v56, %v1532_v51  ;;  %v1633_v55 = vsel %vm1572_vm4, %v1552_v33, %v1492_v47  ;;  %v1653_v37 = vmax.f32 %v1472_v62, %v1613_v28 }
 0x212   : > { %10237 = vst [vmem:[#allocation78_spill] sm:$0xff] %v7321_v23  ;;  %v7336_v8 = vmax.f32 %v10239_v52, %v7321_v23  ;;  %v1594_v23 = vsel %vm1572_vm4, %v1513_v35, %v1533_v27  ;;  %v10241_v52 = vld [vmem:[#allocation107_spill] sm:$0xff]  ;;  %v1574_v26 = vsel %vm1572_vm4, %v1533_v27, %v1553_v17  ;;  %v1634_v40 = vsel %vm1572_vm4, %v1553_v17, %v1493_v19  ;;  %v10243_v35 = vld [vmem:[#allocation112_spill] sm:$0xff] }
 0x213   : > { %v3081_v63 = vmax.f32 %v7185_v44, %v3065_v46  ;;  %v1654_v51 = vmax.f32 %v1452_v53, %v1593_v25  ;;  %v1655_v56 = vmax.f32 %v1432_v48, %v1573_v60  ;;  %3358 = vrot.lane.b32.xlu1 %v3078_v38, %s4279_s11  ;;  %v1657_v0 = vmax.f32 %v1473_v24, %v1614_v32 }
 0x214   : > { %10240 = vst [vmem:[#allocation27_spill] sm:$0xff] %v7336_v8  ;;  %v7353_v39 = vmax.f32 %v10241_v52, %v7336_v8  ;;  %v1656_v8 = vmax.f32 %v1412_v43, %v1633_v55  ;;  %v1658_v14 = vmax.f32 %v1453_v20, %v1594_v23  ;;  %v1659_v27 = vmax.f32 %v1433_v36, %v1574_v26 }
 0x215   : > { %3364 = vrot.lane.b32.xlu0 %v3081_v63, %s4279_s11  ;;  %v1660_v47 = vmax.f32 %v1413_v13, %v1634_v40  ;;  %v1733_v33 = vmax.f32 %v7226_v50, %v1653_v37  ;;  %v1734_v19 = vmax.f32 %v7228_v15, %v1654_v51  ;;  %v1735_v60 = vmax.f32 %v7238_v4, %v1655_v56 }
 0x216   : > { %10242 = vst [vmem:[#allocation43_spill] sm:$0xff] %v7353_v39  ;;  %v3066_v52 = vmax.f32 %v10243_v35, %v7353_v39  ;;  %v1736_v38 = vmax.f32 %v7262_v18, %v1656_v8  ;;  %v1737_v53 = vmax.f32 %v7264_v2, %v1657_v0  ;;  %v1738_v55 = vmax.f32 %v7240_v57, %v1658_v14 }
 0x217   : > { %v1739_v28 = vmax.f32 %v7242_v61, %v1659_v27  ;;  %v1740_v63 = vmax.f32 %v7266_v31, %v1660_v47  ;;  %v1813_v26 = vrot.slane %v7226_v50, 6  ;;  %v1814_v37 = vrot.slane %v7264_v2, 6 }
 0x218   : > { %v3082_v44 = vmax.f32 %v7192_v16, %v3066_v52  ;;  %v1833_v16 = vrot.slane %v7228_v15, 6  ;;  %v1834_v36 = vrot.slane %v7240_v57, 6  ;;  %v1853_v13 = vrot.slane %v7238_v4, 6 }
 0x219   : > { %v1854_v0 = vrot.slane %v7242_v61, 6  ;;  %v1873_v14 = vrot.slane %v7262_v18, 6  ;;  %v1874_v48 = vrot.slane %v7266_v31, 6  ;;  %v1974_v43 = vrot.slane %v7226_v50, 2 }
 0x21a   : > { %3366 = vrot.lane.b32.xlu1 %v3082_v44, %s4279_s11  ;;  %v1914_v20 = vsel %vm1893_vm5, %v1833_v16, %v1853_v13  ;;  %v1934_v62 = vsel %vm1893_vm5, %v1813_v26, %v1833_v16  ;;  %v1935_v46 = vsel %vm1893_vm5, %v1814_v37, %v1834_v36  ;;  %v1975_v24 = vrot.slane %v7264_v2, 2 }
 0x21b   : > { %v1894_v23 = vsel %vm1893_vm5, %v1853_v13, %v1873_v14  ;;  %v1895_v8 = vsel %vm1893_vm5, %v1854_v0, %v1874_v48  ;;  %v1915_v50 = vsel %vm1893_vm5, %v1834_v36, %v1854_v0  ;;  %v1954_v17 = vsel %vm1893_vm5, %v1873_v14, %v1813_v26 }
 0x21c   : > { %v1955_v32 = vsel %vm1893_vm5, %v1874_v48, %v1814_v37  ;;  %v1994_v25 = vrot.slane %v7228_v15, 2  ;;  %v1995_v40 = vrot.slane %v7240_v57, 2  ;;  %v2014_v2 = vrot.slane %v7238_v4, 2 }
 0x21d   : > { %v2015_v51 = vrot.slane %v7242_v61, 2  ;;  %v2034_v56 = vrot.slane %v7262_v18, 2  ;;  %v2035_v35 = vrot.slane %v7266_v31, 2  ;;  %v9539_v52 = vrot.slane %v7120_v42, 6 }
 0x21e   : > { %v2075_v27 = vsel %vm2054_vm6, %v1994_v25, %v2014_v2  ;;  %v2095_v47 = vsel %vm2054_vm6, %v1974_v43, %v1994_v25  ;;  %v2096_v15 = vsel %vm2054_vm6, %v1975_v24, %v1995_v40 }
 0x21f   : > { %v2055_v4 = vsel %vm2054_vm6, %v2014_v2, %v2034_v56  ;;  %v2056_v61 = vsel %vm2054_vm6, %v2015_v51, %v2035_v35  ;;  %v2076_v31 = vsel %vm2054_vm6, %v1995_v40, %v2015_v51  ;;  %v2115_v18 = vsel %vm2054_vm6, %v2034_v56, %v1974_v43  ;;  %v10249_v56 = vld [vmem:[#allocation28_spill] sm:$0xff] }
 0x220   : > { %v2116_v44 = vsel %vm2054_vm6, %v2035_v35, %v1975_v24  ;;  %v2135_v26 = vmax.f32 %v1954_v17, %v2095_v47  ;;  %v2136_v37 = vmax.f32 %v1934_v62, %v2075_v27  ;;  %v2137_v16 = vmax.f32 %v1914_v20, %v2055_v4  ;;  %v10248_v17 = vld [vmem:[#allocation42_spill] sm:$0xff]  ;;  %v10250_v27 = vld [vmem:[#allocation32_spill] sm:$0xff] }
 0x221   : > { %v2138_v36 = vmax.f32 %v1894_v23, %v2115_v18  ;;  %v2139_v13 = vmax.f32 %v1955_v32, %v2096_v15  ;;  %v2140_v0 = vmax.f32 %v1935_v46, %v2076_v31  ;;  %v2141_v14 = vmax.f32 %v1915_v50, %v2056_v61  ;;  %v10251_v15 = vld [vmem:[#allocation38_spill] sm:$0xff]  ;;  %v10252_v61 = vld [vmem:[#allocation44_spill] sm:$0xff] }
 0x222   : > { %v2142_v48 = vmax.f32 %v1895_v8, %v2116_v44  ;;  %v7426_v25 = vmax.f32 %v1733_v33, %v2135_v26  ;;  %v7428_v2 = vmax.f32 %v1734_v19, %v2136_v37  ;;  %v7430_v57 = vmax.f32 %v1735_v60, %v2137_v16  ;;  %v10247_v8 = vld [vmem:[#allocation37_spill] sm:$0xff] }
 0x223   : > { %v7432_v40 = vmax.f32 %v1736_v38, %v2138_v36  ;;  %v7434_v43 = vmax.f32 %v1737_v53, %v2139_v13  ;;  %v7436_v51 = vmax.f32 %v1738_v55, %v2140_v0  ;;  %v7438_v24 = vmax.f32 %v1739_v28, %v2141_v14 }
 0x224   : > { %10244 = vst [vmem:[#allocation119_spill] sm:$0xff] %v7426_v25  ;;  %v7440_v20 = vmax.f32 %v1740_v63, %v2142_v48  ;;  %v2295_v62 = vrot.slane %v7426_v25, 6  ;;  %v2315_v46 = vrot.slane %v7428_v2, 6  ;;  %v9547_v33 = vrot.slane %v7430_v57, 6  ;;  %v10246_v63 = vld [vmem:[#allocation29_spill] sm:$0xff] }
 0x225   : > { %10245 = vst [vmem:[#allocation118_spill] sm:$0xff] %v7434_v43  ;;  %v2296_v19 = vrot.slane %v7434_v43, 6  ;;  %v2316_v60 = vrot.slane %v7436_v51, 6  ;;  %v9538_v38 = vrot.slane %v7438_v24, 6  ;;  %v9549_v53 = vrot.slane %v7432_v40, 6 }
 0x226   : > { %v9546_v55 = vrot.slane %v7440_v20, 6  ;;  %v9540_v28 = vrot.slane %v7107_v54, 6  ;;  %v9541_v23 = vrot.slane %v10246_v63, 6  ;;  %v9542_v50 = vrot.slane %v10247_v8, 6 }
 0x227   : > { %v9543_v32 = vrot.slane %v10248_v17, 6  ;;  %v9544_v35 = vrot.slane %v10249_v56, 6  ;;  %v9545_v47 = vrot.slane %v10250_v27, 6  ;;  %v9548_v4 = vrot.slane %v10251_v15, 6 }
 0x228   : > { %v9551_v31 = vrot.slane %v10252_v61, 6  ;;  %v2395_v18 = vsel %vm1893_vm5, %v2315_v46, %v9547_v33  ;;  %v2396_v44 = vsel %vm1893_vm5, %v2316_v60, %v9538_v38  ;;  %v2415_v26 = vsel %vm1893_vm5, %v2295_v62, %v2315_v46 }
 0x229   : > { %v2416_v37 = vsel %vm1893_vm5, %v2296_v19, %v2316_v60  ;;  %v7474_v16 = vsel %vm1893_vm5, %v9549_v53, %v2295_v62  ;;  %v7480_v36 = vsel %vm1893_vm5, %v9546_v55, %v2296_v19  ;;  %v10253_v13 = vrot.slane %v6713_v9, 6 }
 0x22a   : > { %v10254_v0 = vrot.slane %v7118_v5, 6  ;;  %v10255_v48 = vrot.slane %v6719_v1, 6  ;;  %v10256_v46 = vrot.slane %v6692_v3, 6  ;;  %v10257_v19 = vrot.slane %v7103_v21, 6 }
 0x22b   : > { %v10258_v38 = vrot.slane %v6706_v41, 6  ;;  %v2476_v55 = vrot.slane %v7436_v51, 2  ;;  %v2495_v33 = vrot.slane %v7430_v57, 2  ;;  %v10267_v51 = vrot.slane %v6715_v7, 2 }
 0x22c   : > { %v7488_v14 = vsel %vm1893_vm5, %v10254_v0, %v10253_v13  ;;  %v7496_v62 = vsel %vm1893_vm5, %v9539_v52, %v10255_v48  ;;  %v7504_v60 = vsel %vm1893_vm5, %v10257_v19, %v10256_v46  ;;  %v10259_v0 = vrot.slane %v6711_v6, 6 }
 0x22d   : > { %v7512_v13 = vsel %vm1893_vm5, %v9540_v28, %v10258_v38  ;;  %v10260_v52 = vrot.slane %v6728_v12, 6  ;;  %v10261_v19 = vrot.slane %v6733_v10, 6  ;;  %v10262_v28 = vrot.slane %v6738_v59, 6 }
 0x22e   : > { %v7520_v48 = vsel %vm1893_vm5, %v9541_v23, %v10259_v0  ;;  %v10263_v23 = vrot.slane %v6743_v45, 6  ;;  %v10270_v53 = vrot.slane %v6719_v1, 2  ;;  %v10276_v1 = vrot.slane %v6706_v41, 2 }
 0x22f   : > { %v7528_v46 = vsel %vm1893_vm5, %v9542_v50, %v10260_v52  ;;  %v7536_v38 = vsel %vm1893_vm5, %v9543_v32, %v10261_v19  ;;  %v7544_v0 = vsel %vm1893_vm5, %v9544_v35, %v10262_v28  ;;  %v10264_v50 = vrot.slane %v6953_v58, 6 }
 0x230   : > { %v7552_v52 = vsel %vm1893_vm5, %v9545_v47, %v10263_v23  ;;  %v10265_v32 = vrot.slane %v6959_v29, 6  ;;  %v9553_v35 = vrot.slane %v7426_v25, 2  ;;  %v2475_v47 = vrot.slane %v7428_v2, 2 }
 0x231   : > { %v7560_v19 = vsel %vm1893_vm5, %v9548_v4, %v10264_v50  ;;  %v2496_v50 = vrot.slane %v7438_v24, 2  ;;  %v10268_v23 = vrot.slane %v6713_v9, 2  ;;  %v10269_v4 = vrot.slane %v6721_v30, 2 }
 0x232   : > { %v7568_v28 = vsel %vm1893_vm5, %v9551_v31, %v10265_v32  ;;  %v2575_v32 = vsel %vm2054_vm6, %v9553_v35, %v2475_v47  ;;  %v10266_v31 = vrot.slane %v7434_v43, 2  ;;  %v10271_v35 = vrot.slane %v7432_v40, 2 }
 0x233   : > { %v2577_v39 = vsel %vm2054_vm6, %v10268_v23, %v10267_v51  ;;  %v2578_v25 = vsel %vm2054_vm6, %v10270_v53, %v10269_v4  ;;  %v2555_v23 = vsel %vm2054_vm6, %v2475_v47, %v2495_v33  ;;  %v2556_v30 = vsel %vm2054_vm6, %v2476_v55, %v2496_v50 }
 0x234   : > { %v2576_v2 = vsel %vm2054_vm6, %v10266_v31, %v2476_v55  ;;  %v2535_v43 = vsel %vm2054_vm6, %v2495_v33, %v10271_v35  ;;  %v10272_v31 = vrot.slane %v7440_v20, 2  ;;  %v10273_v51 = vrot.slane %v6062_v34, 2  ;;  %v10279_v34 = vld [vmem:[#allocation62_spill] sm:$0xff] }
 0x235   : > { %v10274_v53 = vrot.slane %v6692_v3, 2  ;;  %v10275_v35 = vrot.slane %v6072_v22, 2  ;;  %v10277_v9 = vrot.slane %v5385_v11, 2  ;;  %v10278_v33 = vrot.slane %v6711_v6, 2  ;;  %v10282_v22 = vld [vmem:[#allocation63_spill] sm:$0xff]  ;;  %v10285_v11 = vld [vmem:[#allocation64_spill] sm:$0xff] }
 0x236   : > { %v2536_v7 = vsel %vm2054_vm6, %v2496_v50, %v10272_v31  ;;  %v10280_v47 = vrot.slane %v10279_v34, 2  ;;  %v10281_v50 = vrot.slane %v6728_v12, 2  ;;  %v10284_v41 = vrot.slane %v6733_v10, 2  ;;  %v10321_v3 = vld [vmem:[#allocation98_spill] sm:$0xff] }
 0x237   : > { %v2579_v4 = vsel %vm2054_vm6, %v10274_v53, %v10273_v51  ;;  %v2580_v31 = vsel %vm2054_vm6, %v10276_v1, %v10275_v35  ;;  %v2581_v55 = vsel %vm2054_vm6, %v10278_v33, %v10277_v9  ;;  %v10283_v53 = vrot.slane %v10282_v22, 2  ;;  %v10288_v33 = vld [vmem:[#allocation65_spill] sm:$0xff] }
 0x238   : > { %v2582_v51 = vsel %vm2054_vm6, %v10281_v50, %v10280_v47  ;;  %v10286_v35 = vrot.slane %v10285_v11, 2  ;;  %v10287_v6 = vrot.slane %v6738_v59, 2  ;;  %v10289_v34 = vrot.slane %v10288_v33, 2  ;;  %v10291_v50 = vld [vmem:[#allocation14_spill] sm:$0xff] }
 0x239   : > { %v2583_v1 = vsel %vm2054_vm6, %v10284_v41, %v10283_v53  ;;  %v10290_v12 = vrot.slane %v6743_v45, 2  ;;  %v10292_v22 = vrot.slane %v10291_v50, 2  ;;  %v10293_v10 = vrot.slane %v6953_v58, 2  ;;  %v10294_v53 = vld [vmem:[#allocation17_spill] sm:$0xff] }
 0x23a   : > { %v2584_v9 = vsel %vm2054_vm6, %v10287_v6, %v10286_v35  ;;  %v10295_v11 = vrot.slane %v10294_v53, 2  ;;  %v10296_v59 = vrot.slane %v6959_v29, 2  ;;  %v2615_v35 = vmax.f32 %v7474_v16, %v2575_v32  ;;  %v10319_v29 = vld [vmem:[#allocation20_spill] sm:$0xff]  ;;  %v10320_v58 = vld [vmem:[#allocation97_spill] sm:$0xff] }
 0x23b   : > { %v2585_v47 = vsel %vm2054_vm6, %v10290_v12, %v10289_v34  ;;  %v2586_v41 = vsel %vm2054_vm6, %v10293_v10, %v10292_v22  ;;  %v7675_v33 = vmax.f32 %v2415_v26, %v2555_v23  ;;  %v7677_v45 = vmax.f32 %v2395_v18, %v2535_v43 }
 0x23c   : > { %v2587_v6 = vsel %vm2054_vm6, %v10296_v59, %v10295_v11  ;;  %v2619_v12 = vmax.f32 %v7480_v36, %v2576_v2  ;;  %v7680_v34 = vmax.f32 %v2416_v37, %v2556_v30  ;;  %v7682_v50 = vmax.f32 %v2396_v44, %v2536_v7 }
 0x23d   : > { %10297 = vst [vmem:[#allocation123_spill] sm:$0xff] %v7675_v33  ;;  %10298 = vst [vmem:[#allocation120_spill] sm:$0xff] %v7677_v45  ;;  %v2623_v10 = vmax.f32 %v7488_v14, %v2577_v39  ;;  %v2627_v22 = vmax.f32 %v7496_v62, %v2578_v25  ;;  %v2631_v53 = vmax.f32 %v7504_v60, %v2579_v4  ;;  %v2695_v36 = vrot.slane %v2615_v35, 6 }
 0x23e   : > { %10299 = vst [vmem:[#allocation121_spill] sm:$0xff] %v7680_v34  ;;  %v2635_v59 = vmax.f32 %v7512_v13, %v2580_v31  ;;  %v2639_v16 = vmax.f32 %v7520_v48, %v2581_v55  ;;  %v2643_v26 = vmax.f32 %v7528_v46, %v2582_v51  ;;  %v2647_v43 = vmax.f32 %v7536_v38, %v2583_v1  ;;  %v10302_v31 = vld [vmem:[#allocation8_spill] sm:$0xff] }
 0x23f   : > { %v2651_v18 = vmax.f32 %v7544_v0, %v2584_v9  ;;  %v2655_v37 = vmax.f32 %v7552_v52, %v2585_v47  ;;  %v2659_v44 = vmax.f32 %v7560_v19, %v2586_v41  ;;  %v2663_v39 = vmax.f32 %v7568_v28, %v2587_v6  ;;  %v10300_v19 = vld [vmem:[#allocation7_spill] sm:$0xff]  ;;  %v10303_v51 = vld [vmem:[#allocation56_spill] sm:$0xff]  ;;  %v10304_v9 = vld [vmem:[#allocation86_spill] sm:$0xff] }
 0x240   : > { %v2696_v25 = vrot.slane %v2619_v12, 6  ;;  %v2697_v14 = vrot.slane %v2623_v10, 6  ;;  %v2698_v62 = vrot.slane %v2627_v22, 6  ;;  %v2699_v60 = vrot.slane %v2631_v53, 6  ;;  %v10301_v28 = vld [vmem:[#allocation55_spill] sm:$0xff]  ;;  %v10305_v41 = vld [vmem:[#allocation48_spill] sm:$0xff] }
 0x241   : > { %v2700_v13 = vrot.slane %v2635_v59, 6  ;;  %v2701_v32 = vrot.slane %v2639_v16, 6  ;;  %v2702_v48 = vrot.slane %v2643_v26, 6  ;;  %v2703_v2 = vrot.slane %v2647_v43, 6  ;;  %v10306_v6 = vld [vmem:[#allocation85_spill] sm:$0xff]  ;;  %v10308_v22 = vld [vmem:[#allocation59_spill] sm:$0xff] }
 0x242   : > { %v2704_v46 = vrot.slane %v2651_v18, 6  ;;  %v2705_v7 = vrot.slane %v2655_v37, 6  ;;  %v2706_v38 = vrot.slane %v2659_v44, 6  ;;  %v2707_v23 = vrot.slane %v2663_v39, 6  ;;  %v10307_v12 = vld [vmem:[#allocation9_spill] sm:$0xff]  ;;  %v10309_v59 = vld [vmem:[#allocation12_spill] sm:$0xff] }
 0x243   : > { %v9574_v0 = vrot.slane %v7675_v33, 6  ;;  %v9573_v52 = vrot.slane %v7680_v34, 6  ;;  %v9572_v30 = vrot.slane %v10300_v19, 6  ;;  %v9571_v4 = vrot.slane %v10301_v28, 6  ;;  %v10310_v18 = vld [vmem:[#allocation54_spill] sm:$0xff] }
 0x244   : > { %v9570_v55 = vrot.slane %v10302_v31, 6  ;;  %v9569_v1 = vrot.slane %v10303_v51, 6  ;;  %v9566_v47 = vrot.slane %v10304_v9, 6  ;;  %v9563_v11 = vrot.slane %v10305_v41, 6 }
 0x245   : > { %v9564_v35 = vrot.slane %v10306_v6, 6  ;;  %v9565_v10 = vrot.slane %v10307_v12, 6  ;;  %v9567_v53 = vrot.slane %v10308_v22, 6  ;;  %v9568_v16 = vrot.slane %v10309_v59, 6 }
 0x246   : > { %v7711_v26 = vsel %vm1893_vm5, %v2695_v36, %v9574_v0  ;;  %v2776_v43 = vsel %vm1893_vm5, %v2696_v25, %v9573_v52  ;;  %v10311_v37 = vrot.slane %v10310_v18, 6  ;;  %v2778_v39 = vsel %vm1893_vm5, %v2698_v62, %v9572_v30  ;;  %v10312_v30 = vld [vmem:[#allocation30_spill] sm:$0xff]  ;;  %v10313_v0 = vld [vmem:[#allocation13_spill] sm:$0xff] }
 0x247   : > { %v2779_v36 = vsel %vm1893_vm5, %v2699_v60, %v9571_v4  ;;  %v2780_v25 = vsel %vm1893_vm5, %v2700_v13, %v9570_v55  ;;  %v2782_v62 = vsel %vm1893_vm5, %v2702_v48, %v9566_v47  ;;  %v2783_v60 = vsel %vm1893_vm5, %v2703_v2, %v9563_v11 }
 0x248   : > { %v2777_v44 = vsel %vm1893_vm5, %v2697_v14, %v10311_v37  ;;  %v2781_v14 = vsel %vm1893_vm5, %v2701_v32, %v9569_v1  ;;  %v2784_v13 = vsel %vm1893_vm5, %v2704_v46, %v9564_v35  ;;  %v2785_v32 = vsel %vm1893_vm5, %v2705_v7, %v9565_v10 }
 0x249   : > { %v2786_v48 = vsel %vm1893_vm5, %v2706_v38, %v9567_v53  ;;  %v2787_v2 = vsel %vm1893_vm5, %v2707_v23, %v9568_v16  ;;  %v2795_v37 = vrot.slane %v7675_v33, 2  ;;  %v2796_v11 = vrot.slane %v7680_v34, 2  ;;  %v10317_v34 = vld [vmem:[#allocation19_spill] sm:$0xff]  ;;  %v10318_v33 = vld [vmem:[#allocation68_spill] sm:$0xff] }
 0x24a   : > { %v2798_v46 = vrot.slane %v10300_v19, 2  ;;  %v2799_v35 = vrot.slane %v10301_v28, 2  ;;  %v2800_v7 = vrot.slane %v10302_v31, 2  ;;  %v2801_v10 = vrot.slane %v10303_v51, 2  ;;  %v10314_v31 = vld [vmem:[#allocation21_spill] sm:$0xff]  ;;  %v10316_v19 = vld [vmem:[#allocation67_spill] sm:$0xff] }
 0x24b   : > { %v2802_v47 = vrot.slane %v10304_v9, 2  ;;  %v2803_v38 = vrot.slane %v10305_v41, 2  ;;  %v2804_v53 = vrot.slane %v10306_v6, 2  ;;  %v2805_v23 = vrot.slane %v10307_v12, 2  ;;  %v10315_v28 = vld [vmem:[#allocation81_spill] sm:$0xff]  ;;  %v10324_v41 = vld [vmem:[#allocation16_spill] sm:$0xff] }
 0x24c   : > { %v2806_v16 = vrot.slane %v10308_v22, 2  ;;  %v2807_v1 = vrot.slane %v10309_v59, 2  ;;  %v10322_v52 = vrot.slane %v7677_v45, 2  ;;  %v10323_v9 = vrot.slane %v7682_v50, 2 }
 0x24d   : > { %v10325_v12 = vrot.slane %v10324_v41, 2  ;;  %v10326_v22 = vrot.slane %v10310_v18, 2  ;;  %v10327_v55 = vrot.slane %v10312_v30, 2  ;;  %v10328_v45 = vrot.slane %v10313_v0, 2 }
 0x24e   : > { %v2875_v51 = vsel %vm2054_vm6, %v2795_v37, %v10322_v52  ;;  %v2876_v6 = vsel %vm2054_vm6, %v2796_v11, %v10323_v9  ;;  %v10329_v37 = vrot.slane %v10314_v31, 2  ;;  %v10330_v11 = vrot.slane %v10315_v28, 2 }
 0x24f   : > { %v2877_v59 = vsel %vm2054_vm6, %v10326_v22, %v10325_v12  ;;  %v2878_v4 = vsel %vm2054_vm6, %v2798_v46, %v10327_v55  ;;  %v2879_v52 = vsel %vm2054_vm6, %v2799_v35, %v10328_v45  ;;  %v10331_v22 = vrot.slane %v10316_v19, 2 }
 0x250   : > { %v2880_v9 = vsel %vm2054_vm6, %v2800_v7, %v10329_v37  ;;  %v2881_v12 = vsel %vm2054_vm6, %v2801_v10, %v10330_v11  ;;  %v10332_v46 = vrot.slane %v10317_v34, 2  ;;  %v10333_v35 = vrot.slane %v10318_v33, 2 }
 0x251   : > { %v2882_v55 = vsel %vm2054_vm6, %v2802_v47, %v10331_v22  ;;  %v10334_v37 = vrot.slane %v10319_v29, 2  ;;  %v10335_v11 = vrot.slane %v10320_v58, 2  ;;  %v10336_v22 = vrot.slane %v10321_v3, 2 }
 0x252   : > { %v2883_v45 = vsel %vm2054_vm6, %v2803_v38, %v10332_v46  ;;  %v2884_v7 = vsel %vm2054_vm6, %v2804_v53, %v10333_v35  ;;  %v2895_v46 = vmax.f32 %v7711_v26, %v2875_v51  ;;  %v2897_v18 = vmax.f32 %v2776_v43, %v2876_v6 }
 0x253   : > { %v2885_v10 = vsel %vm2054_vm6, %v2805_v23, %v10334_v37  ;;  %v2886_v47 = vsel %vm2054_vm6, %v2806_v16, %v10335_v11  ;;  %v2887_v38 = vsel %vm2054_vm6, %v2807_v1, %v10336_v22  ;;  %v2899_v41 = vmax.f32 %v2777_v44, %v2877_v59 }
 0x254   : > { %v2901_v53 = vmax.f32 %v2778_v39, %v2878_v4  ;;  %v2903_v35 = vmax.f32 %v2779_v36, %v2879_v52  ;;  %v2905_v29 = vmax.f32 %v2780_v25, %v2880_v9  ;;  %v2907_v33 = vmax.f32 %v2781_v14, %v2881_v12  ;;  %v10355_v9 = vld [vmem:[#allocation4_spill] sm:$0xff] }
 0x255   : > { %v2909_v34 = vmax.f32 %v2782_v62, %v2882_v55  ;;  %v2911_v23 = vmax.f32 %v2783_v60, %v2883_v45  ;;  %v2913_v37 = vmax.f32 %v2784_v13, %v2884_v7  ;;  %v2915_v58 = vmax.f32 %v2785_v32, %v2885_v10  ;;  %v10352_v32 = vld [vmem:[#allocation45_spill] sm:$0xff]  ;;  %v10358_v7 = vld [vmem:[#allocation92_spill] sm:$0xff] }
 0x256   : > { %v2917_v19 = vmax.f32 %v2786_v48, %v2886_v47  ;;  %v7840_v28 = vmax.f32 %v2787_v2, %v2887_v38  ;;  %v3087_v16 = vmax.f32 %v2895_v46, %v2897_v18  ;;  %v3089_v11 = vmax.f32 %v2897_v18, %v2899_v41  ;;  %v10361_v38 = vld [vmem:[#allocation87_spill] sm:$0xff] }
 0x257   : > { %v7842_v3 = vmax.f32 %v2899_v41, %v2901_v53  ;;  %v7844_v1 = vmax.f32 %v2901_v53, %v2903_v35  ;;  %v7846_v51 = vmax.f32 %v2903_v35, %v2905_v29  ;;  %v7848_v6 = vmax.f32 %v2905_v29, %v2907_v33 }
 0x258   : > { %10337 = vst [vmem:[#allocation122_spill] sm:$0xff] %v7840_v28  ;;  %v7850_v4 = vmax.f32 %v2907_v33, %v2909_v34  ;;  %v7852_v59 = vmax.f32 %v2909_v34, %v2911_v23  ;;  %v7854_v26 = vmax.f32 %v2911_v23, %v2913_v37  ;;  %v7856_v43 = vmax.f32 %v2913_v37, %v2915_v58  ;;  %v10365_v37 = vld [vmem:[#allocation69_spill] sm:$0xff] }
 0x259   : > { %10338 = vst [vmem:[#allocation49_spill] sm:$0xff] %v7844_v1  ;;  %10339 = vst [vmem:[#allocation47_spill] sm:$0xff] %v7848_v6  ;;  %v7858_v44 = vmax.f32 %v2915_v58, %v2917_v19  ;;  %v7861_v18 = vmax.f32 %v2917_v19, %v7840_v28  ;;  %v3125_v41 = vmax.f32 %v3087_v16, %v7842_v3  ;;  %v10345_v34 = vrot.slane %v7432_v40, 6 }
 0x25a   : > { %10340 = vst [vmem:[#allocation34_spill] sm:$0xff] %v7852_v59  ;;  %10341 = vst [vmem:[#allocation51_spill] sm:$0xff] %v7856_v43  ;;  %v7865_v39 = vmax.f32 %v3089_v11, %v7844_v1  ;;  %v7869_v29 = vmax.f32 %v7846_v51, %v7850_v4  ;;  %v7873_v33 = vmax.f32 %v7848_v6, %v7852_v59  ;;  %v10346_v58 = vrot.slane %v7430_v57, 6 }
 0x25b   : > { %10342 = vst [vmem:[#allocation50_spill] sm:$0xff] %v7858_v44  ;;  %10343 = vst [vmem:[#allocation40_spill] sm:$0xff] %v7861_v18  ;;  %v10347_v36 = vrot.slane %v7440_v20, 6  ;;  %v10348_v25 = vrot.slane %v7438_v24, 6  ;;  %v7893_v62 = vmax.f32 %v7854_v26, %v7858_v44  ;;  %v7897_v60 = vmax.f32 %v7856_v43, %v7861_v18 }
 0x25c   : > { %10344 = vst [vmem:[#allocation88_spill] sm:$0xff] %v7869_v29  ;;  %v7881_v19 = vsel %vm1893_vm5, %v10346_v58, %v10345_v34  ;;  %v3159_v57 = vmax.f32 %v3125_v41, %v7865_v39  ;;  %v10351_v13 = vrot.slane %v7118_v5, 6  ;;  %v10353_v48 = vrot.slane %v10352_v32, 6  ;;  %v10368_v34 = vld [vmem:[#allocation70_spill] sm:$0xff] }
 0x25d   : > { %v7889_v14 = vsel %vm1893_vm5, %v10348_v25, %v10347_v36  ;;  %10349 = vst [vmem:[#allocation91_spill] sm:$0xff] %v7893_v62  ;;  %10350 = vst [vmem:[#allocation105_spill] sm:$0xff] %v7897_v60  ;;  %v3167_v2 = vmax.f32 %v7869_v29, %v7873_v33  ;;  %v10354_v52 = vrot.slane %v7120_v42, 6  ;;  %v10356_v12 = vrot.slane %v10355_v9, 6  ;;  %v10441_v29 = vld [vmem:[#allocation7_spill] sm:$0xff] }
 0x25e   : > { %v7906_v24 = vsel %vm1893_vm5, %v10353_v48, %v10351_v13  ;;  %v10357_v45 = vrot.slane %v7103_v21, 6  ;;  %v10359_v10 = vrot.slane %v10358_v7, 6  ;;  %v10360_v22 = vrot.slane %v7107_v54, 6  ;;  %v10371_v13 = vld [vmem:[#allocation71_spill] sm:$0xff] }
 0x25f   : > { %v7916_v55 = vsel %vm1893_vm5, %v10356_v12, %v10354_v52  ;;  %v10362_v46 = vrot.slane %v10361_v38, 6  ;;  %v7936_v35 = vmax.f32 %v7893_v62, %v7897_v60  ;;  %v10364_v23 = vrot.slane %v10246_v63, 6  ;;  %v10374_v12 = vld [vmem:[#allocation72_spill] sm:$0xff]  ;;  %v10443_v60 = vld [vmem:[#allocation55_spill] sm:$0xff] }
 0x260   : > { %v7924_v47 = vsel %vm1893_vm5, %v10359_v10, %v10357_v45  ;;  %v10366_v16 = vrot.slane %v10365_v37, 6  ;;  %v10367_v41 = vrot.slane %v10247_v8, 6  ;;  %v10369_v58 = vrot.slane %v10368_v34, 6  ;;  %v10380_v37 = vld [vmem:[#allocation75_spill] sm:$0xff] }
 0x261   : > { %v7932_v53 = vsel %vm1893_vm5, %v10362_v46, %v10360_v22  ;;  %10363 = vst [vmem:[#allocation103_spill] sm:$0xff] %v7936_v35  ;;  %v10370_v25 = vrot.slane %v10248_v17, 6  ;;  %v10372_v32 = vrot.slane %v10371_v13, 6  ;;  %v3191_v52 = vmax.f32 %v3159_v57, %v3167_v2  ;;  %v10377_v22 = vld [vmem:[#allocation73_spill] sm:$0xff] }
 0x262   : > { %v7944_v11 = vsel %vm1893_vm5, %v10366_v16, %v10364_v23  ;;  %v7952_v36 = vsel %vm1893_vm5, %v10369_v58, %v10367_v41  ;;  %v10373_v9 = vrot.slane %v10249_v56, 6  ;;  %v10375_v45 = vrot.slane %v10374_v12, 6  ;;  %v10384_v58 = vld [vmem:[#allocation22_spill] sm:$0xff] }
 0x263   : > { %v7960_v48 = vsel %vm1893_vm5, %v10372_v32, %v10370_v25  ;;  %v10376_v10 = vrot.slane %v10250_v27, 6  ;;  %v10378_v38 = vrot.slane %v10377_v22, 6  ;;  %v10379_v23 = vrot.slane %v10251_v15, 6  ;;  %v10386_v32 = vld [vmem:[#allocation119_spill] sm:$0xff] }
 0x264   : > { %v7968_v7 = vsel %vm1893_vm5, %v10375_v45, %v10373_v9  ;;  %v10381_v57 = vrot.slane %v10380_v37, 6  ;;  %v7987_v41 = vmax.f32 %v3167_v2, %v7936_v35  ;;  %v10383_v34 = vrot.slane %v10252_v61, 6 }
 0x265   : > { %v7976_v46 = vsel %vm1893_vm5, %v10378_v38, %v10376_v10  ;;  %v10385_v25 = vrot.slane %v10384_v58, 6  ;;  %v10387_v9 = vrot.slane %v10386_v32, 2  ;;  %v10388_v12 = vrot.slane %v7432_v40, 2  ;;  %v10389_v10 = vld [vmem:[#allocation118_spill] sm:$0xff]  ;;  %v10395_v58 = vld [vmem:[#allocation83_spill] sm:$0xff] }
 0x266   : > { %v7984_v16 = vsel %vm1893_vm5, %v10381_v57, %v10379_v23  ;;  %10382 = vst [vmem:[#allocation110_spill] sm:$0xff] %v7987_v41  ;;  %v10390_v22 = vrot.slane %v10389_v10, 2  ;;  %v10391_v2 = vrot.slane %v7440_v20, 2  ;;  %v10392_v23 = vld [vmem:[#allocation33_spill] sm:$0xff]  ;;  %v10394_v57 = vrot.slane %v7118_v5, 2 }
 0x267   : > { %v7995_v13 = vsel %vm1893_vm5, %v10385_v25, %v10383_v34  ;;  %v2595_v45 = vsel %vm2054_vm6, %v10388_v12, %v10387_v9  ;;  %v10393_v37 = vrot.slane %v10392_v23, 2  ;;  %v10396_v25 = vrot.slane %v10395_v58, 2  ;;  %v10398_v9 = vld [vmem:[#allocation26_spill] sm:$0xff] }
 0x268   : > { %v2596_v38 = vsel %vm2054_vm6, %v10391_v2, %v10390_v22  ;;  %v10397_v40 = vrot.slane %v7120_v42, 2  ;;  %v10399_v12 = vrot.slane %v10398_v9, 2  ;;  %v10400_v20 = vrot.slane %v7103_v21, 2  ;;  %v10401_v22 = vld [vmem:[#allocation84_spill] sm:$0xff]  ;;  %v10404_v42 = vld [vmem:[#allocation46_spill] sm:$0xff] }
 0x269   : > { %v2597_v34 = vsel %vm2054_vm6, %v10394_v57, %v10393_v37  ;;  %v10402_v2 = vrot.slane %v10401_v22, 2  ;;  %v10403_v5 = vrot.slane %v7107_v54, 2  ;;  %v3215_v37 = vmax.f32 %v3191_v52, %v7987_v41  ;;  %v10407_v21 = vld [vmem:[#allocation52_spill] sm:$0xff]  ;;  %v10410_v54 = vld [vmem:[#allocation5_spill] sm:$0xff]  ;;  %v10439_v41 = vld [vmem:[#allocation54_spill] sm:$0xff] }
 0x26a   : > { %v2598_v32 = vsel %vm2054_vm6, %v10397_v40, %v10396_v25  ;;  %v2599_v10 = vsel %vm2054_vm6, %v10400_v20, %v10399_v12  ;;  %v10405_v57 = vrot.slane %v10404_v42, 2  ;;  %v10406_v58 = vrot.slane %v10246_v63, 2 }
 0x26b   : > { %v2600_v23 = vsel %vm2054_vm6, %v10403_v5, %v10402_v2  ;;  %v10408_v40 = vrot.slane %v10407_v21, 2  ;;  %v10409_v9 = vrot.slane %v10247_v8, 2  ;;  %v10411_v20 = vrot.slane %v10410_v54, 2  ;;  %v10413_v2 = vld [vmem:[#allocation53_spill] sm:$0xff]  ;;  %3425 = vrot.lane.b32.xlu0 %v3215_v37, %s4280_s12 }
 0x26c   : > { %v2601_v25 = vsel %vm2054_vm6, %v10406_v58, %v10405_v57  ;;  %v10412_v22 = vrot.slane %v10248_v17, 2  ;;  %v10414_v5 = vrot.slane %v10413_v2, 2  ;;  %v10415_v63 = vrot.slane %v10249_v56, 2  ;;  %v10416_v57 = vld [vmem:[#allocation6_spill] sm:$0xff] }
 0x26d   : > { %v2602_v12 = vsel %vm2054_vm6, %v10409_v9, %v10408_v40  ;;  %v10417_v58 = vrot.slane %v10416_v57, 2  ;;  %v10418_v8 = vrot.slane %v10250_v27, 2  ;;  %v10419_v40 = vld [vmem:[#allocation57_spill] sm:$0xff]  ;;  %v10421_v17 = vrot.slane %v10251_v15, 2 }
 0x26e   : > { %v2603_v52 = vsel %vm2054_vm6, %v10412_v22, %v10411_v20  ;;  %v2604_v42 = vsel %vm2054_vm6, %v10415_v63, %v10414_v5  ;;  %v10420_v9 = vrot.slane %v10419_v40, 2  ;;  %v10422_v20 = vld [vmem:[#allocation10_spill] sm:$0xff]  ;;  %v10424_v56 = vrot.slane %v10252_v61, 2 }
 0x26f   : > { %v2605_v21 = vsel %vm2054_vm6, %v10418_v8, %v10417_v58  ;;  %v10423_v22 = vrot.slane %v10422_v20, 2  ;;  %v2618_v27 = vmax.f32 %v7881_v19, %v2595_v45  ;;  %v2622_v5 = vmax.f32 %v7889_v14, %v2596_v38  ;;  %v10425_v45 = vld [vmem:[#allocation120_spill] sm:$0xff]  ;;  %v10426_v38 = vld [vmem:[#allocation81_spill] sm:$0xff] }
 0x270   : > { %v2606_v54 = vsel %vm2054_vm6, %v10421_v17, %v10420_v9  ;;  %v2626_v63 = vmax.f32 %v7906_v24, %v2597_v34  ;;  %v2630_v15 = vmax.f32 %v7916_v55, %v2598_v32  ;;  %v2634_v57 = vmax.f32 %v7924_v47, %v2599_v10  ;;  %v10427_v34 = vld [vmem:[#allocation67_spill] sm:$0xff]  ;;  %v10429_v10 = vld [vmem:[#allocation68_spill] sm:$0xff] }
 0x271   : > { %v2607_v2 = vsel %vm2054_vm6, %v10424_v56, %v10423_v22  ;;  %v2638_v58 = vmax.f32 %v7932_v53, %v2600_v23  ;;  %v2642_v61 = vmax.f32 %v7944_v11, %v2601_v25  ;;  %v2646_v8 = vmax.f32 %v7952_v36, %v2602_v12  ;;  %v10428_v32 = vld [vmem:[#allocation19_spill] sm:$0xff]  ;;  %v10430_v23 = vld [vmem:[#allocation20_spill] sm:$0xff]  ;;  %v10431_v25 = vld [vmem:[#allocation97_spill] sm:$0xff] }
 0x272   : > { %v2650_v40 = vmax.f32 %v7960_v48, %v2603_v52  ;;  %v2654_v37 = vmax.f32 %v7968_v7, %v2604_v42  ;;  %v2658_v19 = vmax.f32 %v7976_v46, %v2605_v21  ;;  %v2662_v14 = vmax.f32 %v7984_v16, %v2606_v54  ;;  %v10432_v52 = vld [vmem:[#allocation98_spill] sm:$0xff]  ;;  %v10433_v21 = vld [vmem:[#allocation123_spill] sm:$0xff]  ;;  %v10435_v54 = vld [vmem:[#allocation121_spill] sm:$0xff] }
 0x273   : > { %v2666_v24 = vmax.f32 %v7995_v13, %v2607_v2  ;;  %v2735_v55 = vrot.slane %v10425_v45, 6  ;;  %v2736_v47 = vrot.slane %v7682_v50, 6  ;;  %v2738_v53 = vrot.slane %v10312_v30, 6  ;;  %v10437_v56 = vld [vmem:[#allocation16_spill] sm:$0xff] }
 0x274   : > { %v2739_v11 = vrot.slane %v10313_v0, 6  ;;  %v2740_v36 = vrot.slane %v10314_v31, 6  ;;  %v2741_v48 = vrot.slane %v10426_v38, 6  ;;  %v2742_v7 = vrot.slane %v10427_v34, 6 }
 0x275   : > { %v2743_v46 = vrot.slane %v10428_v32, 6  ;;  %v2744_v16 = vrot.slane %v10429_v10, 6  ;;  %v2745_v13 = vrot.slane %v10430_v23, 6  ;;  %v2746_v12 = vrot.slane %v10431_v25, 6 }
 0x276   : > { %v2747_v42 = vrot.slane %v10432_v52, 6  ;;  %v10434_v9 = vrot.slane %v10433_v21, 6  ;;  %v10436_v20 = vrot.slane %v10435_v54, 6  ;;  %v10438_v2 = vrot.slane %v10437_v56, 6 }
 0x277   : > { %v10440_v35 = vrot.slane %v10439_v41, 6  ;;  %v10442_v18 = vrot.slane %v10441_v29, 6  ;;  %v10444_v59 = vrot.slane %v10443_v60, 6  ;;  %v2837_v43 = vrot.slane %v2626_v63, 2 }
 0x278   : > { %v2755_v17 = vsel %vm1893_vm5, %v10434_v9, %v2735_v55  ;;  %v2756_v22 = vsel %vm1893_vm5, %v10436_v20, %v2736_v47  ;;  %v10445_v9 = vld [vmem:[#allocation8_spill] sm:$0xff]  ;;  %v2838_v44 = vrot.slane %v2630_v15, 2  ;;  %v2842_v1 = vrot.slane %v2646_v8, 2 }
 0x279   : > { %v2757_v62 = vsel %vm1893_vm5, %v10440_v35, %v10438_v2  ;;  %v2758_v21 = vsel %vm1893_vm5, %v10442_v18, %v2738_v53  ;;  %v2759_v55 = vsel %vm1893_vm5, %v10444_v59, %v2739_v11  ;;  %v10446_v54 = vrot.slane %v10445_v9, 6  ;;  %v10447_v20 = vld [vmem:[#allocation56_spill] sm:$0xff]  ;;  %v10449_v2 = vld [vmem:[#allocation86_spill] sm:$0xff]  ;;  %v10453_v11 = vld [vmem:[#allocation85_spill] sm:$0xff] }
 0x27a   : > { %v10448_v41 = vrot.slane %v10447_v20, 6  ;;  %v10450_v29 = vrot.slane %v10449_v2, 6  ;;  %v10451_v53 = vld [vmem:[#allocation48_spill] sm:$0xff]  ;;  %v10454_v9 = vrot.slane %v10453_v11, 6  ;;  %v2836_v11 = vrot.slane %v2622_v5, 2 }
 0x27b   : > { %v2760_v47 = vsel %vm1893_vm5, %v10446_v54, %v2740_v36  ;;  %v10452_v60 = vrot.slane %v10451_v53, 6  ;;  %v10455_v54 = vld [vmem:[#allocation9_spill] sm:$0xff]  ;;  %v2843_v6 = vrot.slane %v2650_v40, 2  ;;  %v2847_v28 = vrot.slane %v2666_v24, 2 }
 0x27c   : > { %v2761_v35 = vsel %vm1893_vm5, %v10448_v41, %v2741_v48  ;;  %v2762_v18 = vsel %vm1893_vm5, %v10450_v29, %v2742_v7  ;;  %v2764_v36 = vsel %vm1893_vm5, %v10454_v9, %v2744_v16  ;;  %v10456_v20 = vrot.slane %v10455_v54, 6  ;;  %v10457_v41 = vld [vmem:[#allocation59_spill] sm:$0xff]  ;;  %v10459_v29 = vld [vmem:[#allocation12_spill] sm:$0xff] }
 0x27d   : > { %v2763_v59 = vsel %vm1893_vm5, %v10452_v60, %v2743_v46  ;;  %v10458_v2 = vrot.slane %v10457_v41, 6  ;;  %v10460_v53 = vrot.slane %v10459_v29, 6  ;;  %v2835_v60 = vrot.slane %v2618_v27, 2 }
 0x27e   : > { %v2765_v48 = vsel %vm1893_vm5, %v10456_v20, %v2745_v13  ;;  %v2839_v16 = vrot.slane %v2634_v57, 2  ;;  %v2840_v9 = vrot.slane %v2638_v58, 2  ;;  %v2841_v54 = vrot.slane %v2642_v61, 2 }
 0x27f   : > { %v2766_v7 = vsel %vm1893_vm5, %v10458_v2, %v2746_v12  ;;  %v2767_v46 = vsel %vm1893_vm5, %v10460_v53, %v2747_v42  ;;  %v2844_v13 = vrot.slane %v2654_v37, 2  ;;  %v2845_v20 = vrot.slane %v2658_v19, 2 }
 0x280   : > { %v2846_v41 = vrot.slane %v2662_v14, 2  ;;  %v10461_v12 = vrot.slane %v10425_v45, 2  ;;  %v10462_v42 = vrot.slane %v7682_v50, 2  ;;  %v10463_v5 = vrot.slane %v10437_v56, 2 }
 0x281   : > { %v10464_v15 = vrot.slane %v10312_v30, 2  ;;  %v10465_v58 = vrot.slane %v10313_v0, 2  ;;  %v10466_v50 = vrot.slane %v10314_v31, 2  ;;  %v10467_v40 = vrot.slane %v10426_v38, 2 }
 0x282   : > { %v2855_v2 = vsel %vm2054_vm6, %v10461_v12, %v2835_v60  ;;  %v2856_v27 = vsel %vm2054_vm6, %v10462_v42, %v2836_v11  ;;  %v2857_v63 = vsel %vm2054_vm6, %v10463_v5, %v2837_v43  ;;  %v10468_v30 = vrot.slane %v10427_v34, 2 }
 0x283   : > { %v2858_v57 = vsel %vm2054_vm6, %v10464_v15, %v2838_v44  ;;  %v2859_v61 = vsel %vm2054_vm6, %v10465_v58, %v2839_v16  ;;  %v2860_v8 = vsel %vm2054_vm6, %v10466_v50, %v2840_v9  ;;  %v2861_v43 = vsel %vm2054_vm6, %v10467_v40, %v2841_v54 }
 0x284   : > { %v2862_v44 = vsel %vm2054_vm6, %v10468_v30, %v2842_v1  ;;  %v10469_v0 = vrot.slane %v10428_v32, 2  ;;  %v10470_v31 = vrot.slane %v10429_v10, 2  ;;  %v10471_v14 = vrot.slane %v10430_v23, 2  ;;  %v10480_v30 = vld [vmem:[#allocation99_spill] sm:$0xff] }
 0x285   : > { %v10472_v45 = vrot.slane %v10431_v25, 2  ;;  %v10473_v38 = vrot.slane %v10432_v52, 2  ;;  %v2896_v34 = vmax.f32 %v2755_v17, %v2855_v2  ;;  %v2898_v32 = vmax.f32 %v2756_v22, %v2856_v27  ;;  %v10475_v2 = vld [vmem:[#allocation58_spill] sm:$0xff] }
 0x286   : > { %v2863_v37 = vsel %vm2054_vm6, %v10469_v0, %v2843_v6  ;;  %v2864_v19 = vsel %vm2054_vm6, %v10470_v31, %v2844_v13  ;;  %v2865_v24 = vsel %vm2054_vm6, %v10471_v14, %v2845_v20  ;;  %v2900_v10 = vmax.f32 %v2757_v62, %v2857_v63  ;;  %v10476_v63 = vld [vmem:[#allocation60_spill] sm:$0xff] }
 0x287   : > { %v2866_v1 = vsel %vm2054_vm6, %v10472_v45, %v2846_v41  ;;  %v2867_v6 = vsel %vm2054_vm6, %v10473_v38, %v2847_v28  ;;  %v2902_v56 = vmax.f32 %v2758_v21, %v2858_v57  ;;  %v2904_v29 = vmax.f32 %v2759_v55, %v2859_v61  ;;  %v10481_v45 = vld [vmem:[#allocation80_spill] sm:$0xff] }
 0x288   : > { %v2906_v53 = vmax.f32 %v2760_v47, %v2860_v8  ;;  %v2908_v23 = vmax.f32 %v2761_v35, %v2861_v43  ;;  %v2910_v60 = vmax.f32 %v2762_v18, %v2862_v44  ;;  %v2912_v11 = vmax.f32 %v2763_v59, %v2863_v37  ;;  %v10478_v8 = vld [vmem:[#allocation23_spill] sm:$0xff] }
 0x289   : > { %v2914_v16 = vmax.f32 %v2764_v36, %v2864_v19  ;;  %v2916_v9 = vmax.f32 %v2765_v48, %v2865_v24  ;;  %v2918_v25 = vmax.f32 %v2766_v7, %v2866_v1  ;;  %v8208_v54 = vmax.f32 %v2767_v46, %v2867_v6  ;;  %v10474_v46 = vld [vmem:[#allocation66_spill] sm:$0xff] }
 0x28a   : > { %v3088_v13 = vmax.f32 %v2896_v34, %v2898_v32  ;;  %v3090_v20 = vmax.f32 %v2898_v32, %v2900_v10  ;;  %v3092_v52 = vmax.f32 %v2900_v10, %v2902_v56  ;;  %v8210_v41 = vmax.f32 %v2902_v56, %v2904_v29 }
 0x28b   : > { %v3096_v28 = vmax.f32 %v2904_v29, %v2906_v53  ;;  %v8212_v17 = vmax.f32 %v2906_v53, %v2908_v23  ;;  %v3100_v62 = vmax.f32 %v2908_v23, %v2910_v60  ;;  %v8214_v22 = vmax.f32 %v2910_v60, %v2912_v11 }
 0x28c   : > { %v3104_v21 = vmax.f32 %v2912_v11, %v2914_v16  ;;  %v8216_v55 = vmax.f32 %v2914_v16, %v2916_v9  ;;  %v8218_v47 = vmax.f32 %v2916_v9, %v2918_v25  ;;  %v8221_v35 = vmax.f32 %v2918_v25, %v8208_v54  ;;  %v10484_v11 = vld [vmem:[#allocation18_spill] sm:$0xff] }
 0x28d   : > { %v3126_v18 = vmax.f32 %v3088_v13, %v3092_v52  ;;  %v3128_v59 = vmax.f32 %v3090_v20, %v8210_v41  ;;  %v8224_v36 = vmax.f32 %v3096_v28, %v3100_v62  ;;  %v3136_v48 = vmax.f32 %v8212_v17, %v8214_v22  ;;  %v10485_v20 = vld [vmem:[#allocation11_spill] sm:$0xff] }
 0x28e   : > { %v8229_v7 = vmax.f32 %v3104_v21, %v8218_v47  ;;  %v2368_v12 = vrot.slane %v10474_v46, 6  ;;  %v2468_v42 = vrot.slane %v10475_v2, 2  ;;  %v8235_v27 = vmax.f32 %v8216_v55, %v8221_v35 }
 0x28f   : > { %v3160_v5 = vmax.f32 %v3126_v18, %v3128_v59  ;;  %v2728_v15 = vrot.slane %v10476_v63, 6  ;;  %v2808_v57 = vrot.slane %v10476_v63, 2  ;;  %v3168_v58 = vmax.f32 %v8224_v36, %v3136_v48 }
 0x290   : > { %v10477_v61 = vrot.slane %v10475_v2, 6  ;;  %v10479_v40 = vrot.slane %v10478_v8, 2  ;;  %v2828_v44 = vrot.slane %v10480_v30, 2  ;;  %v8251_v0 = vmax.f32 %v8229_v7, %v8235_v27  ;;  %v10493_v8 = vld [vmem:[#allocation49_spill] sm:$0xff] }
 0x291   : > { %v3129_v31 = vmax.f32 %v7842_v3, %v7846_v51  ;;  %v3137_v19 = vmax.f32 %v7850_v4, %v7854_v26  ;;  %v3192_v14 = vmax.f32 %v3160_v5, %v3168_v58  ;;  %v10482_v1 = vrot.slane %v10481_v45, 6 }
 0x292   : > { %v2448_v50 = vsel %vm1893_vm5, %v2368_v12, %v10477_v61  ;;  %v2588_v43 = vsel %vm2054_vm6, %v2468_v42, %v10479_v40  ;;  %v2888_v24 = vsel %vm2054_vm6, %v2808_v57, %v2828_v44  ;;  %v10483_v6 = vrot.slane %v10474_v46, 2  ;;  %v10488_v46 = vld [vmem:[#allocation122_spill] sm:$0xff] }
 0x293   : > { %v2667_v37 = vmax.f32 %v2448_v50, %v2588_v43  ;;  %v2388_v38 = vsel %vm1893_vm5, %v10482_v1, %v2368_v12  ;;  %v8268_v32 = vmax.f32 %v3168_v58, %v8251_v0  ;;  %v3161_v51 = vmax.f32 %v7865_v39, %v3129_v31  ;;  %v10490_v57 = vld [vmem:[#allocation82_spill] sm:$0xff]  ;;  %v10492_v50 = vld [vmem:[#allocation47_spill] sm:$0xff] }
 0x294   : > { %v2608_v34 = vsel %vm2054_vm6, %v10483_v6, %v2468_v42  ;;  %v3169_v4 = vmax.f32 %v7873_v33, %v3137_v19  ;;  %v2748_v10 = vrot.slane %v10480_v30, 6  ;;  %v8273_v56 = vmax.f32 %v3092_v52, %v3096_v28  ;;  %v10489_v42 = vld [vmem:[#allocation100_spill] sm:$0xff]  ;;  %v10494_v43 = vld [vmem:[#allocation50_spill] sm:$0xff]  ;;  %v10497_v6 = vld [vmem:[#allocation39_spill] sm:$0xff] }
 0x295   : > { %v2708_v3 = vrot.slane %v2667_v37, 6  ;;  %v2670_v26 = vmax.f32 %v2388_v38, %v2608_v34  ;;  %v3138_v29 = vmax.f32 %v3100_v62, %v3104_v21  ;;  %v3216_v53 = vmax.f32 %v3192_v14, %v8268_v32  ;;  %v10487_v21 = vld [vmem:[#allocation15_spill] sm:$0xff] }
 0x296   : > { %v3193_v60 = vmax.f32 %v3161_v51, %v3169_v4  ;;  %v2369_v16 = vrot.slane %v10484_v11, 6  ;;  %v2768_v39 = vsel %vm1893_vm5, %v2728_v15, %v2748_v10  ;;  %v3162_v33 = vmax.f32 %v3128_v59, %v8273_v56  ;;  %v10495_v14 = vld [vmem:[#allocation51_spill] sm:$0xff]  ;;  %v10500_v10 = vld [vmem:[#allocation105_spill] sm:$0xff] }
 0x297   : > { %v2788_v23 = vsel %vm1893_vm5, %v2708_v3, %v2728_v15  ;;  %v2848_v25 = vrot.slane %v2670_v26, 2  ;;  %3427 = vrot.lane.b32.xlu1 %v3216_v53, %s4280_s12  ;;  %v3170_v13 = vmax.f32 %v3136_v48, %v3138_v29  ;;  %v10486_v52 = vrot.slane %v10485_v20, 6  ;;  %v3506_v48 = vld [vmem:[%s9162_s4] sm:$0xff] }
 0x298   : > { %v2921_v9 = vmax.f32 %v2788_v23, %v2888_v24  ;;  %v2469_v62 = vrot.slane %v10485_v20, 2  ;;  %v2729_v18 = vrot.slane %v10487_v21, 6  ;;  %v2809_v59 = vrot.slane %v10487_v21, 2  ;;  %4145 = vmatprep.subr.mxu1 %v3506_v48  ;;  %v10496_v24 = vld [vmem:[#allocation34_spill] sm:$0xff] }
 0x299   : > { %v2449_v28 = vsel %vm1893_vm5, %v2369_v16, %v10486_v52  ;;  %v2868_v2 = vsel %vm2054_vm6, %v2828_v44, %v2848_v25  ;;  %v2829_v5 = vrot.slane %v10489_v42, 2  ;;  %v3194_v15 = vmax.f32 %v3162_v33, %v3170_v13  ;;  %4146 = vmatpush3.msra.mxu1 %v3506_v48  ;;  %v8342_v33 = vld [vmem:[#allocation2 + $0x200] sm:$0xff] }
 0x29a   : > { %v8290_v12 = vmax.f32 %v10488_v46, %v2921_v9  ;;  %v2922_v63 = vmax.f32 %v2768_v39, %v2868_v2  ;;  %v10491_v58 = vrot.slane %v10490_v57, 2  ;;  %v8305_v40 = vmax.f32 %v10493_v8, %v10492_v50 }
 0x29b   : > { %v2889_v37 = vsel %vm2054_vm6, %v2809_v59, %v2829_v5  ;;  %v8313_v45 = vmax.f32 %v10496_v24, %v10495_v14  ;;  %v10498_v34 = vrot.slane %v10497_v6, 6  ;;  %v10499_v51 = vrot.slane %v10484_v11, 2 }
 0x29c   : > { %v2589_v61 = vsel %vm2054_vm6, %v2469_v62, %v10491_v58  ;;  %v3145_v30 = vmax.f32 %v10494_v43, %v8290_v12  ;;  %v8316_v1 = vmax.f32 %v8208_v54, %v2922_v63  ;;  %v3163_v38 = vmax.f32 %v3129_v31, %v8305_v40 }
 0x29d   : > { %v2671_v44 = vmax.f32 %v2449_v28, %v2589_v61  ;;  %v2389_v3 = vsel %vm1893_vm5, %v10498_v34, %v2369_v16  ;;  %v2609_v26 = vsel %vm2054_vm6, %v10499_v51, %v2469_v62  ;;  %v3171_v39 = vmax.f32 %v3137_v19, %v8313_v45  ;;  %v8349_v28 = vld [vmem:[#allocation2 + $0x208] sm:$0xff] }
 0x29e   : > { %v8328_v53 = vmax.f32 %v10500_v10, %v3145_v30  ;;  %v2674_v54 = vmax.f32 %v2389_v3, %v2609_v26  ;;  %v3146_v31 = vmax.f32 %v8218_v47, %v8316_v1  ;;  %v2749_v25 = vrot.slane %v10489_v42, 6 }
 0x29f   : > { %v2709_v23 = vrot.slane %v2671_v44, 6  ;;  %v8336_v16 = vmax.f32 %v8210_v41, %v8212_v17  ;;  %v8340_v11 = vmax.f32 %v8214_v22, %v8216_v55  ;;  %v3195_v52 = vmax.f32 %v3163_v38, %v3171_v39  ;;  %v1315_v55 = vld [vmem:[#allocation2 + $0x210] sm:$0xff] }
 0x2a0   : > { %v8345_v20 = vmax.f32 %v3169_v4, %v8328_v53  ;;  %v2849_v47 = vrot.slane %v2674_v54, 2  ;;  %v8352_v62 = vmax.f32 %v8235_v27, %v3146_v31  ;;  %v2769_v17 = vsel %vm1893_vm5, %v2729_v18, %v2749_v25  ;;  %v8360_v4 = vld [vmem:[#allocation2 + $0x218] sm:$0xff] }
 0x2a1   : > { %v2789_v19 = vsel %vm1893_vm5, %v2709_v23, %v2729_v18  ;;  %v3164_v22 = vmax.f32 %v8273_v56, %v8336_v16  ;;  %v3172_v2 = vmax.f32 %v3138_v29, %v8340_v11  ;;  %v1345_v27 = vrot.slane %v8342_v33, 7 }
 0x2a2   : > { %v8354_v41 = vmax.f32 %v2789_v19, %v2889_v37  ;;  %v3217_v21 = vmax.f32 %v3193_v60, %v8345_v20  ;;  %v2869_v46 = vsel %vm2054_vm6, %v2829_v5, %v2849_v47  ;;  %v8368_v59 = vmax.f32 %v3170_v13, %v8352_v62  ;;  %v10501_v13 = vld [vmem:[#allocation40_spill] sm:$0xff] }
 0x2a3   : > { %v8373_v42 = vmax.f32 %v2769_v17, %v2869_v46  ;;  %v1365_v56 = vrot.slane %v8349_v28, 7  ;;  %v3196_v60 = vmax.f32 %v3164_v22, %v3172_v2  ;;  %v1385_v48 = vrot.slane %v1315_v55, 7  ;;  %v8431_v46 = vpop.permute.xlu0 %3271 }
 0x2a4   : > { %v8371_v18 = vmax.f32 %v2921_v9, %v8354_v41  ;;  %3429 = vrot.lane.b32.xlu0 %v3217_v21, %s4280_s12  ;;  %v1405_v5 = vrot.slane %v8360_v4, 7  ;;  %v1508_v29 = vrot.slane %v8342_v33, 1  ;;  %v3218_v57 = vmax.f32 %v3194_v15, %v8368_v59  ;;  %3316 = vst.msk [vmem:[#allocation3 + $0x20] sm:$0xff] %vm3311_vm2, %v8431_v46 }
 0x2a5   : > { %v8385_v9 = vmax.f32 %v2922_v63, %v8373_v42  ;;  %v1468_v61 = vsel %vm1411_vm3, %v1345_v27, %v1365_v56  ;;  %v1448_v50 = vsel %vm1411_vm3, %v1365_v56, %v1385_v48  ;;  %v1528_v43 = vrot.slane %v8349_v28, 1 }
 0x2a6   : > { %v8382_v58 = vmax.f32 %v10501_v13, %v8371_v18  ;;  %v1488_v8 = vsel %vm1411_vm3, %v1405_v5, %v1345_v27  ;;  %v1548_v44 = vrot.slane %v1315_v55, 1  ;;  %3431 = vrot.lane.b32.xlu1 %v3218_v57, %s4280_s12  ;;  %v1568_v37 = vrot.slane %v8360_v4, 1 }
 0x2a7   : > { %v8400_v63 = vmax.f32 %v8221_v35, %v8385_v9  ;;  %v1829_v14 = vrot.slane %v8342_v33, 6  ;;  %v1629_v38 = vsel %vm1572_vm4, %v1508_v29, %v1528_v43  ;;  %v1849_v6 = vrot.slane %v8349_v28, 6 }
 0x2a8   : > { %v8396_v15 = vmax.f32 %v3145_v30, %v8382_v58  ;;  %v1609_v24 = vsel %vm1572_vm4, %v1528_v43, %v1548_v44  ;;  %v1869_v34 = vrot.slane %v1315_v55, 6  ;;  %v1589_v35 = vsel %vm1572_vm4, %v1548_v44, %v1568_v37 }
 0x2a9   : > { %v8413_v3 = vmax.f32 %v3146_v31, %v8400_v63  ;;  %v1717_v51 = vmax.f32 %v1488_v8, %v1629_v38  ;;  %v1718_v26 = vmax.f32 %v1468_v61, %v1609_v24  ;;  %v1719_v10 = vmax.f32 %v1448_v50, %v1589_v35  ;;  %v10505_v61 = vld [vmem:[#allocation24_spill] sm:$0xff] }
 0x2aa   : > { %v8410_v30 = vmax.f32 %v3171_v39, %v8396_v15  ;;  %v1889_v23 = vrot.slane %v8360_v4, 6  ;;  %v1930_v54 = vsel %vm1893_vm5, %v1849_v6, %v1869_v34  ;;  %v1950_v31 = vsel %vm1893_vm5, %v1829_v14, %v1849_v6 }
 0x2ab   : > { %10503 = vst [vmem:[#allocation102_spill] sm:$0xff] %v8413_v3  ;;  %v8422_v19 = vmax.f32 %v3172_v2, %v8413_v3  ;;  %v1797_v39 = vmax.f32 %v8342_v33, %v1717_v51  ;;  %v1798_v47 = vmax.f32 %v8349_v28, %v1718_v26  ;;  %v1799_v17 = vmax.f32 %v1315_v55, %v1719_v10  ;;  %v10508_v10 = vld [vmem:[#allocation76_spill] sm:$0xff] }
 0x2ac   : > { %10502 = vst [vmem:[#allocation101_spill] sm:$0xff] %v8410_v30  ;;  %v3219_v25 = vmax.f32 %v3195_v52, %v8410_v30  ;;  %v1970_v22 = vsel %vm1893_vm5, %v1889_v23, %v1829_v14  ;;  %v1990_v21 = vrot.slane %v8342_v33, 2  ;;  %v2010_v2 = vrot.slane %v8349_v28, 2  ;;  %v10506_v14 = vld [vmem:[#allocation74_spill] sm:$0xff] }
 0x2ad   : > { %10504 = vst [vmem:[#allocation106_spill] sm:$0xff] %v8422_v19  ;;  %v3220_v52 = vmax.f32 %v3196_v60, %v8422_v19  ;;  %v2030_v27 = vrot.slane %v1315_v55, 2  ;;  %v2050_v56 = vrot.slane %v8360_v4, 2  ;;  %v1428_v57 = vsel %vm1411_vm3, %v1385_v48, %v1405_v5 }
 0x2ae   : > { %3433 = vrot.lane.b32.xlu0 %v3219_v25, %s4280_s12  ;;  %v1649_v13 = vsel %vm1572_vm4, %v1568_v37, %v1508_v29  ;;  %v1910_v33 = vsel %vm1893_vm5, %v1869_v34, %v1889_v23  ;;  %v2370_v50 = vrot.slane %v10505_v61, 6  ;;  %v2111_v55 = vsel %vm2054_vm6, %v1990_v21, %v2010_v2  ;;  %v8459_v34 = vpop.permute.xlu1 %3273  ;;  %v10509_v25 = vld [vmem:[#allocation124_spill] sm:$0xff] }
 0x2af   : > { %3435 = vrot.lane.b32.xlu1 %v3220_v52, %s4280_s12  ;;  %v2071_v60 = vsel %vm2054_vm6, %v2030_v27, %v2050_v56  ;;  %v2091_v28 = vsel %vm2054_vm6, %v2010_v2, %v2030_v27  ;;  %v1720_v48 = vmax.f32 %v1428_v57, %v1649_v13  ;;  %v2199_v5 = vmax.f32 %v1970_v22, %v2111_v55  ;;  %v10511_v52 = vld [vmem:[#allocation78_spill] sm:$0xff]  ;;  %v10512_v55 = vld [vmem:[#allocation88_spill] sm:$0xff] }
 0x2b0   : > { %v2200_v8 = vmax.f32 %v1950_v31, %v2091_v28  ;;  %v2201_v29 = vmax.f32 %v1930_v54, %v2071_v60  ;;  %v2131_v43 = vsel %vm2054_vm6, %v2050_v56, %v1990_v21  ;;  %v10507_v24 = vrot.slane %v10506_v14, 6  ;;  %v8468_v54 = vpop.permute.xlu0 %3275  ;;  %3317 = vst.msk [vmem:[#allocation3 + $0x28] sm:$0xff] %vm3311_vm2, %v8459_v34 }
 0x2b1   : > { %v1800_v44 = vmax.f32 %v8360_v4, %v1720_v48  ;;  %v2202_v37 = vmax.f32 %v1910_v33, %v2131_v43  ;;  %v2470_v6 = vrot.slane %v10506_v14, 2  ;;  %v8461_v35 = vmax.f32 %v1797_v39, %v2199_v5  ;;  %v10513_v5 = vld [vmem:[#allocation91_spill] sm:$0xff]  ;;  %3318 = vst.msk [vmem:[#allocation3 + $0x30] sm:$0xff] %vm3311_vm2, %v8468_v54 }
 0x2b2   : > { %v2450_v38 = vsel %vm1893_vm5, %v2370_v50, %v10507_v24  ;;  %v8463_v51 = vmax.f32 %v1798_v47, %v2200_v8  ;;  %v8465_v26 = vmax.f32 %v1799_v17, %v2201_v29  ;;  %v2730_v23 = vrot.slane %v10508_v10, 6  ;;  %v8508_v14 = vpop.permute.xlu1 %3277 }
 0x2b3   : > { %v8470_v4 = vmax.f32 %v1800_v44, %v2202_v37  ;;  %v10510_v31 = vrot.slane %v10509_v25, 2  ;;  %v2810_v21 = vrot.slane %v10508_v10, 2  ;;  %v2830_v39 = vrot.slane %v10511_v52, 2  ;;  %3319 = vst.msk [vmem:[#allocation3 + $0x38] sm:$0xff] %vm3311_vm2, %v8508_v14 }
 0x2b4   : > { %v9615_v47 = vrot.slane %v8461_v35, 6  ;;  %v2331_v17 = vrot.slane %v8463_v51, 6  ;;  %v9614_v2 = vrot.slane %v8463_v51, 2  ;;  %v2511_v27 = vrot.slane %v8465_v26, 2 }
 0x2b5   : > { %v2590_v22 = vsel %vm2054_vm6, %v2470_v6, %v10510_v31  ;;  %v9613_v56 = vrot.slane %v8465_v26, 6  ;;  %v9612_v57 = vrot.slane %v8470_v4, 2  ;;  %v2890_v33 = vsel %vm2054_vm6, %v2810_v21, %v2830_v39  ;;  %v8522_v21 = vld [vmem:[#allocation2 + $0x220] sm:$0xff] }
 0x2b6   : > { %v2675_v13 = vmax.f32 %v2450_v38, %v2590_v22  ;;  %v2431_v60 = vsel %vm1893_vm5, %v9615_v47, %v2331_v17  ;;  %v2571_v28 = vsel %vm2054_vm6, %v9614_v2, %v2511_v27  ;;  %v3165_v48 = vmax.f32 %v8305_v40, %v10512_v55  ;;  %v8531_v55 = vld [vmem:[#allocation2 + $0x228] sm:$0xff] }
 0x2b7   : > { %v3173_v8 = vmax.f32 %v8313_v45, %v10513_v5  ;;  %v8498_v29 = vmax.f32 %v2431_v60, %v2571_v28  ;;  %v2411_v43 = vsel %vm1893_vm5, %v2331_v17, %v9613_v56  ;;  %v2551_v44 = vsel %vm2054_vm6, %v2511_v27, %v9612_v57  ;;  %v10514_v45 = vld [vmem:[#allocation25_spill] sm:$0xff]  ;;  %v8524_v17 = vpop.permute.xlu0 %3279  ;;  %v8543_v5 = vld [vmem:[#allocation2 + $0x238] sm:$0xff] }
 0x2b8   : > { %v2710_v37 = vrot.slane %v2675_v13, 6  ;;  %v8510_v24 = vmax.f32 %v2411_v43, %v2551_v44  ;;  %v10515_v38 = vrot.slane %v10514_v45, 6  ;;  %v10516_v31 = vrot.slane %v10505_v61, 2  ;;  %v10517_v43 = vld [vmem:[#allocation61_spill] sm:$0xff]  ;;  %3320 = vst.msk [vmem:[#allocation3 + $0x40] sm:$0xff] %vm3311_vm2, %v8524_v17 }
 0x2b9   : > { %v8512_v40 = vmax.f32 %v3165_v48, %v3173_v8  ;;  %v3017_v27 = vmax.f32 %v10508_v10, %v8498_v29  ;;  %v2750_v28 = vrot.slane %v10511_v52, 6  ;;  %v3174_v48 = vmax.f32 %v8340_v11, %v8229_v7  ;;  %v8541_v10 = vld [vmem:[#allocation2 + $0x230] sm:$0xff]  ;;  %v10519_v11 = vld [vmem:[#allocation36_spill] sm:$0xff] }
 0x2ba   : > { %v2390_v25 = vsel %vm1893_vm5, %v10515_v38, %v2370_v50  ;;  %v2610_v22 = vsel %vm2054_vm6, %v10516_v31, %v2470_v6  ;;  %v2790_v13 = vsel %vm1893_vm5, %v2710_v37, %v2730_v23  ;;  %v3018_v61 = vmax.f32 %v10511_v52, %v8510_v24 }
 0x2bb   : > { %v2678_v60 = vmax.f32 %v2390_v25, %v2610_v22  ;;  %v8535_v50 = vmax.f32 %v2790_v13, %v2890_v33  ;;  %v3166_v6 = vmax.f32 %v8336_v16, %v8224_v36  ;;  %v8546_v44 = vmax.f32 %v10517_v43, %v3017_v27  ;;  %v10518_v33 = vld [vmem:[#allocation108_spill] sm:$0xff]  ;;  %v8565_v27 = vpop.permute.xlu1 %3281  ;;  %v10520_v13 = vld [vmem:[#allocation43_spill] sm:$0xff] }
 0x2bc   : > { %v2770_v37 = vsel %vm1893_vm5, %v2730_v23, %v2750_v28  ;;  %v1346_v52 = vrot.slane %v8522_v21, 7  ;;  %v8552_v38 = vmax.f32 %v10518_v33, %v3018_v61  ;;  %v1366_v16 = vrot.slane %v8531_v55, 7  ;;  %3321 = vst.msk [vmem:[#allocation3 + $0x48] sm:$0xff] %vm3311_vm2, %v8565_v27 }
 0x2bd   : > { %v2850_v45 = vrot.slane %v2678_v60, 2  ;;  %v8556_v36 = vmax.f32 %v8354_v41, %v8535_v50  ;;  %v3198_v7 = vmax.f32 %v3166_v6, %v3174_v48  ;;  %v3067_v25 = vmax.f32 %v10519_v11, %v8546_v44  ;;  %v8577_v6 = vpop.permute.xlu0 %3283 }
 0x2be   : > { %v1386_v23 = vrot.slane %v8541_v10, 7  ;;  %v1406_v22 = vrot.slane %v8543_v5, 7  ;;  %v3068_v60 = vmax.f32 %v10520_v13, %v8552_v38  ;;  %v1469_v61 = vsel %vm1411_vm3, %v1346_v52, %v1366_v16  ;;  %v10522_v13 = vld [vmem:[#allocation79_spill] sm:$0xff]  ;;  %3322 = vst.msk [vmem:[#allocation3 + $0x50] sm:$0xff] %vm3311_vm2, %v8577_v6 }
 0x2bf   : > { %v2870_v31 = vsel %vm2054_vm6, %v2830_v39, %v2850_v45  ;;  %v8571_v41 = vmax.f32 %v8290_v12, %v8556_v36  ;;  %v10521_v39 = vld [vmem:[#allocation77_spill] sm:$0xff]  ;;  %v1509_v11 = vrot.slane %v8522_v21, 1 }
 0x2c0   : > { %v8573_v28 = vmax.f32 %v2770_v37, %v2870_v31  ;;  %v3083_v43 = vmax.f32 %v10521_v39, %v3067_v25  ;;  %v1449_v45 = vsel %vm1411_vm3, %v1366_v16, %v1386_v23  ;;  %v1489_v33 = vsel %vm1411_vm3, %v1406_v22, %v1346_v52 }
 0x2c1   : > { %v3084_v12 = vmax.f32 %v10522_v13, %v3068_v60  ;;  %v8588_v37 = vmax.f32 %v8382_v58, %v8571_v41  ;;  %v1529_v25 = vrot.slane %v8531_v55, 1  ;;  %v1549_v16 = vrot.slane %v8541_v10, 1  ;;  %v8624_v3 = vpop.permute.xlu0 %3287 }
 0x2c2   : > { %v8592_v31 = vmax.f32 %v8373_v42, %v8573_v28  ;;  %3368 = vrot.lane.b32.xlu0 %v3083_v43, %s4279_s11  ;;  %v1569_v52 = vrot.slane %v8543_v5, 1  ;;  %v1830_v39 = vrot.slane %v8522_v21, 6  ;;  %v1850_v60 = vrot.slane %v8531_v55, 6  ;;  %3324 = vst.msk [vmem:[#allocation3 + $0x60] sm:$0xff] %vm3311_vm2, %v8624_v3 }
 0x2c3   : > { %10523 = vst [vmem:[#allocation104_spill] sm:$0xff] %v8588_v37  ;;  %3370 = vrot.lane.b32.xlu1 %v3084_v12, %s4279_s11  ;;  %v8602_v58 = vmax.f32 %v3173_v8, %v8588_v37  ;;  %v1630_v43 = vsel %vm1572_vm4, %v1509_v11, %v1529_v25  ;;  %v1870_v13 = vrot.slane %v8541_v10, 6  ;;  %v1610_v56 = vsel %vm1572_vm4, %v1529_v25, %v1549_v16  ;;  %v8616_v8 = vpop.permute.xlu1 %3285 }
 0x2c4   : > { %v8606_v42 = vmax.f32 %v8316_v1, %v8592_v31  ;;  %v1590_v57 = vsel %vm1572_vm4, %v1549_v16, %v1569_v52  ;;  %v1721_v2 = vmax.f32 %v1489_v33, %v1630_v43  ;;  %v1890_v12 = vrot.slane %v8543_v5, 6  ;;  %3323 = vst.msk [vmem:[#allocation3 + $0x58] sm:$0xff] %vm3311_vm2, %v8616_v8  ;;  %v10540_v8 = vld [vmem:[#allocation101_spill] sm:$0xff] }
 0x2c5   : > { %10524 = vst [vmem:[#allocation114_spill] sm:$0xff] %v8602_v58  ;;  %v3221_v1 = vmax.f32 %v8512_v40, %v8602_v58  ;;  %v1722_v37 = vmax.f32 %v1469_v61, %v1610_v56  ;;  %v1723_v19 = vmax.f32 %v1449_v45, %v1590_v57  ;;  %v1931_v33 = vsel %vm1893_vm5, %v1850_v60, %v1870_v13 }
 0x2c6   : > { %v8622_v47 = vmax.f32 %v8400_v63, %v8606_v42  ;;  %v1801_v30 = vmax.f32 %v8522_v21, %v1721_v2  ;;  %v1951_v25 = vsel %vm1893_vm5, %v1830_v39, %v1850_v60  ;;  %v1971_v16 = vsel %vm1893_vm5, %v1890_v12, %v1830_v39 }
 0x2c7   : > { %3437 = vrot.lane.b32.xlu0 %v3221_v1, %s4280_s12  ;;  %v1802_v56 = vmax.f32 %v8531_v55, %v1722_v37  ;;  %v1803_v57 = vmax.f32 %v8541_v10, %v1723_v19  ;;  %v1991_v2 = vrot.slane %v8522_v21, 2  ;;  %v2011_v40 = vrot.slane %v8531_v55, 2 }
 0x2c8   : > { %10525 = vst [vmem:[#allocation115_spill] sm:$0xff] %v8622_v47  ;;  %v8635_v63 = vmax.f32 %v3174_v48, %v8622_v47  ;;  %v2031_v61 = vrot.slane %v8541_v10, 2  ;;  %v2051_v45 = vrot.slane %v8543_v5, 2  ;;  %v1429_v39 = vsel %vm1411_vm3, %v1386_v23, %v1406_v22  ;;  %v8657_v22 = vpop.permute.xlu1 %3289 }
 0x2c9   : > { %v1650_v48 = vsel %vm1572_vm4, %v1569_v52, %v1509_v11  ;;  %v1911_v37 = vsel %vm1893_vm5, %v1870_v13, %v1890_v12  ;;  %v2371_v19 = vrot.slane %v8470_v4, 6  ;;  %v2112_v10 = vsel %vm2054_vm6, %v1991_v2, %v2011_v40  ;;  %v8662_v13 = vpop.permute.xlu0 %3263  ;;  %3325 = vst.msk [vmem:[#allocation3 + $0x68] sm:$0xff] %vm3311_vm2, %v8657_v22 }
 0x2ca   : > { %10526 = vst [vmem:[#allocation89_spill] sm:$0xff] %v8635_v63  ;;  %v3222_v60 = vmax.f32 %v3198_v7, %v8635_v63  ;;  %v2072_v21 = vsel %vm2054_vm6, %v2031_v61, %v2051_v45  ;;  %v2092_v55 = vsel %vm2054_vm6, %v2011_v40, %v2031_v61  ;;  %v1724_v23 = vmax.f32 %v1429_v39, %v1650_v48 }
 0x2cb   : > { %v2203_v7 = vmax.f32 %v1971_v16, %v2112_v10  ;;  %v2204_v11 = vmax.f32 %v1951_v25, %v2092_v55  ;;  %v2205_v52 = vmax.f32 %v1931_v33, %v2072_v21  ;;  %v2132_v43 = vsel %vm2054_vm6, %v2051_v45, %v1991_v2  ;;  %3312 = vst.msk [vmem:[#allocation3] sm:$0xff] %vm3311_vm2, %v8662_v13 }
 0x2cc   : > { %3439 = vrot.lane.b32.xlu1 %v3222_v60, %s4280_s12  ;;  %v1804_v12 = vmax.f32 %v8543_v5, %v1724_v23  ;;  %v2206_v1 = vmax.f32 %v1911_v37, %v2132_v43  ;;  %v10527_v61 = vrot.slane %v8461_v35, 6  ;;  %v2471_v39 = vrot.slane %v8461_v35, 2 }
 0x2cd   : > { %v2283_v48 = vmax.f32 %v1801_v30, %v2203_v7  ;;  %v2284_v60 = vmax.f32 %v1802_v56, %v2204_v11  ;;  %v2285_v16 = vmax.f32 %v1803_v57, %v2205_v52  ;;  %v2731_v33 = vrot.slane %v8498_v29, 6  ;;  %v8677_v7 = vpop.permute.xlu1 %3269 }
 0x2ce   : > { %v2451_v40 = vsel %vm1893_vm5, %v2371_v19, %v10527_v61  ;;  %v2286_v25 = vmax.f32 %v1804_v12, %v2206_v1  ;;  %v10528_v2 = vrot.slane %v8463_v51, 2  ;;  %v2811_v5 = vrot.slane %v8498_v29, 2  ;;  %v8687_v1 = vpop.permute.xlu0 %3265  ;;  %3315 = vst.msk [vmem:[#allocation3 + $0x18] sm:$0xff] %vm3311_vm2, %v8677_v7 }
 0x2cf   : > { %v2831_v37 = vrot.slane %v8510_v24, 2  ;;  %v2312_v21 = vrot.slane %v2283_v48, 6  ;;  %v2332_v55 = vrot.slane %v2284_v60, 6  ;;  %v2472_v10 = vrot.slane %v2283_v48, 2  ;;  %3313 = vst.msk [vmem:[#allocation3 + $0x8] sm:$0xff] %vm3311_vm2, %v8687_v1 }
 0x2d0   : > { %v2591_v45 = vsel %vm2054_vm6, %v2471_v39, %v10528_v2  ;;  %v2492_v23 = vrot.slane %v2284_v60, 2  ;;  %v2512_v35 = vrot.slane %v2285_v16, 2  ;;  %v2352_v30 = vrot.slane %v2285_v16, 6 }
 0x2d1   : > { %v2372_v56 = vrot.slane %v2286_v25, 6  ;;  %v2532_v57 = vrot.slane %v2286_v25, 2  ;;  %v2432_v51 = vsel %vm1893_vm5, %v2312_v21, %v2332_v55  ;;  %v2679_v11 = vmax.f32 %v2451_v40, %v2591_v45 }
 0x2d2   : > { %v2891_v52 = vsel %vm2054_vm6, %v2811_v5, %v2831_v37  ;;  %v10529_v43 = vrot.slane %v8465_v26, 6  ;;  %v2572_v61 = vsel %vm2054_vm6, %v2492_v23, %v2512_v35  ;;  %v2412_v48 = vsel %vm1893_vm5, %v2332_v55, %v2352_v30 }
 0x2d3   : > { %v2552_v60 = vsel %vm2054_vm6, %v2512_v35, %v2532_v57  ;;  %v10530_v40 = vrot.slane %v8470_v4, 2  ;;  %v2684_v26 = vmax.f32 %v2432_v51, %v2572_v61  ;;  %v2711_v2 = vrot.slane %v2679_v11, 6  ;;  %v8712_v61 = vpop.permute.xlu1 %3293 }
 0x2d4   : > { %v2391_v12 = vsel %vm1893_vm5, %v10529_v43, %v2371_v19  ;;  %v2685_v25 = vmax.f32 %v2412_v48, %v2552_v60  ;;  %v2751_v45 = vrot.slane %v8510_v24, 6  ;;  %v2452_v5 = vsel %vm1893_vm5, %v2372_v56, %v2312_v21  ;;  %3327 = vst.msk [vmem:[#allocation3 + $0x78] sm:$0xff] %vm3311_vm2, %v8712_v61  ;;  %v10542_v61 = vld [vmem:[#allocation102_spill] sm:$0xff] }
 0x2d5   : > { %v2611_v16 = vsel %vm2054_vm6, %v10530_v40, %v2471_v39  ;;  %v2592_v55 = vsel %vm2054_vm6, %v2472_v10, %v2492_v23  ;;  %v2392_v35 = vsel %vm1893_vm5, %v2352_v30, %v2372_v56  ;;  %v2732_v43 = vrot.slane %v2684_v26, 6  ;;  %v10531_v23 = vld [vmem:[#allocation31_spill] sm:$0xff]  ;;  %v8715_v40 = vld [vmem:[#allocation2 + $0x240] sm:$0xff] }
 0x2d6   : > { %v2682_v19 = vmax.f32 %v2391_v12, %v2611_v16  ;;  %v2812_v4 = vrot.slane %v2684_v26, 2  ;;  %v3019_v63 = vmax.f32 %v8498_v29, %v2684_v26  ;;  %v2752_v39 = vrot.slane %v2685_v25, 6  ;;  %v8717_v29 = vpop.permute.xlu0 %3267  ;;  %v10532_v16 = vld [vmem:[#allocation27_spill] sm:$0xff] }
 0x2d7   : > { %v2832_v51 = vrot.slane %v2685_v25, 2  ;;  %v3020_v11 = vmax.f32 %v8510_v24, %v2685_v25  ;;  %v2791_v12 = vsel %vm1893_vm5, %v2711_v2, %v2731_v33  ;;  %v2771_v21 = vsel %vm1893_vm5, %v2731_v33, %v2751_v45  ;;  %v8726_v2 = vld [vmem:[#allocation2 + $0x248] sm:$0xff]  ;;  %3314 = vst.msk [vmem:[#allocation3 + $0x10] sm:$0xff] %vm3311_vm2, %v8717_v29 }
 0x2d8   : > { %v3045_v48 = vmax.f32 %v10531_v23, %v3019_v63  ;;  %v2927_v60 = vmax.f32 %v2791_v12, %v2891_v52  ;;  %v2851_v30 = vrot.slane %v2682_v19, 2  ;;  %v2683_v56 = vmax.f32 %v2452_v5, %v2592_v55  ;;  %v10534_v23 = vld [vmem:[#allocation41_spill] sm:$0xff] }
 0x2d9   : > { %v3046_v26 = vmax.f32 %v10532_v16, %v3020_v11  ;;  %v2892_v24 = vsel %vm2054_vm6, %v2812_v4, %v2832_v51  ;;  %v2612_v25 = vsel %vm2054_vm6, %v2532_v57, %v2472_v10  ;;  %v2772_v33 = vsel %vm1893_vm5, %v2732_v43, %v2752_v39  ;;  %v8735_v11 = vld [vmem:[#allocation2 + $0x250] sm:$0xff]  ;;  %v8737_v10 = vld [vmem:[#allocation2 + $0x258] sm:$0xff] }
 0x2da   : > { %v3069_v63 = vmax.f32 %v8546_v44, %v3045_v48  ;;  %v8730_v52 = vmax.f32 %v8535_v50, %v2927_v60  ;;  %v2871_v19 = vsel %vm2054_vm6, %v2831_v37, %v2851_v30  ;;  %v2712_v45 = vrot.slane %v2683_v56, 6  ;;  %v10533_v39 = vld [vmem:[#allocation35_spill] sm:$0xff]  ;;  %v8752_v30 = vpop.permute.xlu1 %3362 }
 0x2db   : > { %v3070_v5 = vmax.f32 %v8552_v38, %v3046_v26  ;;  %v2928_v55 = vmax.f32 %v2771_v21, %v2871_v19  ;;  %v2686_v4 = vmax.f32 %v2392_v35, %v2612_v25  ;;  %v1347_v57 = vrot.slane %v8715_v40, 7  ;;  %v8760_v26 = vpop.permute.xlu0 %3291 }
 0x2dc   : > { %v3085_v12 = vmax.f32 %v10533_v39, %v3069_v63  ;;  %v3151_v50 = vmax.f32 %v8371_v18, %v8730_v52  ;;  %v2792_v44 = vsel %vm1893_vm5, %v2712_v45, %v2732_v43  ;;  %v1367_v37 = vrot.slane %v8726_v2, 7  ;;  %v10536_v63 = vld [vmem:[#allocation103_spill] sm:$0xff]  ;;  %3326 = vst.msk [vmem:[#allocation3 + $0x70] sm:$0xff] %vm3311_vm2, %v8760_v26 }
 0x2dd   : > { %v3086_v38 = vmax.f32 %v10534_v23, %v3070_v5  ;;  %v8748_v35 = vmax.f32 %v8573_v28, %v2928_v55  ;;  %v8750_v21 = vmax.f32 %v2792_v44, %v2892_v24  ;;  %v2852_v48 = vrot.slane %v2686_v4, 2 }
 0x2de   : > { %3372 = vrot.lane.b32.xlu0 %v3085_v12, %s4279_s11  ;;  %v3183_v56 = vmax.f32 %v8571_v41, %v3151_v50  ;;  %v1387_v18 = vrot.slane %v8735_v11, 7  ;;  %v1407_v43 = vrot.slane %v8737_v10, 7  ;;  %v1470_v16 = vsel %vm1411_vm3, %v1347_v57, %v1367_v37  ;;  %v10537_v12 = vld [vmem:[#allocation110_spill] sm:$0xff] }
 0x2df   : > { %3374 = vrot.lane.b32.xlu1 %v3086_v38, %s4279_s11  ;;  %v3152_v28 = vmax.f32 %v8385_v9, %v8748_v35  ;;  %v8766_v24 = vmax.f32 %v2927_v60, %v8750_v21  ;;  %v2872_v41 = vsel %vm2054_vm6, %v2832_v51, %v2852_v48  ;;  %v1510_v25 = vrot.slane %v8715_v40, 1  ;;  %v8797_v48 = vpop.permute.xlu1 %3344 }
 0x2e0   : > { %v3207_v19 = vmax.f32 %v10536_v63, %v3183_v56  ;;  %v8772_v45 = vmax.f32 %v2772_v33, %v2872_v41  ;;  %v1430_v5 = vsel %vm1411_vm3, %v1387_v18, %v1407_v43  ;;  %v1450_v4 = vsel %vm1411_vm3, %v1367_v37, %v1387_v18  ;;  %v8810_v18 = vpop.permute.xlu0 %3360 }
 0x2e1   : > { %10535 = vst [vmem:[#allocation109_spill] sm:$0xff] %v8766_v24  ;;  %v3184_v9 = vmax.f32 %v8606_v42, %v3152_v28  ;;  %v8781_v60 = vmax.f32 %v8556_v36, %v8766_v24  ;;  %v1490_v51 = vsel %vm1411_vm3, %v1407_v43, %v1347_v57  ;;  %v1530_v39 = vrot.slane %v8726_v2, 1 }
 0x2e2   : > { %v3223_v33 = vmax.f32 %v10537_v12, %v3207_v19  ;;  %v8788_v44 = vmax.f32 %v2928_v55, %v8772_v45  ;;  %v1550_v23 = vrot.slane %v8735_v11, 1  ;;  %v1570_v37 = vrot.slane %v8737_v10, 1 }
 0x2e3   : > { %v3208_v42 = vmax.f32 %v8251_v0, %v3184_v9  ;;  %v3185_v38 = vmax.f32 %v3151_v50, %v8781_v60  ;;  %v1631_v36 = vsel %vm1572_vm4, %v1510_v25, %v1530_v39  ;;  %v1831_v57 = vrot.slane %v8715_v40, 6 }
 0x2e4   : > { %10538 = vst [vmem:[#allocation111_spill] sm:$0xff] %v8788_v44  ;;  %3441 = vrot.lane.b32.xlu0 %v3223_v33, %s4280_s12  ;;  %v8802_v55 = vmax.f32 %v8592_v31, %v8788_v44  ;;  %v1591_v56 = vsel %vm1572_vm4, %v1550_v23, %v1570_v37  ;;  %v1611_v0 = vsel %vm1572_vm4, %v1530_v39, %v1550_v23  ;;  %v1851_v33 = vrot.slane %v8726_v2, 6 }
 0x2e5   : > { %v1651_v50 = vsel %vm1572_vm4, %v1570_v37, %v1510_v25  ;;  %v3224_v43 = vmax.f32 %v8268_v32, %v3208_v42  ;;  %v3209_v41 = vmax.f32 %v8328_v53, %v3185_v38  ;;  %v1725_v63 = vmax.f32 %v1490_v51, %v1631_v36  ;;  %v8827_v51 = vld [vmem:[#allocation2 + $0x268] sm:$0xff]  ;;  %v8836_v38 = vld [vmem:[#allocation2 + $0x270] sm:$0xff]  ;;  %v8838_v36 = vld [vmem:[#allocation2 + $0x278] sm:$0xff] }
 0x2e6   : > { %v1726_v19 = vmax.f32 %v1470_v16, %v1611_v0  ;;  %v3186_v31 = vmax.f32 %v3152_v28, %v8802_v55  ;;  %v1727_v9 = vmax.f32 %v1450_v4, %v1591_v56  ;;  %v1728_v12 = vmax.f32 %v1430_v5, %v1651_v50  ;;  %v8825_v4 = vld [vmem:[#allocation2 + $0x260] sm:$0xff]  ;;  %v8840_v56 = vpop.permute.xlu1 %3346 }
 0x2e7   : > { %3443 = vrot.lane.b32.xlu1 %v3224_v43, %s4280_s12  ;;  %v3225_v39 = vmax.f32 %v8345_v20, %v3209_v41  ;;  %v1805_v25 = vmax.f32 %v8715_v40, %v1725_v63  ;;  %v1871_v32 = vrot.slane %v8735_v11, 6  ;;  %v1891_v5 = vrot.slane %v8737_v10, 6  ;;  %v8848_v63 = vpop.permute.xlu0 %3348 }
 0x2e8   : > { %v1806_v23 = vmax.f32 %v8726_v2, %v1726_v19  ;;  %v3210_v53 = vmax.f32 %v8352_v62, %v3186_v31  ;;  %v1807_v16 = vmax.f32 %v8735_v11, %v1727_v9  ;;  %v1808_v28 = vmax.f32 %v8737_v10, %v1728_v12 }
 0x2e9   : > { %3445 = vrot.lane.b32.xlu0 %v3225_v39, %s4280_s12  ;;  %v1932_v20 = vsel %vm1893_vm5, %v1851_v33, %v1871_v32  ;;  %v1952_v37 = vsel %vm1893_vm5, %v1831_v57, %v1851_v33  ;;  %v1992_v62 = vrot.slane %v8715_v40, 2  ;;  %v2012_v42 = vrot.slane %v8726_v2, 2 }
 0x2ea   : > { %v3226_v0 = vmax.f32 %v8368_v59, %v3210_v53  ;;  %v1912_v50 = vsel %vm1893_vm5, %v1871_v32, %v1891_v5  ;;  %v1972_v43 = vsel %vm1893_vm5, %v1891_v5, %v1831_v57  ;;  %v2032_v41 = vrot.slane %v8735_v11, 2 }
 0x2eb   : > { %v2052_v40 = vrot.slane %v8737_v10, 2  ;;  %v2113_v2 = vsel %vm2054_vm6, %v1992_v62, %v2012_v42  ;;  %v1348_v19 = vrot.slane %v8825_v4, 7  ;;  %v1368_v31 = vrot.slane %v8827_v51, 7 }
 0x2ec   : > { %3447 = vrot.lane.b32.xlu1 %v3226_v0, %s4280_s12  ;;  %v2093_v59 = vsel %vm2054_vm6, %v2012_v42, %v2032_v41  ;;  %v2207_v9 = vmax.f32 %v1972_v43, %v2113_v2  ;;  %v1388_v57 = vrot.slane %v8836_v38, 7  ;;  %v1408_v11 = vrot.slane %v8838_v36, 7 }
 0x2ed   : > { %v2073_v10 = vsel %vm2054_vm6, %v2032_v41, %v2052_v40  ;;  %v2133_v12 = vsel %vm2054_vm6, %v2052_v40, %v1992_v62  ;;  %v2208_v33 = vmax.f32 %v1952_v37, %v2093_v59  ;;  %v1471_v39 = vsel %vm1411_vm3, %v1348_v19, %v1368_v31  ;;  %v8873_v62 = vpop.permute.xlu1 %3350 }
 0x2ee   : > { %v2209_v32 = vmax.f32 %v1932_v20, %v2073_v10  ;;  %v2210_v53 = vmax.f32 %v1912_v50, %v2133_v12  ;;  %v2287_v5 = vmax.f32 %v1805_v25, %v2207_v9  ;;  %v1431_v42 = vsel %vm1411_vm3, %v1388_v57, %v1408_v11  ;;  %v8875_v50 = vpop.permute.xlu0 %3352 }
 0x2ef   : > { %v2288_v0 = vmax.f32 %v1806_v23, %v2208_v33  ;;  %v1451_v43 = vsel %vm1411_vm3, %v1368_v31, %v1388_v57  ;;  %v1491_v41 = vsel %vm1411_vm3, %v1408_v11, %v1348_v19  ;;  %v1511_v2 = vrot.slane %v8825_v4, 1 }
 0x2f0   : > { %v2289_v37 = vmax.f32 %v1807_v16, %v2209_v32  ;;  %v2290_v40 = vmax.f32 %v1808_v28, %v2210_v53  ;;  %v2313_v59 = vrot.slane %v2287_v5, 6  ;;  %v2473_v20 = vrot.slane %v2287_v5, 2 }
 0x2f1   : > { %v2333_v25 = vrot.slane %v2288_v0, 6  ;;  %v2493_v9 = vrot.slane %v2288_v0, 2  ;;  %v1531_v23 = vrot.slane %v8827_v51, 1  ;;  %v1551_v10 = vrot.slane %v8836_v38, 1  ;;  %v8896_v44 = vpop.permute.xlu1 %3354 }
 0x2f2   : > { %v2353_v31 = vrot.slane %v2289_v37, 6  ;;  %v2373_v57 = vrot.slane %v2290_v40, 6  ;;  %v2513_v12 = vrot.slane %v2289_v37, 2  ;;  %v2533_v19 = vrot.slane %v2290_v40, 2  ;;  %10539 = vst [vmem:[#allocation113_spill] sm:$0xff] %v8896_v44 }
 0x2f3   : > { %v2433_v11 = vsel %vm1893_vm5, %v2313_v59, %v2333_v25  ;;  %v2593_v16 = vsel %vm2054_vm6, %v2473_v20, %v2493_v9  ;;  %v1571_v28 = vrot.slane %v8838_v36, 1  ;;  %v1612_v33 = vsel %vm1572_vm4, %v1531_v23, %v1551_v10 }
 0x2f4   : > { %v2413_v32 = vsel %vm1893_vm5, %v2333_v25, %v2353_v31  ;;  %v2453_v53 = vsel %vm1893_vm5, %v2373_v57, %v2313_v59  ;;  %v2553_v5 = vsel %vm2054_vm6, %v2513_v12, %v2533_v19  ;;  %v2573_v0 = vsel %vm2054_vm6, %v2493_v9, %v2513_v12  ;;  %v8906_v12 = vpop.permute.xlu0 %3356 }
 0x2f5   : > { %v2687_v37 = vmax.f32 %v2453_v53, %v2593_v16  ;;  %v2688_v40 = vmax.f32 %v2433_v11, %v2573_v0  ;;  %v2689_v58 = vmax.f32 %v2413_v32, %v2553_v5  ;;  %v2393_v47 = vsel %vm1893_vm5, %v2353_v31, %v2373_v57 }
 0x2f6   : > { %v2613_v25 = vsel %vm2054_vm6, %v2533_v19, %v2473_v20  ;;  %v1592_v59 = vsel %vm1572_vm4, %v1551_v10, %v1571_v28  ;;  %v1632_v24 = vsel %vm1572_vm4, %v1511_v2, %v1531_v23  ;;  %v1652_v9 = vsel %vm1572_vm4, %v1571_v28, %v1511_v2 }
 0x2f7   : > { %v2713_v11 = vrot.slane %v2687_v37, 6  ;;  %v2733_v16 = vrot.slane %v2688_v40, 6  ;;  %v2813_v32 = vrot.slane %v2688_v40, 2  ;;  %v2833_v31 = vrot.slane %v2689_v58, 2 }
 0x2f8   : > { %v2690_v57 = vmax.f32 %v2393_v47, %v2613_v25  ;;  %v2753_v53 = vrot.slane %v2689_v58, 6  ;;  %v1729_v5 = vmax.f32 %v1491_v41, %v1632_v24  ;;  %v1730_v0 = vmax.f32 %v1471_v39, %v1612_v33  ;;  %v8921_v41 = vpop.permute.xlu1 %3358  ;;  %v3365_v25 = vpop.permute.xlu0 %3364 }
 0x2f9   : > { %v2793_v20 = vsel %vm1893_vm5, %v2713_v11, %v2733_v16  ;;  %v2893_v10 = vsel %vm2054_vm6, %v2813_v32, %v2833_v31  ;;  %v1731_v23 = vmax.f32 %v1451_v43, %v1592_v59  ;;  %v1732_v19 = vmax.f32 %v1431_v42, %v1652_v9 }
 0x2fa   : > { %v8912_v44 = vmax.f32 %v2793_v20, %v2893_v10  ;;  %v2773_v2 = vsel %vm1893_vm5, %v2733_v16, %v2753_v53  ;;  %v2853_v28 = vrot.slane %v2690_v57, 2  ;;  %v1809_v37 = vmax.f32 %v8825_v4, %v1729_v5 }
 0x2fb   : > { %v1810_v47 = vmax.f32 %v8827_v51, %v1730_v0  ;;  %v1811_v58 = vmax.f32 %v8836_v38, %v1731_v23  ;;  %v1812_v24 = vmax.f32 %v8838_v36, %v1732_v19  ;;  %v1832_v39 = vrot.slane %v8825_v4, 6 }
 0x2fc   : > { %v3121_v42 = vmax.f32 %v8750_v21, %v8912_v44  ;;  %v2873_v43 = vsel %vm2054_vm6, %v2833_v31, %v2853_v28  ;;  %v1852_v33 = vrot.slane %v8827_v51, 6  ;;  %v1872_v40 = vrot.slane %v8836_v38, 6  ;;  %v3367_v3 = vpop.permute.xlu1 %3366  ;;  %v3426_v17 = vpop.permute.xlu0 %3425 }
 0x2fd   : > { %v8929_v59 = vmax.f32 %v2773_v2, %v2873_v43  ;;  %v1892_v9 = vrot.slane %v8838_v36, 6  ;;  %v1993_v11 = vrot.slane %v8825_v4, 2  ;;  %v2013_v16 = vrot.slane %v8827_v51, 2 }
 0x2fe   : > { %v8935_v32 = vmax.f32 %v8730_v52, %v3121_v42  ;;  %v1933_v21 = vsel %vm1893_vm5, %v1852_v33, %v1872_v40  ;;  %v1953_v31 = vsel %vm1893_vm5, %v1832_v39, %v1852_v33  ;;  %v2033_v57 = vrot.slane %v8836_v38, 2 }
 0x2ff   : > { %v3122_v53 = vmax.f32 %v8772_v45, %v8929_v59  ;;  %v1913_v5 = vsel %vm1893_vm5, %v1872_v40, %v1892_v9  ;;  %v1973_v4 = vsel %vm1893_vm5, %v1892_v9, %v1832_v39  ;;  %v2053_v52 = vrot.slane %v8838_v36, 2 }
 0x300   : > { %v3187_v51 = vmax.f32 %v8781_v60, %v8935_v32  ;;  %v2094_v0 = vsel %vm2054_vm6, %v2013_v16, %v2033_v57  ;;  %v2114_v38 = vsel %vm2054_vm6, %v1993_v11, %v2013_v16  ;;  %vm3392_vm3 = vcmask 48160  }
 0x301   : > { %v8956_v45 = vmax.f32 %v8748_v35, %v3122_v53  ;;  %v2074_v20 = vsel %vm2054_vm6, %v2033_v57, %v2053_v52  ;;  %v2134_v10 = vsel %vm2054_vm6, %v2053_v52, %v1993_v11  ;;  %v2211_v36 = vmax.f32 %v1973_v4, %v2114_v38  ;;  %3402 = vst.msk [vmem:[#allocation3 + $0x48] sm:$0xff] %vm3392_vm3, %v8752_v30  ;;  %v992_v4 = vld [vmem:[%s4423_s6 + $0x60] sm:$0xff]  ;;  %v993_v52 = vld [vmem:[%s4423_s6 + $0x68] sm:$0xff] }
 0x302   : > { %v3211_v46 = vmax.f32 %v8396_v15, %v3187_v51  ;;  %v2212_v34 = vmax.f32 %v1953_v31, %v2094_v0  ;;  %v2213_v54 = vmax.f32 %v1933_v21, %v2074_v20  ;;  %v2214_v14 = vmax.f32 %v1913_v5, %v2134_v10  ;;  %3393 = vst.msk [vmem:[#allocation3] sm:$0xff] %vm3392_vm3, %v8797_v48  ;;  %v10541_v15 = vld [vmem:[#allocation113_spill] sm:$0xff] }
 0x303   : > { %v3188_v27 = vmax.f32 %v8802_v55, %v8956_v45  ;;  %v2291_v6 = vmax.f32 %v1809_v37, %v2211_v36  ;;  %vm3473_vm4 = vcmask 64560   ;;  %3401 = vst.msk [vmem:[#allocation3 + $0x40] sm:$0xff] %vm3392_vm3, %v8810_v18  ;;  %3394 = vst.msk [vmem:[#allocation3 + $0x8] sm:$0xff] %vm3392_vm3, %v8840_v56  ;;  %v10543_v18 = vld [vmem:[#allocation106_spill] sm:$0xff]  ;;  %4139 = vmatprep.mubr.msk.f32.mxu0 %vm449_vm1, %v992_v4  ;;  %v10544_v20 = vld [vmem:[#allocation109_spill] sm:$0xff] }
 0x304   : > { %v3227_v22 = vmax.f32 %v10540_v8, %v3211_v46  ;;  %v2292_v13 = vmax.f32 %v1810_v47, %v2212_v34  ;;  %v2293_v7 = vmax.f32 %v1811_v58, %v2213_v54  ;;  %v2294_v1 = vmax.f32 %v1812_v24, %v2214_v14  ;;  %3395 = vst.msk [vmem:[#allocation3 + $0x10] sm:$0xff] %vm3392_vm3, %v8848_v63  ;;  %v10545_v36 = vld [vmem:[#allocation111_spill] sm:$0xff]  ;;  %v10546_v54 = vld [vmem:[#allocation104_spill] sm:$0xff] }
 0x305   : > { %3396 = vst.msk [vmem:[#allocation3 + $0x18] sm:$0xff] %vm3392_vm3, %v8873_v62  ;;  %3397 = vst.msk [vmem:[#allocation3 + $0x20] sm:$0xff] %vm3392_vm3, %v8875_v50  ;;  %v3212_v29 = vmax.f32 %v10542_v61, %v3188_v27  ;;  %v2314_v35 = vrot.slane %v2291_v6, 6  ;;  %v2474_v30 = vrot.slane %v2291_v6, 2  ;;  %4140 = vmatmul.mubr.msk.f32.gmra.mxu0 %vm449_vm1, %v993_v52  ;;  %v995_v27 = vld [vmem:[%s4423_s6 + $0x78] sm:$0xff] }
 0x306   : > { %3398 = vst.msk [vmem:[#allocation3 + $0x28] sm:$0xff] %vm3392_vm3, %v10541_v15  ;;  %3399 = vst.msk [vmem:[#allocation3 + $0x30] sm:$0xff] %vm3392_vm3, %v8906_v12  ;;  %3449 = vrot.lane.b32.xlu0 %v3227_v22, %s4280_s12  ;;  %v2334_v26 = vrot.slane %v2292_v13, 6  ;;  %v2354_v60 = vrot.slane %v2293_v7, 6  ;;  %v2374_v48 = vrot.slane %v2294_v1, 6  ;;  %v2494_v55 = vrot.slane %v2292_v13, 2 }
 0x307   : > { %3400 = vst.msk [vmem:[#allocation3 + $0x38] sm:$0xff] %vm3392_vm3, %v8921_v41  ;;  %3403 = vst.msk [vmem:[#allocation3 + $0x50] sm:$0xff] %vm3392_vm3, %v3365_v25  ;;  %v3228_v56 = vmax.f32 %v10543_v18, %v3212_v29  ;;  %v2514_v63 = vrot.slane %v2293_v7, 2  ;;  %v2534_v62 = vrot.slane %v2294_v1, 2 }
 0x308   : > { %3404 = vst.msk [vmem:[#allocation3 + $0x58] sm:$0xff] %vm3392_vm3, %v3367_v3  ;;  %v2414_v50 = vsel %vm1893_vm5, %v2334_v26, %v2354_v60  ;;  %v2434_v12 = vsel %vm1893_vm5, %v2314_v35, %v2334_v26  ;;  %v2454_v23 = vsel %vm1893_vm5, %v2374_v48, %v2314_v35  ;;  %v2594_v19 = vsel %vm2054_vm6, %v2474_v30, %v2494_v55 }
 0x309   : > { %3474 = vst.msk [vmem:[#allocation3] sm:$0xff] %vm3473_vm4, %v3426_v17  ;;  %3451 = vrot.lane.b32.xlu1 %v3228_v56, %s4280_s12  ;;  %v2554_v2 = vsel %vm2054_vm6, %v2514_v63, %v2534_v62  ;;  %v2574_v28 = vsel %vm2054_vm6, %v2494_v55, %v2514_v63  ;;  %v2691_v37 = vmax.f32 %v2454_v23, %v2594_v19  ;;  %v3428_v16 = vpop.permute.xlu1 %3427  ;;  %v994_v17 = vld [vmem:[%s4423_s6 + $0x70] sm:$0xff] }
 0x30a   : > { %v2394_v47 = vsel %vm1893_vm5, %v2354_v60, %v2374_v48  ;;  %v2692_v58 = vmax.f32 %v2434_v12, %v2574_v28  ;;  %v2693_v24 = vmax.f32 %v2414_v50, %v2554_v2  ;;  %v2614_v39 = vsel %vm2054_vm6, %v2534_v62, %v2474_v30  ;;  %3475 = vst.msk [vmem:[#allocation3 + $0x8] sm:$0xff] %vm3473_vm4, %v3428_v16 }
 0x30b   : > { %v2714_v41 = vrot.slane %v2691_v37, 6  ;;  %v2694_v42 = vmax.f32 %v2394_v47, %v2614_v39  ;;  %4142 = vmatprep.mubr.msk.f32.mxu0 %vm449_vm1, %v994_v17 }
 0x30c   : > { %v2734_v43 = vrot.slane %v2692_v58, 6  ;;  %v2814_v33 = vrot.slane %v2692_v58, 2  ;;  %v2834_v40 = vrot.slane %v2693_v24, 2  ;;  %v2754_v25 = vrot.slane %v2693_v24, 6  ;;  %4143 = vmatmul.mubr.msk.f32.gmra.mxu0 %vm449_vm1, %v995_v27 }
 0x30d   : > { %v2854_v11 = vrot.slane %v2694_v42, 2 }
 0x30e   : > { %v2794_v21 = vsel %vm1893_vm5, %v2714_v41, %v2734_v43  ;;  %v2894_v31 = vsel %vm2054_vm6, %v2814_v33, %v2834_v40  ;;  %v2774_v57 = vsel %vm1893_vm5, %v2734_v43, %v2754_v25 }
 0x30f   : > { %v2933_v53 = vmax.f32 %v2794_v21, %v2894_v31  ;;  %v2874_v5 = vsel %vm2054_vm6, %v2834_v40, %v2854_v11 }
 0x310   : > { %v3490_v9 = vld [vmem:[#allocation3] sm:$0xff]  ;;  %v2934_v51 = vmax.f32 %v2774_v57, %v2874_v5 }
 0x311   : > { %4147 = vmatprep.mubr.msk.f32.mxu1 %vm3507_vm15, %v3490_v9  ;;  %v3123_v0 = vmax.f32 %v8912_v44, %v2933_v53  ;;  %v3491_v46 = vld [vmem:[#allocation3 + $0x8] sm:$0xff]  ;;  %v10547_v44 = vld [vmem:[#allocation115_spill] sm:$0xff] }
 0x312   : > { %v3124_v38 = vmax.f32 %v8929_v59, %v2934_v51  ;;  %4148 = vmatmul.mubr.msk.f32.vlgmr.msra.gmra.mxu1 %vm3507_vm15, %v3491_v46  ;;  %v10548_v59 = vld [vmem:[#allocation114_spill] sm:$0xff] }
 0x313   : > { %v3157_v10 = vmax.f32 %v10544_v20, %v3123_v0 }
 0x314   : > { %v3158_v3 = vmax.f32 %v10545_v36, %v3124_v38 }
 0x315   : > { %v3189_v49 = vmax.f32 %v8935_v32, %v3157_v10  ;;  %v10549_v32 = vld [vmem:[#allocation89_spill] sm:$0xff] }
 0x316   : > { %v3190_v34 = vmax.f32 %v8956_v45, %v3158_v3  ;;  %v3430_v8 = vpop.permute.xlu0 %3429 }
 0x317   : > { %v3213_v14 = vmax.f32 %v10546_v54, %v3189_v49  ;;  %3476 = vst.msk [vmem:[#allocation3 + $0x10] sm:$0xff] %vm3473_vm4, %v3430_v8 }
 0x318   : > { %v3214_v6 = vmax.f32 %v10547_v44, %v3190_v34  ;;  %v3432_v45 = vpop.permute.xlu1 %3431 }
 0x319   : > { %v3229_v22 = vmax.f32 %v10548_v59, %v3213_v14  ;;  %3477 = vst.msk [vmem:[#allocation3 + $0x18] sm:$0xff] %vm3473_vm4, %v3432_v45 }
 0x31a   : > { %v3230_v13 = vmax.f32 %v10549_v32, %v3214_v6 }
 0x31b   : > { %3453 = vrot.lane.b32.xlu0 %v3229_v22, %s4280_s12 }
 0x31c   : > { %3455 = vrot.lane.b32.xlu1 %v3230_v13, %s4280_s12 }
 0x31e   : > { %v3492_v7 = vld [vmem:[#allocation3 + $0x10] sm:$0xff] }
 0x31f   : > { %4150 = vmatprep.mubr.msk.f32.mxu1 %vm3507_vm15, %v3492_v7 }
 0x320   : > { %v3434_v1 = vpop.permute.xlu0 %3433  ;;  %v3493_v61 = vld [vmem:[#allocation3 + $0x18] sm:$0xff] }
 0x321   : > { %3478 = vst.msk [vmem:[#allocation3 + $0x20] sm:$0xff] %vm3473_vm4, %v3434_v1  ;;  %v3436_v15 = vpop.permute.xlu1 %3435  ;;  %4151 = vmatmul.mubr.msk.f32.gmra.mxu1 %vm3507_vm15, %v3493_v61 }
 0x322   : > { %3479 = vst.msk [vmem:[#allocation3 + $0x28] sm:$0xff] %vm3473_vm4, %v3436_v15 }
 0x328   : > { %v3494_v29 = vld [vmem:[#allocation3 + $0x20] sm:$0xff] }
 0x329   : > { %4153 = vmatprep.mubr.msk.f32.mxu1 %vm3507_vm15, %v3494_v29  ;;  %v3495_v35 = vld [vmem:[#allocation3 + $0x28] sm:$0xff] }
 0x32a   : > { %4154 = vmatmul.mubr.msk.f32.gmra.mxu1 %vm3507_vm15, %v3495_v35 }
 0x334   : > { %v3369_v30 = vpop.permute.xlu0 %3368 }
 0x335   : > { %3405 = vst.msk [vmem:[#allocation3 + $0x60] sm:$0xff] %vm3392_vm3, %v3369_v30  ;;  %v3371_v26 = vpop.permute.xlu1 %3370 }
 0x336   : > { %3406 = vst.msk [vmem:[#allocation3 + $0x68] sm:$0xff] %vm3392_vm3, %v3371_v26 }
 0x339   : > { %v3438_v60 = vpop.permute.xlu0 %3437 }
 0x33a   : > { %3480 = vst.msk [vmem:[#allocation3 + $0x30] sm:$0xff] %vm3473_vm4, %v3438_v60 }
 0x33e   : > { %v3440_v48 = vpop.permute.xlu1 %3439 }
 0x33f   : > { %3481 = vst.msk [vmem:[#allocation3 + $0x38] sm:$0xff] %vm3473_vm4, %v3440_v48 }
 0x341   : > { %v3496_v55 = vld [vmem:[#allocation3 + $0x30] sm:$0xff] }
 0x342   : > { %4156 = vmatprep.mubr.msk.f32.mxu1 %vm3507_vm15, %v3496_v55 }
 0x346   : > { %v3497_v18 = vld [vmem:[#allocation3 + $0x38] sm:$0xff] }
 0x347   : > { %4157 = vmatmul.mubr.msk.f32.gmra.mxu1 %vm3507_vm15, %v3497_v18 }
 0x350   : > { %v3373_v56 = vpop.permute.xlu0 %3372 }
 0x351   : > { %3407 = vst.msk [vmem:[#allocation3 + $0x70] sm:$0xff] %vm3392_vm3, %v3373_v56  ;;  %v3375_v63 = vpop.permute.xlu1 %3374 }
 0x352   : > { %3408 = vst.msk [vmem:[#allocation3 + $0x78] sm:$0xff] %vm3392_vm3, %v3375_v63 }
 0x356   : > { %v3442_v62 = vpop.permute.xlu0 %3441 }
 0x357   : > { %3482 = vst.msk [vmem:[#allocation3 + $0x40] sm:$0xff] %vm3473_vm4, %v3442_v62 }
 0x359   : > { %v3444_v50 = vpop.permute.xlu1 %3443 }
 0x35a   : > { %3483 = vst.msk [vmem:[#allocation3 + $0x48] sm:$0xff] %vm3473_vm4, %v3444_v50 }
 0x35b   : > { %v3446_v12 = vpop.permute.xlu0 %3445 }
 0x35c   : > { %3484 = vst.msk [vmem:[#allocation3 + $0x50] sm:$0xff] %vm3473_vm4, %v3446_v12 }
 0x35e   : > { %v3448_v23 = vpop.permute.xlu1 %3447  ;;  %v3498_v19 = vld [vmem:[#allocation3 + $0x40] sm:$0xff] }
 0x35f   : > { %3485 = vst.msk [vmem:[#allocation3 + $0x58] sm:$0xff] %vm3473_vm4, %v3448_v23  ;;  %4159 = vmatprep.mubr.msk.f32.mxu1 %vm3507_vm15, %v3498_v19 }
 0x361   : > { %v3499_v2 = vld [vmem:[#allocation3 + $0x48] sm:$0xff] }
 0x362   : > { %4160 = vmatmul.mubr.msk.f32.gmra.mxu1 %vm3507_vm15, %v3499_v2 }
 0x363   : > { %v3500_v28 = vld [vmem:[#allocation3 + $0x50] sm:$0xff] }
 0x364   : > { %4162 = vmatprep.mubr.msk.f32.mxu1 %vm3507_vm15, %v3500_v28 }
 0x366   : > { %v3501_v37 = vld [vmem:[#allocation3 + $0x58] sm:$0xff] }
 0x367   : > { %4163 = vmatmul.mubr.msk.f32.gmra.mxu1 %vm3507_vm15, %v3501_v37 }
 0x378   : > { %v3450_v47 = vpop.permute.xlu0 %3449 }
 0x379   : > { %3486 = vst.msk [vmem:[#allocation3 + $0x60] sm:$0xff] %vm3473_vm4, %v3450_v47 }
 0x37b   : > { %v3452_v58 = vpop.permute.xlu1 %3451 }
 0x37c   : > { %3487 = vst.msk [vmem:[#allocation3 + $0x68] sm:$0xff] %vm3473_vm4, %v3452_v58 }
 0x380   : > { %v3502_v24 = vld [vmem:[#allocation3 + $0x60] sm:$0xff] }
 0x381   : > { %4165 = vmatprep.mubr.msk.f32.mxu1 %vm3507_vm15, %v3502_v24 }
 0x383   : > { %v3503_v39 = vld [vmem:[#allocation3 + $0x68] sm:$0xff] }
 0x384   : > { %4166 = vmatmul.mubr.msk.f32.gmra.mxu1 %vm3507_vm15, %v3503_v39 }
 0x38d   : > { %v3454_v41 = vpop.permute.xlu0 %3453 }
 0x38e   : > { %3488 = vst.msk [vmem:[#allocation3 + $0x70] sm:$0xff] %vm3473_vm4, %v3454_v41  ;;  %v3456_v42 = vpop.permute.xlu1 %3455 }
 0x38f   : > { %3489 = vst.msk [vmem:[#allocation3 + $0x78] sm:$0xff] %vm3473_vm4, %v3456_v42 }
 0x395   : > { %v3504_v43 = vld [vmem:[#allocation3 + $0x70] sm:$0xff] }
 0x396   : > { %4168 = vmatprep.mubr.msk.f32.mxu1 %vm3507_vm15, %v3504_v43  ;;  %v3505_v33 = vld [vmem:[#allocation3 + $0x78] sm:$0xff] }
 0x397   : > { %4169 = vmatmul.mubr.msk.f32.gmra.mxu1 %vm3507_vm15, %v3505_v33 }
 0x3c5   : > { %v4141_v40 = vpop.f32.mrf.mxu0 }
 0x3c7   : > { %v1170_v25 = vpop.f32.mrf.mxu0 }
 0x3cc   : > { %v4144_v57 = vpop.f32.mrf.mxu0 }
 0x3ce   : > { %v1178_v5 = vpop.f32.mrf.mxu0 }
 0x3d2   : > { %v4149_v9 = vpop.f32.mrf.mxu1 }
 0x3d3   : > { %vm3702_vm5 = vcmp.ge.f32.partialorder %v4149_v9, 0.0  ;;  %v3718_v11 = vmul.f32 0.015625, %v4149_v9 }
 0x3d4   : > { %v3622_v16 = vpop.f32.mrf.mxu1 }
 0x3d5   : > { %v3734_v21 = vsel %vm3702_vm5, %v4149_v9, %v3718_v11  ;;  %vm3701_vm6 = vcmp.ge.f32.partialorder %v3622_v16, 0.0  ;;  %v3717_v31 = vmul.f32 0.015625, %v3622_v16 }
 0x3d6   : > { %3750 = vst.msk [vmem:[%s9109_s17 + $0x8] sm:$0xff] %vm449_vm1, %v3734_v21 }
 0x3d7   : > { %v3733_v53 = vsel %vm3701_vm6, %v3622_v16, %v3717_v31 }
 0x3d8   : > { %3749 = vst.msk [vmem:[%s9109_s17] sm:$0xff] %vm449_vm1, %v3733_v53 }
 0x3e1   : > { %v4152_v4 = vpop.f32.mrf.mxu1 }
 0x3e2   : > { %vm3704_vm14 = vcmp.ge.f32.partialorder %v4152_v4, 0.0  ;;  %v3720_v52 = vmul.f32 0.015625, %v4152_v4 }
 0x3e3   : > { %v3632_v51 = vpop.f32.mrf.mxu1 }
 0x3e4   : > { %v3736_v0 = vsel %vm3704_vm14, %v4152_v4, %v3720_v52  ;;  %vm3703_vm0 = vcmp.ge.f32.partialorder %v3632_v51, 0.0  ;;  %v3719_v38 = vmul.f32 0.015625, %v3632_v51 }
 0x3e5   : > { %3752 = vst.msk [vmem:[%s9109_s17 + $0x18] sm:$0xff] %vm449_vm1, %v3736_v0 }
 0x3e6   : > { %v3735_v20 = vsel %vm3703_vm0, %v3632_v51, %v3719_v38 }
 0x3e7   : > { %3751 = vst.msk [vmem:[%s9109_s17 + $0x10] sm:$0xff] %vm449_vm1, %v3735_v20 }
 0x3ea   : > { %v4155_v10 = vpop.f32.mrf.mxu1 }
 0x3eb   : > { %vm3706_vm7 = vcmp.ge.f32.partialorder %v4155_v10, 0.0  ;;  %v3722_v36 = vmul.f32 0.015625, %v4155_v10 }
 0x3ec   : > { %v3642_v3 = vpop.f32.mrf.mxu1 }
 0x3ed   : > { %v3738_v49 = vsel %vm3706_vm7, %v4155_v10, %v3722_v36  ;;  %vm3705_vm8 = vcmp.ge.f32.partialorder %v3642_v3, 0.0  ;;  %v3721_v46 = vmul.f32 0.015625, %v3642_v3 }
 0x3ee   : > { %3754 = vst.msk [vmem:[%s9109_s17 + $0x28] sm:$0xff] %vm449_vm1, %v3738_v49 }
 0x3ef   : > { %v3737_v34 = vsel %vm3705_vm8, %v3642_v3, %v3721_v46 }
 0x3f0   : > { %3753 = vst.msk [vmem:[%s9109_s17 + $0x20] sm:$0xff] %vm449_vm1, %v3737_v34 }
 0x407   : > { %v4158_v54 = vpop.f32.mrf.mxu1 }
 0x408   : > { %vm3708_vm13 = vcmp.ge.f32.partialorder %v4158_v54, 0.0  ;;  %v3724_v14 = vmul.f32 0.015625, %v4158_v54 }
 0x409   : > { %v3652_v17 = vpop.f32.mrf.mxu1 }
 0x40a   : > { %v3740_v27 = vsel %vm3708_vm13, %v4158_v54, %v3724_v14  ;;  %vm3707_vm9 = vcmp.ge.f32.partialorder %v3652_v17, 0.0  ;;  %v3723_v44 = vmul.f32 0.015625, %v3652_v17 }
 0x40b   : > { %3756 = vst.msk [vmem:[%s9109_s17 + $0x38] sm:$0xff] %vm449_vm1, %v3740_v27 }
 0x40c   : > { %v3739_v6 = vsel %vm3707_vm9, %v3652_v17, %v3723_v44 }
 0x40d   : > { %3755 = vst.msk [vmem:[%s9109_s17 + $0x30] sm:$0xff] %vm449_vm1, %v3739_v6 }
 0x422   : > { %v4161_v8 = vpop.f32.mrf.mxu1 }
 0x423   : > { %vm3710_vm10 = vcmp.ge.f32.partialorder %v4161_v8, 0.0  ;;  %v3726_v59 = vmul.f32 0.015625, %v4161_v8 }
 0x424   : > { %v3662_v22 = vpop.f32.mrf.mxu1 }
 0x425   : > { %v3742_v32 = vsel %vm3710_vm10, %v4161_v8, %v3726_v59  ;;  %vm3709_vm11 = vcmp.ge.f32.partialorder %v3662_v22, 0.0  ;;  %v3725_v13 = vmul.f32 0.015625, %v3662_v22 }
 0x426   : > { %3758 = vst.msk [vmem:[%s9109_s17 + $0x48] sm:$0xff] %vm449_vm1, %v3742_v32 }
 0x427   : > { %v3741_v45 = vsel %vm3709_vm11, %v3662_v22, %v3725_v13  ;;  %v4164_v7 = vpop.f32.mrf.mxu1 }
 0x428   : > { %3757 = vst.msk [vmem:[%s9109_s17 + $0x40] sm:$0xff] %vm449_vm1, %v3741_v45  ;;  %vm3712_vm12 = vcmp.ge.f32.partialorder %v4164_v7, 0.0  ;;  %v3728_v1 = vmul.f32 0.015625, %v4164_v7 }
 0x429   : > { %v3672_v15 = vpop.f32.mrf.mxu1 }
 0x42a   : > { %v3744_v61 = vsel %vm3712_vm12, %v4164_v7, %v3728_v1  ;;  %vm3711_vm2 = vcmp.ge.f32.partialorder %v3672_v15, 0.0  ;;  %v3727_v29 = vmul.f32 0.015625, %v3672_v15 }
 0x42b   : > { %3760 = vst.msk [vmem:[%s9109_s17 + $0x58] sm:$0xff] %vm449_vm1, %v3744_v61 }
 0x42c   : > { %v3743_v35 = vsel %vm3711_vm2, %v3672_v15, %v3727_v29 }
 0x42d   : > { %3759 = vst.msk [vmem:[%s9109_s17 + $0x50] sm:$0xff] %vm449_vm1, %v3743_v35 }
 0x444   : > { %v4167_v30 = vpop.f32.mrf.mxu1 }
 0x445   : > { %vm3714_vm3 = vcmp.ge.f32.partialorder %v4167_v30, 0.0  ;;  %v3730_v26 = vmul.f32 0.015625, %v4167_v30 }
 0x446   : > { %v3682_v60 = vpop.f32.mrf.mxu1 }
 0x447   : > { %v3746_v48 = vsel %vm3714_vm3, %v4167_v30, %v3730_v26  ;;  %vm3713_vm4 = vcmp.ge.f32.partialorder %v3682_v60, 0.0  ;;  %v3729_v55 = vmul.f32 0.015625, %v3682_v60 }
 0x448   : > { %3762 = vst.msk [vmem:[%s9109_s17 + $0x68] sm:$0xff] %vm449_vm1, %v3746_v48 }
 0x449   : > { %v3745_v18 = vsel %vm3713_vm4, %v3682_v60, %v3729_v55 }
 0x44a   : > { %3761 = vst.msk [vmem:[%s9109_s17 + $0x60] sm:$0xff] %vm449_vm1, %v3745_v18 }
 0x457   : > { %v4170_v56 = vpop.f32.mrf.mxu1 }
 0x458   : > { %vm3716_vm15 = vcmp.ge.f32.partialorder %v4170_v56, 0.0  ;;  %v3732_v63 = vmul.f32 0.015625, %v4170_v56 }
 0x459   : > { %v3692_v62 = vpop.f32.mrf.mxu1 }
 0x45a   : > { %v3748_v50 = vsel %vm3716_vm15, %v4170_v56, %v3732_v63  ;;  %vm3715_vm5 = vcmp.ge.f32.partialorder %v3692_v62, 0.0  ;;  %v3731_v12 = vmul.f32 0.015625, %v3692_v62 }
 0x45b   : > { %3764 = vst.msk [vmem:[%s9109_s17 + $0x78] sm:$0xff] %vm449_vm1, %v3748_v50 }
 0x45c   : > { %v3747_v23 = vsel %vm3715_vm5, %v3692_v62, %v3731_v12 }
 0x45d   : > { %3763 = vst.msk [vmem:[%s9109_s17 + $0x70] sm:$0xff] %vm449_vm1, %v3747_v23 }
 0x45e PF: > { %s15_s22 = sadd.s32 1, %s4275_s22   ;;  %s10550_s18 = smov %s4267_s20 }
 0x45f   : > { %p12_p13 = scmp.ge.s32.totalorder %s15_s22, 6   ;;  %s10551_s19 = smov %s4271_s21 }
 0x460   : > { %s10552_s20 = smov %s10555_s23  ;;  %s10553_s21 = smov %s10559_s24 }
 0x461   :  { %14 = sbr.rel (!%p12_p13) target bundleno = 3 (0x3), region = 78 }

</bundles_post_ra>
